<compile_context>
chip_gen: v5e
topology: v5e:2x2
jax: 0.10.0
libtpu: 0.0.40
codegen_flags: <defaults>
</compile_context>

<pallas_src>
import jax
import jax.numpy as jnp
import numpy as np
from jax import lax
from jax.experimental import pallas as pl
from jax.experimental.pallas import tpu as pltpu


def _round_up(v, m):
    return ((v + m - 1) // m) * m


def _dual_gru_kernel(xc_ref, xr_ref, lenc_ref, lenr_ref,
                     wc_ih_ref, bc_ih_ref, wc_hh_ref, bc_hh_ref,
                     wr_ih_ref, br_ih_ref, wr_hh_ref, br_hh_ref,
                     out_ref, gic_ref, gir_ref):
    # xc_ref  : (S_c*Bp, Ec) bf16   time-major ctx embeddings, batch padded to Bp
    # xr_ref  : (S_r*Np, Er) bf16   time-major rsp embeddings, batch padded to Np
    # lenc_ref: (Bp, 1) int32       ctx lengths (0 for pad rows)
    # lenr_ref: (Np, 1) int32       rsp lengths (0 for pad rows)
    # w*_ih   : (E*, 3Hp) bf16      gate blocks [r|z|n], each lane-padded to Hp
    # b*_ih   : (1, 3Hp)  f32
    # w*_hh   : (Hp, 3Hp) bf16      rows H..Hp zero-padded
    # b*_hh   : (1, 3Hp)  f32
    # out_ref : (Bp, Np)  f32       full score matrix <h_ctx[b], h_rsp[n]>
    # gi*_ref : VMEM f32 scratch for the hoisted input projections
    Bp = lenc_ref.shape[0]
    Np = lenr_ref.shape[0]
    Sc = xc_ref.shape[0] // Bp
    Sr = xr_ref.shape[0] // Np
    Hp = wc_hh_ref.shape[0]

    # ---- Hoisted input projections: two MXU matmuls, off the serial path.
    # TODO(synk): store gi in bf16 for production sizes (halves dominant VMEM).
    gic_ref[...] = (jnp.dot(xc_ref[...], wc_ih_ref[...],
                            preferred_element_type=jnp.float32) + bc_ih_ref[...])
    gir_ref[...] = (jnp.dot(xr_ref[...], wr_ih_ref[...],
                            preferred_element_type=jnp.float32) + br_ih_ref[...])

    def run_recurrence(gi_ref, rows, steps, w_hh_ref, b_hh_ref, lens_ref):
        # Loop-invariant loads hoisted out of the step.
        w_hh = w_hh_ref[...]
        b_hh = b_hh_ref[...]
        lens = lens_ref[...]

        def step(t, h):
            # rows is a multiple of 8 -> every slice is sublane aligned.
            row0 = pl.multiple_of(t * rows, rows)
            gi = gi_ref[pl.ds(row0, rows), :]                         # (rows, 3Hp)
            # TODO(synk): keep w_hh resident in the MXU across steps via
            # pltpu.matmul_push_rhs / matmul_acc_lhs / matmul_pop.
            gh = jnp.dot(h.astype(jnp.bfloat16), w_hh,
                         preferred_element_type=jnp.float32) + b_hh   # (rows, 3Hp)
            r = jax.nn.sigmoid(gi[:, 0:Hp] + gh[:, 0:Hp])
            z = jax.nn.sigmoid(gi[:, Hp:2 * Hp] + gh[:, Hp:2 * Hp])
            n = jnp.tanh(gi[:, 2 * Hp:3 * Hp] + r * gh[:, 2 * Hp:3 * Hp])
            h_new = (1.0 - z) * n + z * h
            # Packed-sequence semantics: steps past a row's length keep old h.
            return jnp.where(lens > t, h_new, h)

        # Capped unroll: LLO scheduling visibility without vreg blowup.
        return lax.fori_loop(0, steps, step,
                             jnp.zeros((rows, Hp), jnp.float32),
                             unroll=min(steps, 8))

    h_c = run_recurrence(gic_ref, Bp, Sc, wc_hh_ref, bc_hh_ref, lenc_ref)
    h_r = run_recurrence(gir_ref, Np, Sr, wr_hh_ref, br_hh_ref, lenr_ref)

    # ---- Scoring: one MXU matmul, one dense store (no per-b masked stores).
    # Padded hidden lanes and padded batch rows are exactly zero, so the Hp
    # contraction equals the H contraction.
    out_ref[...] = lax.dot_general(h_c, h_r, (((1,), (1,)), ((), ())),
                                   preferred_element_type=jnp.float32)


def _pad_gate_cols(w, H, Hp):
    """(..., 3H) -> (..., 3Hp): zero-pad each of the r/z/n gate blocks to Hp."""
    if Hp == H:
        return w
    pad = [(0, 0)] * (w.ndim - 1) + [(0, Hp - H)]
    blocks = [jnp.pad(w[..., g * H:(g + 1) * H], pad) for g in range(3)]
    return jnp.concatenate(blocks, axis=-1)


def dual_encoder_forward(ctx_seq, ctx_lens, resp_seq, resp_lens, params):
    """ctx_seq: (S_c, B) int32, resp_seq: (S_r, B*C) int32 (time-major, as in
    prep_batch's .t()).  Returns (B, 1, C) scores == torch ctx.bmm(rsp)."""
    S_c, B = ctx_seq.shape
    S_r, BC = resp_seq.shape
    C = BC // B
    assert C * B == BC, "response batch must be B * n_candidates"
    H = params["wc_hh"].shape[0]
    E_c = params["emb_c"].shape[1]
    E_r = params["emb_r"].shape[1]

    Hp = _round_up(H, 128)     # 128-lane aligned per-gate width
    Bp = _round_up(B, 8)       # 8-sublane aligned ctx batch
    Np = _round_up(BC, 8)      # 8-sublane aligned rsp batch

    # ---- Glue (not the hot path): embedding lookup, padding, weight prep ----
    x_c = params["emb_c"][ctx_seq]                                   # (S_c, B, Ec)
    x_r = params["emb_r"][resp_seq]                                  # (S_r, BC, Er)
    x_c = jnp.pad(x_c, ((0, 0), (0, Bp - B), (0, 0))).astype(jnp.bfloat16)
    x_r = jnp.pad(x_r, ((0, 0), (0, Np - BC), (0, 0))).astype(jnp.bfloat16)
    xc_flat = x_c.reshape(S_c * Bp, E_c)
    xr_flat = x_r.reshape(S_r * Np, E_r)

    # Packed-sequence semantics require lens <= padded length (PyTorch would
    # reject longer); clamp defensively (review correctness concern).
    lens_c = jnp.minimum(ctx_lens.astype(jnp.int32), S_c)
    lens_r = jnp.minimum(resp_lens.astype(jnp.int32), S_r)
    lens_c = jnp.pad(lens_c, (0, Bp - B)).reshape(Bp, 1)              # pad rows -> 0
    lens_r = jnp.pad(lens_r, (0, Np - BC)).reshape(Np, 1)

    # Gate-block lane padding; bf16 weights, f32 biases (padding stays zero).
    wc_ih = _pad_gate_cols(params["wc_ih"], H, Hp).astype(jnp.bfloat16)   # (Ec,3Hp)
    wr_ih = _pad_gate_cols(params["wr_ih"], H, Hp).astype(jnp.bfloat16)   # (Er,3Hp)
    wc_hh = jnp.pad(_pad_gate_cols(params["wc_hh"], H, Hp),
                    ((0, Hp - H), (0, 0))).astype(jnp.bfloat16)           # (Hp,3Hp)
    wr_hh = jnp.pad(_pad_gate_cols(params["wr_hh"], H, Hp),
                    ((0, Hp - H), (0, 0))).astype(jnp.bfloat16)
    bc_ih = _pad_gate_cols(params["bc_ih"], H, Hp)                        # (1,3Hp) f32
    br_ih = _pad_gate_cols(params["br_ih"], H, Hp)
    bc_hh = _pad_gate_cols(params["bc_hh"], H, Hp)
    br_hh = _pad_gate_cols(params["br_hh"], H, Hp)

    # Scoped-VMEM sizing: v5e's default scoped limit is ~16 MiB; clamp below
    # v7x's 64 MiB physical VMEM.
    gi_bytes = 4 * 3 * Hp * (S_c * Bp + S_r * Np)                     # f32 scratches
    in_bytes = (2 * (S_c * Bp * E_c + S_r * Np * E_r
                     + (E_c + E_r + 2 * Hp) * 3 * Hp)                 # bf16 inputs
                + 4 * (4 * 3 * Hp + Bp + Np + Bp * Np))               # f32 bias/lens/out
    vmem_limit = int(min(max(2 * (gi_bytes + in_bytes), 32 << 20), 60 << 20))

    vmem = pl.BlockSpec(memory_space=pltpu.MemorySpace.VMEM)
    scores_full = pl.pallas_call(
        _dual_gru_kernel,
        out_shape=jax.ShapeDtypeStruct((Bp, Np), jnp.float32),
        in_specs=[vmem] * 12,
        out_specs=vmem,
        scratch_shapes=[pltpu.VMEM((S_c * Bp, 3 * Hp), jnp.float32),
                        pltpu.VMEM((S_r * Np, 3 * Hp), jnp.float32)],
        compiler_params=pltpu.CompilerParams(vmem_limit_bytes=vmem_limit),
    )(xc_flat, xr_flat, lens_c, lens_r,
      wc_ih, bc_ih, wc_hh, bc_hh, wr_ih, br_ih, wr_hh, br_hh)

    # score[b, c] = <h_ctx[b], h_rsp[b*C + c]> : block diagonal of full matrix.
    blocks = scores_full[:B, :BC].reshape(B, B, C)
    scores = blocks[jnp.arange(B), jnp.arange(B)]                     # (B, C)
    return scores[:, None, :]                                         # (B, 1, C)


def _reference_forward(ctx_seq, ctx_lens, resp_seq, resp_lens, params):
    """Pure-JAX f32 reference of the same forward (sanity check only)."""
    def run_gru(seq, lens, emb, w_ih, w_hh, b_ih, b_hh):
        S, Bn = seq.shape
        H = w_hh.shape[0]
        x = emb[seq]

        def step(h, inp):
            x_t, t = inp
            gi = x_t @ w_ih + b_ih
            gh = h @ w_hh + b_hh
            r = jax.nn.sigmoid(gi[:, :H] + gh[:, :H])
            z = jax.nn.sigmoid(gi[:, H:2 * H] + gh[:, H:2 * H])
            n = jnp.tanh(gi[:, 2 * H:] + r * gh[:, 2 * H:])
            h_new = (1.0 - z) * n + z * h
            return jnp.where((lens > t)[:, None], h_new, h), None

        h0 = jnp.zeros((Bn, H), jnp.float32)
        h, _ = lax.scan(step, h0, (x, jnp.arange(S)))
        return h

    h_c = run_gru(ctx_seq, ctx_lens, params["emb_c"], params["wc_ih"],
                  params["wc_hh"], params["bc_ih"], params["bc_hh"])
    h_r = run_gru(resp_seq, resp_lens, params["emb_r"], params["wr_ih"],
                  params["wr_hh"], params["br_ih"], params["br_hh"])
    B = ctx_seq.shape[1]
    C = resp_seq.shape[1] // B
    H = h_c.shape[1]
    scores = jnp.einsum("bh,bch->bc", h_c, h_r.reshape(B, C, H))
    return scores[:, None, :]


def init_params(key, vocab=50, emb_size=32, hid_size=32):
    H, E = hid_size, emb_size
    keys = jax.random.split(key, 10)
    s = 0.1

    def rnd(k, shape):
        return s * jax.random.normal(k, shape, dtype=jnp.float32)

    return {
        # context encoder: embedding + 1-layer unidirectional GRU (transposed weights)
        "emb_c": rnd(keys[0], (vocab, E)),
        "wc_ih": rnd(keys[1], (E, 3 * H)),
        "wc_hh": rnd(keys[2], (H, 3 * H)),
        "bc_ih": rnd(keys[3], (1, 3 * H)),
        "bc_hh": rnd(keys[4], (1, 3 * H)),
        # response encoder
        "emb_r": rnd(keys[5], (vocab, E)),
        "wr_ih": rnd(keys[6], (E, 3 * H)),
        "wr_hh": rnd(keys[7], (H, 3 * H)),
        "br_ih": rnd(keys[8], (1, 3 * H)),
        "br_hh": rnd(keys[9], (1, 3 * H)),
    }


if __name__ == "__main__":
    key = jax.random.PRNGKey(0)
    k_par, k_ctx, k_rsp = jax.random.split(key, 3)

    S_c, S_r, B, C = 8, 6, 2, 2          # seq lens, contexts, candidates/context
    vocab, E, H = 50, 32, 32

    params = init_params(k_par, vocab=vocab, emb_size=E, hid_size=H)

    ctx_seq = jax.random.randint(k_ctx, (S_c, B), 0, vocab, dtype=jnp.int32)
    resp_seq = jax.random.randint(k_rsp, (S_r, B * C), 0, vocab, dtype=jnp.int32)
    ctx_lens = jnp.array([8, 5], dtype=jnp.int32)        # right-padded batches
    resp_lens = jnp.array([6, 4, 5, 3], dtype=jnp.int32)

    scores = dual_encoder_forward(ctx_seq, ctx_lens, resp_seq, resp_lens, params)
    jax.block_until_ready(scores)

    assert scores.shape == (B, 1, C)
    assert scores.dtype == jnp.float32

    ref = _reference_forward(ctx_seq, ctx_lens, resp_seq, resp_lens, params)
    np.testing.assert_allclose(np.asarray(scores), np.asarray(ref),
                               rtol=0.0, atol=2e-2)      # bf16 matmul tolerance

    print("KERNEL_OK")
</pallas_src>

<mosaic_0001>
module attributes {stable_mosaic.version = 11 : i64} {
  func.func @_dual_gru_kernel(%arg0: memref<64x32xbf16, #tpu.memory_space<vmem>>, %arg1: memref<48x32xbf16, #tpu.memory_space<vmem>>, %arg2: memref<8x1xi32, #tpu.memory_space<vmem>>, %arg3: memref<8x1xi32, #tpu.memory_space<vmem>>, %arg4: memref<32x384xbf16, #tpu.memory_space<vmem>>, %arg5: memref<1x384xf32, #tpu.memory_space<vmem>>, %arg6: memref<128x384xbf16, #tpu.memory_space<vmem>>, %arg7: memref<1x384xf32, #tpu.memory_space<vmem>>, %arg8: memref<32x384xbf16, #tpu.memory_space<vmem>>, %arg9: memref<1x384xf32, #tpu.memory_space<vmem>>, %arg10: memref<128x384xbf16, #tpu.memory_space<vmem>>, %arg11: memref<1x384xf32, #tpu.memory_space<vmem>>, %arg12: memref<8x8xf32, #tpu.memory_space<vmem>>, %arg13: memref<64x384xf32, #tpu.memory_space<vmem>>, %arg14: memref<48x384xf32, #tpu.memory_space<vmem>>) attributes {dimension_semantics = [], scalar_prefetch = 0 : i64, scratch_operands = 2 : i64, tpu.core_type = #tpu.core_type<tc>} {
    %c0 = arith.constant 0 : index
    %c0_0 = arith.constant 0 : index
    %0 = vector.load %arg0[%c0, %c0_0] : memref<64x32xbf16, #tpu.memory_space<vmem>>, vector<64x32xbf16>
    %c0_1 = arith.constant 0 : index
    %c0_2 = arith.constant 0 : index
    %1 = vector.load %arg4[%c0_1, %c0_2] : memref<32x384xbf16, #tpu.memory_space<vmem>>, vector<32x384xbf16>
    %cst = arith.constant dense<0.000000e+00> : vector<64x384xf32>
    %2 = tpu.matmul %0, %1, %cst {dimension_numbers = #tpu.dot_dimension_numbers<[1], [0], [0], [1], [0, 0, 1, 1], [], []>} : vector<64x32xbf16>, vector<32x384xbf16>, vector<64x384xf32> -> vector<64x384xf32>
    %c0_3 = arith.constant 0 : index
    %c0_4 = arith.constant 0 : index
    %3 = vector.load %arg5[%c0_3, %c0_4] : memref<1x384xf32, #tpu.memory_space<vmem>>, vector<1x384xf32>
    %4 = vector.broadcast %3 : vector<1x384xf32> to vector<64x384xf32>
    %5 = arith.addf %2, %4 : vector<64x384xf32>
    %c0_5 = arith.constant 0 : index
    %c0_6 = arith.constant 0 : index
    %6 = vector.load %arg13[%c0_5, %c0_6] : memref<64x384xf32, #tpu.memory_space<vmem>>, vector<64x384xf32>
    tpu.vector_store %arg13[%c0_5, %c0_6], %5 {strides = array<i32>} : memref<64x384xf32, #tpu.memory_space<vmem>>, vector<64x384xf32>,
    %c0_7 = arith.constant 0 : index
    %c0_8 = arith.constant 0 : index
    %7 = vector.load %arg1[%c0_7, %c0_8] : memref<48x32xbf16, #tpu.memory_space<vmem>>, vector<48x32xbf16>
    %c0_9 = arith.constant 0 : index
    %c0_10 = arith.constant 0 : index
    %8 = vector.load %arg8[%c0_9, %c0_10] : memref<32x384xbf16, #tpu.memory_space<vmem>>, vector<32x384xbf16>
    %cst_11 = arith.constant dense<0.000000e+00> : vector<48x384xf32>
    %9 = tpu.matmul %7, %8, %cst_11 {dimension_numbers = #tpu.dot_dimension_numbers<[1], [0], [0], [1], [0, 0, 1, 1], [], []>} : vector<48x32xbf16>, vector<32x384xbf16>, vector<48x384xf32> -> vector<48x384xf32>
    %c0_12 = arith.constant 0 : index
    %c0_13 = arith.constant 0 : index
    %10 = vector.load %arg9[%c0_12, %c0_13] : memref<1x384xf32, #tpu.memory_space<vmem>>, vector<1x384xf32>
    %11 = vector.broadcast %10 : vector<1x384xf32> to vector<48x384xf32>
    %12 = arith.addf %9, %11 : vector<48x384xf32>
    %c0_14 = arith.constant 0 : index
    %c0_15 = arith.constant 0 : index
    %13 = vector.load %arg14[%c0_14, %c0_15] : memref<48x384xf32, #tpu.memory_space<vmem>>, vector<48x384xf32>
    tpu.vector_store %arg14[%c0_14, %c0_15], %12 {strides = array<i32>} : memref<48x384xf32, #tpu.memory_space<vmem>>, vector<48x384xf32>,
    %c0_16 = arith.constant 0 : index
    %c0_17 = arith.constant 0 : index
    %14 = vector.load %arg6[%c0_16, %c0_17] : memref<128x384xbf16, #tpu.memory_space<vmem>>, vector<128x384xbf16>
    %c0_18 = arith.constant 0 : index
    %c0_19 = arith.constant 0 : index
    %15 = vector.load %arg7[%c0_18, %c0_19] : memref<1x384xf32, #tpu.memory_space<vmem>>, vector<1x384xf32>
    %c0_20 = arith.constant 0 : index
    %c0_21 = arith.constant 0 : index
    %16 = vector.load %arg2[%c0_20, %c0_21] : memref<8x1xi32, #tpu.memory_space<vmem>>, vector<8x1xi32>
    %cst_22 = arith.constant 0.000000e+00 : f32
    %17 = vector.broadcast %cst_22 : f32 to vector<8x128xf32>
    %c0_i32 = arith.constant 0 : i32
    %c8_i32 = arith.constant 8 : i32
    %18 = arith.muli %c0_i32, %c8_i32 : i32
    %19 = tpu.assume_multiple %18, 8 : i32
    %20 = arith.index_cast %19 : i32 to index
    %c0_23 = arith.constant 0 : index
    %21 = vector.load %arg13[%20, %c0_23] : memref<64x384xf32, #tpu.memory_space<vmem>>, vector<8x384xf32>
    %22 = arith.truncf %17 : vector<8x128xf32> to vector<8x128xbf16>
    %cst_24 = arith.constant dense<0.000000e+00> : vector<8x384xf32>
    %23 = tpu.matmul %22, %14, %cst_24 {dimension_numbers = #tpu.dot_dimension_numbers<[1], [0], [0], [1], [0, 0, 1, 1], [], []>} : vector<8x128xbf16>, vector<128x384xbf16>, vector<8x384xf32> -> vector<8x384xf32>
    %24 = vector.broadcast %15 : vector<1x384xf32> to vector<8x384xf32>
    %25 = arith.addf %23, %24 : vector<8x384xf32>
    %26 = vector.extract_strided_slice %21 {offsets = [0, 0], sizes = [8, 128], strides = [1, 1]} : vector<8x384xf32> to vector<8x128xf32>
    %27 = vector.extract_strided_slice %25 {offsets = [0, 0], sizes = [8, 128], strides = [1, 1]} : vector<8x384xf32> to vector<8x128xf32>
    %28 = arith.addf %26, %27 : vector<8x128xf32>
    %29 = arith.negf %28 : vector<8x128xf32>
    %30 = math.exp %29 : vector<8x128xf32>
    %cst_25 = arith.constant 1.000000e+00 : f32
    %31 = vector.broadcast %cst_25 : f32 to vector<8x128xf32>
    %32 = arith.addf %31, %30 : vector<8x128xf32>
    %33 = arith.divf %31, %32 : vector<8x128xf32>
    %34 = vector.extract_strided_slice %21 {offsets = [0, 128], sizes = [8, 128], strides = [1, 1]} : vector<8x384xf32> to vector<8x128xf32>
    %35 = vector.extract_strided_slice %25 {offsets = [0, 128], sizes = [8, 128], strides = [1, 1]} : vector<8x384xf32> to vector<8x128xf32>
    %36 = arith.addf %34, %35 : vector<8x128xf32>
    %37 = arith.negf %36 : vector<8x128xf32>
    %38 = math.exp %37 : vector<8x128xf32>
    %cst_26 = arith.constant 1.000000e+00 : f32
    %39 = vector.broadcast %cst_26 : f32 to vector<8x128xf32>
    %40 = arith.addf %39, %38 : vector<8x128xf32>
    %41 = arith.divf %39, %40 : vector<8x128xf32>
    %42 = vector.extract_strided_slice %21 {offsets = [0, 256], sizes = [8, 128], strides = [1, 1]} : vector<8x384xf32> to vector<8x128xf32>
    %43 = vector.extract_strided_slice %25 {offsets = [0, 256], sizes = [8, 128], strides = [1, 1]} : vector<8x384xf32> to vector<8x128xf32>
    %44 = arith.mulf %33, %43 : vector<8x128xf32>
    %45 = arith.addf %42, %44 : vector<8x128xf32>
    %46 = math.tanh %45 : vector<8x128xf32>
    %cst_27 = arith.constant 1.000000e+00 : f32
    %47 = vector.broadcast %cst_27 : f32 to vector<8x128xf32>
    %48 = arith.subf %47, %41 : vector<8x128xf32>
    %49 = arith.mulf %48, %46 : vector<8x128xf32>
    %50 = arith.mulf %41, %17 : vector<8x128xf32>
    %51 = arith.addf %49, %50 : vector<8x128xf32>
    %52 = vector.broadcast %c0_i32 : i32 to vector<8x1xi32>
    %53 = arith.cmpi sgt, %16, %52 : vector<8x1xi32>
    %54 = vector.shape_cast %53 : vector<8x1xi1> to vector<8x1xi1>
    %55 = vector.broadcast %54 : vector<8x1xi1> to vector<8x128xi1>
    %56 = arith.select %55, %51, %17 : vector<8x128xi1>, vector<8x128xf32>
    %c1_i32 = arith.constant 1 : i32
    %c8_i32_28 = arith.constant 8 : i32
    %57 = arith.muli %c1_i32, %c8_i32_28 : i32
    %58 = tpu.assume_multiple %57, 8 : i32
    %59 = arith.index_cast %58 : i32 to index
    %c0_29 = arith.constant 0 : index
    %60 = vector.load %arg13[%59, %c0_29] : memref<64x384xf32, #tpu.memory_space<vmem>>, vector<8x384xf32>
    %61 = arith.truncf %56 : vector<8x128xf32> to vector<8x128xbf16>
    %cst_30 = arith.constant dense<0.000000e+00> : vector<8x384xf32>
    %62 = tpu.matmul %61, %14, %cst_30 {dimension_numbers = #tpu.dot_dimension_numbers<[1], [0], [0], [1], [0, 0, 1, 1], [], []>} : vector<8x128xbf16>, vector<128x384xbf16>, vector<8x384xf32> -> vector<8x384xf32>
    %63 = vector.broadcast %15 : vector<1x384xf32> to vector<8x384xf32>
    %64 = arith.addf %62, %63 : vector<8x384xf32>
    %65 = vector.extract_strided_slice %60 {offsets = [0, 0], sizes = [8, 128], strides = [1, 1]} : vector<8x384xf32> to vector<8x128xf32>
    %66 = vector.extract_strided_slice %64 {offsets = [0, 0], sizes = [8, 128], strides = [1, 1]} : vector<8x384xf32> to vector<8x128xf32>
    %67 = arith.addf %65, %66 : vector<8x128xf32>
    %68 = arith.negf %67 : vector<8x128xf32>
    %69 = math.exp %68 : vector<8x128xf32>
    %cst_31 = arith.constant 1.000000e+00 : f32
    %70 = vector.broadcast %cst_31 : f32 to vector<8x128xf32>
    %71 = arith.addf %70, %69 : vector<8x128xf32>
    %72 = arith.divf %70, %71 : vector<8x128xf32>
    %73 = vector.extract_strided_slice %60 {offsets = [0, 128], sizes = [8, 128], strides = [1, 1]} : vector<8x384xf32> to vector<8x128xf32>
    %74 = vector.extract_strided_slice %64 {offsets = [0, 128], sizes = [8, 128], strides = [1, 1]} : vector<8x384xf32> to vector<8x128xf32>
    %75 = arith.addf %73, %74 : vector<8x128xf32>
    %76 = arith.negf %75 : vector<8x128xf32>
    %77 = math.exp %76 : vector<8x128xf32>
    %cst_32 = arith.constant 1.000000e+00 : f32
    %78 = vector.broadcast %cst_32 : f32 to vector<8x128xf32>
    %79 = arith.addf %78, %77 : vector<8x128xf32>
    %80 = arith.divf %78, %79 : vector<8x128xf32>
    %81 = vector.extract_strided_slice %60 {offsets = [0, 256], sizes = [8, 128], strides = [1, 1]} : vector<8x384xf32> to vector<8x128xf32>
    %82 = vector.extract_strided_slice %64 {offsets = [0, 256], sizes = [8, 128], strides = [1, 1]} : vector<8x384xf32> to vector<8x128xf32>
    %83 = arith.mulf %72, %82 : vector<8x128xf32>
    %84 = arith.addf %81, %83 : vector<8x128xf32>
    %85 = math.tanh %84 : vector<8x128xf32>
    %cst_33 = arith.constant 1.000000e+00 : f32
    %86 = vector.broadcast %cst_33 : f32 to vector<8x128xf32>
    %87 = arith.subf %86, %80 : vector<8x128xf32>
    %88 = arith.mulf %87, %85 : vector<8x128xf32>
    %89 = arith.mulf %80, %56 : vector<8x128xf32>
    %90 = arith.addf %88, %89 : vector<8x128xf32>
    %91 = vector.broadcast %c1_i32 : i32 to vector<8x1xi32>
    %92 = arith.cmpi sgt, %16, %91 : vector<8x1xi32>
    %93 = vector.shape_cast %92 : vector<8x1xi1> to vector<8x1xi1>
    %94 = vector.broadcast %93 : vector<8x1xi1> to vector<8x128xi1>
    %95 = arith.select %94, %90, %56 : vector<8x128xi1>, vector<8x128xf32>
    %c2_i32 = arith.constant 2 : i32
    %c8_i32_34 = arith.constant 8 : i32
    %96 = arith.muli %c2_i32, %c8_i32_34 : i32
    %97 = tpu.assume_multiple %96, 8 : i32
    %98 = arith.index_cast %97 : i32 to index
    %c0_35 = arith.constant 0 : index
    %99 = vector.load %arg13[%98, %c0_35] : memref<64x384xf32, #tpu.memory_space<vmem>>, vector<8x384xf32>
    %100 = arith.truncf %95 : vector<8x128xf32> to vector<8x128xbf16>
    %cst_36 = arith.constant dense<0.000000e+00> : vector<8x384xf32>
    %101 = tpu.matmul %100, %14, %cst_36 {dimension_numbers = #tpu.dot_dimension_numbers<[1], [0], [0], [1], [0, 0, 1, 1], [], []>} : vector<8x128xbf16>, vector<128x384xbf16>, vector<8x384xf32> -> vector<8x384xf32>
    %102 = vector.broadcast %15 : vector<1x384xf32> to vector<8x384xf32>
    %103 = arith.addf %101, %102 : vector<8x384xf32>
    %104 = vector.extract_strided_slice %99 {offsets = [0, 0], sizes = [8, 128], strides = [1, 1]} : vector<8x384xf32> to vector<8x128xf32>
    %105 = vector.extract_strided_slice %103 {offsets = [0, 0], sizes = [8, 128], strides = [1, 1]} : vector<8x384xf32> to vector<8x128xf32>
    %106 = arith.addf %104, %105 : vector<8x128xf32>
    %107 = arith.negf %106 : vector<8x128xf32>
    %108 = math.exp %107 : vector<8x128xf32>
    %cst_37 = arith.constant 1.000000e+00 : f32
    %109 = vector.broadcast %cst_37 : f32 to vector<8x128xf32>
    %110 = arith.addf %109, %108 : vector<8x128xf32>
    %111 = arith.divf %109, %110 : vector<8x128xf32>
    %112 = vector.extract_strided_slice %99 {offsets = [0, 128], sizes = [8, 128], strides = [1, 1]} : vector<8x384xf32> to vector<8x128xf32>
    %113 = vector.extract_strided_slice %103 {offsets = [0, 128], sizes = [8, 128], strides = [1, 1]} : vector<8x384xf32> to vector<8x128xf32>
    %114 = arith.addf %112, %113 : vector<8x128xf32>
    %115 = arith.negf %114 : vector<8x128xf32>
    %116 = math.exp %115 : vector<8x128xf32>
    %cst_38 = arith.constant 1.000000e+00 : f32
    %117 = vector.broadcast %cst_38 : f32 to vector<8x128xf32>
    %118 = arith.addf %117, %116 : vector<8x128xf32>
    %119 = arith.divf %117, %118 : vector<8x128xf32>
    %120 = vector.extract_strided_slice %99 {offsets = [0, 256], sizes = [8, 128], strides = [1, 1]} : vector<8x384xf32> to vector<8x128xf32>
    %121 = vector.extract_strided_slice %103 {offsets = [0, 256], sizes = [8, 128], strides = [1, 1]} : vector<8x384xf32> to vector<8x128xf32>
    %122 = arith.mulf %111, %121 : vector<8x128xf32>
    %123 = arith.addf %120, %122 : vector<8x128xf32>
    %124 = math.tanh %123 : vector<8x128xf32>
    %cst_39 = arith.constant 1.000000e+00 : f32
    %125 = vector.broadcast %cst_39 : f32 to vector<8x128xf32>
    %126 = arith.subf %125, %119 : vector<8x128xf32>
    %127 = arith.mulf %126, %124 : vector<8x128xf32>
    %128 = arith.mulf %119, %95 : vector<8x128xf32>
    %129 = arith.addf %127, %128 : vector<8x128xf32>
    %130 = vector.broadcast %c2_i32 : i32 to vector<8x1xi32>
    %131 = arith.cmpi sgt, %16, %130 : vector<8x1xi32>
    %132 = vector.shape_cast %131 : vector<8x1xi1> to vector<8x1xi1>
    %133 = vector.broadcast %132 : vector<8x1xi1> to vector<8x128xi1>
    %134 = arith.select %133, %129, %95 : vector<8x128xi1>, vector<8x128xf32>
    %c3_i32 = arith.constant 3 : i32
    %c8_i32_40 = arith.constant 8 : i32
    %135 = arith.muli %c3_i32, %c8_i32_40 : i32
    %136 = tpu.assume_multiple %135, 8 : i32
    %137 = arith.index_cast %136 : i32 to index
    %c0_41 = arith.constant 0 : index
    %138 = vector.load %arg13[%137, %c0_41] : memref<64x384xf32, #tpu.memory_space<vmem>>, vector<8x384xf32>
    %139 = arith.truncf %134 : vector<8x128xf32> to vector<8x128xbf16>
    %cst_42 = arith.constant dense<0.000000e+00> : vector<8x384xf32>
    %140 = tpu.matmul %139, %14, %cst_42 {dimension_numbers = #tpu.dot_dimension_numbers<[1], [0], [0], [1], [0, 0, 1, 1], [], []>} : vector<8x128xbf16>, vector<128x384xbf16>, vector<8x384xf32> -> vector<8x384xf32>
    %141 = vector.broadcast %15 : vector<1x384xf32> to vector<8x384xf32>
    %142 = arith.addf %140, %141 : vector<8x384xf32>
    %143 = vector.extract_strided_slice %138 {offsets = [0, 0], sizes = [8, 128], strides = [1, 1]} : vector<8x384xf32> to vector<8x128xf32>
    %144 = vector.extract_strided_slice %142 {offsets = [0, 0], sizes = [8, 128], strides = [1, 1]} : vector<8x384xf32> to vector<8x128xf32>
    %145 = arith.addf %143, %144 : vector<8x128xf32>
    %146 = arith.negf %145 : vector<8x128xf32>
    %147 = math.exp %146 : vector<8x128xf32>
    %cst_43 = arith.constant 1.000000e+00 : f32
    %148 = vector.broadcast %cst_43 : f32 to vector<8x128xf32>
    %149 = arith.addf %148, %147 : vector<8x128xf32>
    %150 = arith.divf %148, %149 : vector<8x128xf32>
    %151 = vector.extract_strided_slice %138 {offsets = [0, 128], sizes = [8, 128], strides = [1, 1]} : vector<8x384xf32> to vector<8x128xf32>
    %152 = vector.extract_strided_slice %142 {offsets = [0, 128], sizes = [8, 128], strides = [1, 1]} : vector<8x384xf32> to vector<8x128xf32>
    %153 = arith.addf %151, %152 : vector<8x128xf32>
    %154 = arith.negf %153 : vector<8x128xf32>
    %155 = math.exp %154 : vector<8x128xf32>
    %cst_44 = arith.constant 1.000000e+00 : f32
    %156 = vector.broadcast %cst_44 : f32 to vector<8x128xf32>
    %157 = arith.addf %156, %155 : vector<8x128xf32>
    %158 = arith.divf %156, %157 : vector<8x128xf32>
    %159 = vector.extract_strided_slice %138 {offsets = [0, 256], sizes = [8, 128], strides = [1, 1]} : vector<8x384xf32> to vector<8x128xf32>
    %160 = vector.extract_strided_slice %142 {offsets = [0, 256], sizes = [8, 128], strides = [1, 1]} : vector<8x384xf32> to vector<8x128xf32>
    %161 = arith.mulf %150, %160 : vector<8x128xf32>
    %162 = arith.addf %159, %161 : vector<8x128xf32>
    %163 = math.tanh %162 : vector<8x128xf32>
    %cst_45 = arith.constant 1.000000e+00 : f32
    %164 = vector.broadcast %cst_45 : f32 to vector<8x128xf32>
    %165 = arith.subf %164, %158 : vector<8x128xf32>
    %166 = arith.mulf %165, %163 : vector<8x128xf32>
    %167 = arith.mulf %158, %134 : vector<8x128xf32>
    %168 = arith.addf %166, %167 : vector<8x128xf32>
    %169 = vector.broadcast %c3_i32 : i32 to vector<8x1xi32>
    %170 = arith.cmpi sgt, %16, %169 : vector<8x1xi32>
    %171 = vector.shape_cast %170 : vector<8x1xi1> to vector<8x1xi1>
    %172 = vector.broadcast %171 : vector<8x1xi1> to vector<8x128xi1>
    %173 = arith.select %172, %168, %134 : vector<8x128xi1>, vector<8x128xf32>
    %c4_i32 = arith.constant 4 : i32
    %c8_i32_46 = arith.constant 8 : i32
    %174 = arith.muli %c4_i32, %c8_i32_46 : i32
    %175 = tpu.assume_multiple %174, 8 : i32
    %176 = arith.index_cast %175 : i32 to index
    %c0_47 = arith.constant 0 : index
    %177 = vector.load %arg13[%176, %c0_47] : memref<64x384xf32, #tpu.memory_space<vmem>>, vector<8x384xf32>
    %178 = arith.truncf %173 : vector<8x128xf32> to vector<8x128xbf16>
    %cst_48 = arith.constant dense<0.000000e+00> : vector<8x384xf32>
    %179 = tpu.matmul %178, %14, %cst_48 {dimension_numbers = #tpu.dot_dimension_numbers<[1], [0], [0], [1], [0, 0, 1, 1], [], []>} : vector<8x128xbf16>, vector<128x384xbf16>, vector<8x384xf32> -> vector<8x384xf32>
    %180 = vector.broadcast %15 : vector<1x384xf32> to vector<8x384xf32>
    %181 = arith.addf %179, %180 : vector<8x384xf32>
    %182 = vector.extract_strided_slice %177 {offsets = [0, 0], sizes = [8, 128], strides = [1, 1]} : vector<8x384xf32> to vector<8x128xf32>
    %183 = vector.extract_strided_slice %181 {offsets = [0, 0], sizes = [8, 128], strides = [1, 1]} : vector<8x384xf32> to vector<8x128xf32>
    %184 = arith.addf %182, %183 : vector<8x128xf32>
    %185 = arith.negf %184 : vector<8x128xf32>
    %186 = math.exp %185 : vector<8x128xf32>
    %cst_49 = arith.constant 1.000000e+00 : f32
    %187 = vector.broadcast %cst_49 : f32 to vector<8x128xf32>
    %188 = arith.addf %187, %186 : vector<8x128xf32>
    %189 = arith.divf %187, %188 : vector<8x128xf32>
    %190 = vector.extract_strided_slice %177 {offsets = [0, 128], sizes = [8, 128], strides = [1, 1]} : vector<8x384xf32> to vector<8x128xf32>
    %191 = vector.extract_strided_slice %181 {offsets = [0, 128], sizes = [8, 128], strides = [1, 1]} : vector<8x384xf32> to vector<8x128xf32>
    %192 = arith.addf %190, %191 : vector<8x128xf32>
    %193 = arith.negf %192 : vector<8x128xf32>
    %194 = math.exp %193 : vector<8x128xf32>
    %cst_50 = arith.constant 1.000000e+00 : f32
    %195 = vector.broadcast %cst_50 : f32 to vector<8x128xf32>
    %196 = arith.addf %195, %194 : vector<8x128xf32>
    %197 = arith.divf %195, %196 : vector<8x128xf32>
    %198 = vector.extract_strided_slice %177 {offsets = [0, 256], sizes = [8, 128], strides = [1, 1]} : vector<8x384xf32> to vector<8x128xf32>
    %199 = vector.extract_strided_slice %181 {offsets = [0, 256], sizes = [8, 128], strides = [1, 1]} : vector<8x384xf32> to vector<8x128xf32>
    %200 = arith.mulf %189, %199 : vector<8x128xf32>
    %201 = arith.addf %198, %200 : vector<8x128xf32>
    %202 = math.tanh %201 : vector<8x128xf32>
    %cst_51 = arith.constant 1.000000e+00 : f32
    %203 = vector.broadcast %cst_51 : f32 to vector<8x128xf32>
    %204 = arith.subf %203, %197 : vector<8x128xf32>
    %205 = arith.mulf %204, %202 : vector<8x128xf32>
    %206 = arith.mulf %197, %173 : vector<8x128xf32>
    %207 = arith.addf %205, %206 : vector<8x128xf32>
    %208 = vector.broadcast %c4_i32 : i32 to vector<8x1xi32>
    %209 = arith.cmpi sgt, %16, %208 : vector<8x1xi32>
    %210 = vector.shape_cast %209 : vector<8x1xi1> to vector<8x1xi1>
    %211 = vector.broadcast %210 : vector<8x1xi1> to vector<8x128xi1>
    %212 = arith.select %211, %207, %173 : vector<8x128xi1>, vector<8x128xf32>
    %c5_i32 = arith.constant 5 : i32
    %c8_i32_52 = arith.constant 8 : i32
    %213 = arith.muli %c5_i32, %c8_i32_52 : i32
    %214 = tpu.assume_multiple %213, 8 : i32
    %215 = arith.index_cast %214 : i32 to index
    %c0_53 = arith.constant 0 : index
    %216 = vector.load %arg13[%215, %c0_53] : memref<64x384xf32, #tpu.memory_space<vmem>>, vector<8x384xf32>
    %217 = arith.truncf %212 : vector<8x128xf32> to vector<8x128xbf16>
    %cst_54 = arith.constant dense<0.000000e+00> : vector<8x384xf32>
    %218 = tpu.matmul %217, %14, %cst_54 {dimension_numbers = #tpu.dot_dimension_numbers<[1], [0], [0], [1], [0, 0, 1, 1], [], []>} : vector<8x128xbf16>, vector<128x384xbf16>, vector<8x384xf32> -> vector<8x384xf32>
    %219 = vector.broadcast %15 : vector<1x384xf32> to vector<8x384xf32>
    %220 = arith.addf %218, %219 : vector<8x384xf32>
    %221 = vector.extract_strided_slice %216 {offsets = [0, 0], sizes = [8, 128], strides = [1, 1]} : vector<8x384xf32> to vector<8x128xf32>
    %222 = vector.extract_strided_slice %220 {offsets = [0, 0], sizes = [8, 128], strides = [1, 1]} : vector<8x384xf32> to vector<8x128xf32>
    %223 = arith.addf %221, %222 : vector<8x128xf32>
    %224 = arith.negf %223 : vector<8x128xf32>
    %225 = math.exp %224 : vector<8x128xf32>
    %cst_55 = arith.constant 1.000000e+00 : f32
    %226 = vector.broadcast %cst_55 : f32 to vector<8x128xf32>
    %227 = arith.addf %226, %225 : vector<8x128xf32>
    %228 = arith.divf %226, %227 : vector<8x128xf32>
    %229 = vector.extract_strided_slice %216 {offsets = [0, 128], sizes = [8, 128], strides = [1, 1]} : vector<8x384xf32> to vector<8x128xf32>
    %230 = vector.extract_strided_slice %220 {offsets = [0, 128], sizes = [8, 128], strides = [1, 1]} : vector<8x384xf32> to vector<8x128xf32>
    %231 = arith.addf %229, %230 : vector<8x128xf32>
    %232 = arith.negf %231 : vector<8x128xf32>
    %233 = math.exp %232 : vector<8x128xf32>
    %cst_56 = arith.constant 1.000000e+00 : f32
    %234 = vector.broadcast %cst_56 : f32 to vector<8x128xf32>
    %235 = arith.addf %234, %233 : vector<8x128xf32>
    %236 = arith.divf %234, %235 : vector<8x128xf32>
    %237 = vector.extract_strided_slice %216 {offsets = [0, 256], sizes = [8, 128], strides = [1, 1]} : vector<8x384xf32> to vector<8x128xf32>
    %238 = vector.extract_strided_slice %220 {offsets = [0, 256], sizes = [8, 128], strides = [1, 1]} : vector<8x384xf32> to vector<8x128xf32>
    %239 = arith.mulf %228, %238 : vector<8x128xf32>
    %240 = arith.addf %237, %239 : vector<8x128xf32>
    %241 = math.tanh %240 : vector<8x128xf32>
    %cst_57 = arith.constant 1.000000e+00 : f32
    %242 = vector.broadcast %cst_57 : f32 to vector<8x128xf32>
    %243 = arith.subf %242, %236 : vector<8x128xf32>
    %244 = arith.mulf %243, %241 : vector<8x128xf32>
    %245 = arith.mulf %236, %212 : vector<8x128xf32>
    %246 = arith.addf %244, %245 : vector<8x128xf32>
    %247 = vector.broadcast %c5_i32 : i32 to vector<8x1xi32>
    %248 = arith.cmpi sgt, %16, %247 : vector<8x1xi32>
    %249 = vector.shape_cast %248 : vector<8x1xi1> to vector<8x1xi1>
    %250 = vector.broadcast %249 : vector<8x1xi1> to vector<8x128xi1>
    %251 = arith.select %250, %246, %212 : vector<8x128xi1>, vector<8x128xf32>
    %c6_i32 = arith.constant 6 : i32
    %c8_i32_58 = arith.constant 8 : i32
    %252 = arith.muli %c6_i32, %c8_i32_58 : i32
    %253 = tpu.assume_multiple %252, 8 : i32
    %254 = arith.index_cast %253 : i32 to index
    %c0_59 = arith.constant 0 : index
    %255 = vector.load %arg13[%254, %c0_59] : memref<64x384xf32, #tpu.memory_space<vmem>>, vector<8x384xf32>
    %256 = arith.truncf %251 : vector<8x128xf32> to vector<8x128xbf16>
    %cst_60 = arith.constant dense<0.000000e+00> : vector<8x384xf32>
    %257 = tpu.matmul %256, %14, %cst_60 {dimension_numbers = #tpu.dot_dimension_numbers<[1], [0], [0], [1], [0, 0, 1, 1], [], []>} : vector<8x128xbf16>, vector<128x384xbf16>, vector<8x384xf32> -> vector<8x384xf32>
    %258 = vector.broadcast %15 : vector<1x384xf32> to vector<8x384xf32>
    %259 = arith.addf %257, %258 : vector<8x384xf32>
    %260 = vector.extract_strided_slice %255 {offsets = [0, 0], sizes = [8, 128], strides = [1, 1]} : vector<8x384xf32> to vector<8x128xf32>
    %261 = vector.extract_strided_slice %259 {offsets = [0, 0], sizes = [8, 128], strides = [1, 1]} : vector<8x384xf32> to vector<8x128xf32>
    %262 = arith.addf %260, %261 : vector<8x128xf32>
    %263 = arith.negf %262 : vector<8x128xf32>
    %264 = math.exp %263 : vector<8x128xf32>
    %cst_61 = arith.constant 1.000000e+00 : f32
    %265 = vector.broadcast %cst_61 : f32 to vector<8x128xf32>
    %266 = arith.addf %265, %264 : vector<8x128xf32>
    %267 = arith.divf %265, %266 : vector<8x128xf32>
    %268 = vector.extract_strided_slice %255 {offsets = [0, 128], sizes = [8, 128], strides = [1, 1]} : vector<8x384xf32> to vector<8x128xf32>
    %269 = vector.extract_strided_slice %259 {offsets = [0, 128], sizes = [8, 128], strides = [1, 1]} : vector<8x384xf32> to vector<8x128xf32>
    %270 = arith.addf %268, %269 : vector<8x128xf32>
    %271 = arith.negf %270 : vector<8x128xf32>
    %272 = math.exp %271 : vector<8x128xf32>
    %cst_62 = arith.constant 1.000000e+00 : f32
    %273 = vector.broadcast %cst_62 : f32 to vector<8x128xf32>
    %274 = arith.addf %273, %272 : vector<8x128xf32>
    %275 = arith.divf %273, %274 : vector<8x128xf32>
    %276 = vector.extract_strided_slice %255 {offsets = [0, 256], sizes = [8, 128], strides = [1, 1]} : vector<8x384xf32> to vector<8x128xf32>
    %277 = vector.extract_strided_slice %259 {offsets = [0, 256], sizes = [8, 128], strides = [1, 1]} : vector<8x384xf32> to vector<8x128xf32>
    %278 = arith.mulf %267, %277 : vector<8x128xf32>
    %279 = arith.addf %276, %278 : vector<8x128xf32>
    %280 = math.tanh %279 : vector<8x128xf32>
    %cst_63 = arith.constant 1.000000e+00 : f32
    %281 = vector.broadcast %cst_63 : f32 to vector<8x128xf32>
    %282 = arith.subf %281, %275 : vector<8x128xf32>
    %283 = arith.mulf %282, %280 : vector<8x128xf32>
    %284 = arith.mulf %275, %251 : vector<8x128xf32>
    %285 = arith.addf %283, %284 : vector<8x128xf32>
    %286 = vector.broadcast %c6_i32 : i32 to vector<8x1xi32>
    %287 = arith.cmpi sgt, %16, %286 : vector<8x1xi32>
    %288 = vector.shape_cast %287 : vector<8x1xi1> to vector<8x1xi1>
    %289 = vector.broadcast %288 : vector<8x1xi1> to vector<8x128xi1>
    %290 = arith.select %289, %285, %251 : vector<8x128xi1>, vector<8x128xf32>
    %c7_i32 = arith.constant 7 : i32
    %c8_i32_64 = arith.constant 8 : i32
    %291 = arith.muli %c7_i32, %c8_i32_64 : i32
    %292 = tpu.assume_multiple %291, 8 : i32
    %293 = arith.index_cast %292 : i32 to index
    %c0_65 = arith.constant 0 : index
    %294 = vector.load %arg13[%293, %c0_65] : memref<64x384xf32, #tpu.memory_space<vmem>>, vector<8x384xf32>
    %295 = arith.truncf %290 : vector<8x128xf32> to vector<8x128xbf16>
    %cst_66 = arith.constant dense<0.000000e+00> : vector<8x384xf32>
    %296 = tpu.matmul %295, %14, %cst_66 {dimension_numbers = #tpu.dot_dimension_numbers<[1], [0], [0], [1], [0, 0, 1, 1], [], []>} : vector<8x128xbf16>, vector<128x384xbf16>, vector<8x384xf32> -> vector<8x384xf32>
    %297 = vector.broadcast %15 : vector<1x384xf32> to vector<8x384xf32>
    %298 = arith.addf %296, %297 : vector<8x384xf32>
    %299 = vector.extract_strided_slice %294 {offsets = [0, 0], sizes = [8, 128], strides = [1, 1]} : vector<8x384xf32> to vector<8x128xf32>
    %300 = vector.extract_strided_slice %298 {offsets = [0, 0], sizes = [8, 128], strides = [1, 1]} : vector<8x384xf32> to vector<8x128xf32>
    %301 = arith.addf %299, %300 : vector<8x128xf32>
    %302 = arith.negf %301 : vector<8x128xf32>
    %303 = math.exp %302 : vector<8x128xf32>
    %cst_67 = arith.constant 1.000000e+00 : f32
    %304 = vector.broadcast %cst_67 : f32 to vector<8x128xf32>
    %305 = arith.addf %304, %303 : vector<8x128xf32>
    %306 = arith.divf %304, %305 : vector<8x128xf32>
    %307 = vector.extract_strided_slice %294 {offsets = [0, 128], sizes = [8, 128], strides = [1, 1]} : vector<8x384xf32> to vector<8x128xf32>
    %308 = vector.extract_strided_slice %298 {offsets = [0, 128], sizes = [8, 128], strides = [1, 1]} : vector<8x384xf32> to vector<8x128xf32>
    %309 = arith.addf %307, %308 : vector<8x128xf32>
    %310 = arith.negf %309 : vector<8x128xf32>
    %311 = math.exp %310 : vector<8x128xf32>
    %cst_68 = arith.constant 1.000000e+00 : f32
    %312 = vector.broadcast %cst_68 : f32 to vector<8x128xf32>
    %313 = arith.addf %312, %311 : vector<8x128xf32>
    %314 = arith.divf %312, %313 : vector<8x128xf32>
    %315 = vector.extract_strided_slice %294 {offsets = [0, 256], sizes = [8, 128], strides = [1, 1]} : vector<8x384xf32> to vector<8x128xf32>
    %316 = vector.extract_strided_slice %298 {offsets = [0, 256], sizes = [8, 128], strides = [1, 1]} : vector<8x384xf32> to vector<8x128xf32>
    %317 = arith.mulf %306, %316 : vector<8x128xf32>
    %318 = arith.addf %315, %317 : vector<8x128xf32>
    %319 = math.tanh %318 : vector<8x128xf32>
    %cst_69 = arith.constant 1.000000e+00 : f32
    %320 = vector.broadcast %cst_69 : f32 to vector<8x128xf32>
    %321 = arith.subf %320, %314 : vector<8x128xf32>
    %322 = arith.mulf %321, %319 : vector<8x128xf32>
    %323 = arith.mulf %314, %290 : vector<8x128xf32>
    %324 = arith.addf %322, %323 : vector<8x128xf32>
    %325 = vector.broadcast %c7_i32 : i32 to vector<8x1xi32>
    %326 = arith.cmpi sgt, %16, %325 : vector<8x1xi32>
    %327 = vector.shape_cast %326 : vector<8x1xi1> to vector<8x1xi1>
    %328 = vector.broadcast %327 : vector<8x1xi1> to vector<8x128xi1>
    %329 = arith.select %328, %324, %290 : vector<8x128xi1>, vector<8x128xf32>
    %c8_i32_70 = arith.constant 8 : i32
    %c0_71 = arith.constant 0 : index
    %c0_72 = arith.constant 0 : index
    %330 = vector.load %arg10[%c0_71, %c0_72] : memref<128x384xbf16, #tpu.memory_space<vmem>>, vector<128x384xbf16>
    %c0_73 = arith.constant 0 : index
    %c0_74 = arith.constant 0 : index
    %331 = vector.load %arg11[%c0_73, %c0_74] : memref<1x384xf32, #tpu.memory_space<vmem>>, vector<1x384xf32>
    %c0_75 = arith.constant 0 : index
    %c0_76 = arith.constant 0 : index
    %332 = vector.load %arg3[%c0_75, %c0_76] : memref<8x1xi32, #tpu.memory_space<vmem>>, vector<8x1xi32>
    %cst_77 = arith.constant 0.000000e+00 : f32
    %333 = vector.broadcast %cst_77 : f32 to vector<8x128xf32>
    %c0_i32_78 = arith.constant 0 : i32
    %c8_i32_79 = arith.constant 8 : i32
    %334 = arith.muli %c0_i32_78, %c8_i32_79 : i32
    %335 = tpu.assume_multiple %334, 8 : i32
    %336 = arith.index_cast %335 : i32 to index
    %c0_80 = arith.constant 0 : index
    %337 = vector.load %arg14[%336, %c0_80] : memref<48x384xf32, #tpu.memory_space<vmem>>, vector<8x384xf32>
    %338 = arith.truncf %333 : vector<8x128xf32> to vector<8x128xbf16>
    %cst_81 = arith.constant dense<0.000000e+00> : vector<8x384xf32>
    %339 = tpu.matmul %338, %330, %cst_81 {dimension_numbers = #tpu.dot_dimension_numbers<[1], [0], [0], [1], [0, 0, 1, 1], [], []>} : vector<8x128xbf16>, vector<128x384xbf16>, vector<8x384xf32> -> vector<8x384xf32>
    %340 = vector.broadcast %331 : vector<1x384xf32> to vector<8x384xf32>
    %341 = arith.addf %339, %340 : vector<8x384xf32>
    %342 = vector.extract_strided_slice %337 {offsets = [0, 0], sizes = [8, 128], strides = [1, 1]} : vector<8x384xf32> to vector<8x128xf32>
    %343 = vector.extract_strided_slice %341 {offsets = [0, 0], sizes = [8, 128], strides = [1, 1]} : vector<8x384xf32> to vector<8x128xf32>
    %344 = arith.addf %342, %343 : vector<8x128xf32>
    %345 = arith.negf %344 : vector<8x128xf32>
    %346 = math.exp %345 : vector<8x128xf32>
    %cst_82 = arith.constant 1.000000e+00 : f32
    %347 = vector.broadcast %cst_82 : f32 to vector<8x128xf32>
    %348 = arith.addf %347, %346 : vector<8x128xf32>
    %349 = arith.divf %347, %348 : vector<8x128xf32>
    %350 = vector.extract_strided_slice %337 {offsets = [0, 128], sizes = [8, 128], strides = [1, 1]} : vector<8x384xf32> to vector<8x128xf32>
    %351 = vector.extract_strided_slice %341 {offsets = [0, 128], sizes = [8, 128], strides = [1, 1]} : vector<8x384xf32> to vector<8x128xf32>
    %352 = arith.addf %350, %351 : vector<8x128xf32>
    %353 = arith.negf %352 : vector<8x128xf32>
    %354 = math.exp %353 : vector<8x128xf32>
    %cst_83 = arith.constant 1.000000e+00 : f32
    %355 = vector.broadcast %cst_83 : f32 to vector<8x128xf32>
    %356 = arith.addf %355, %354 : vector<8x128xf32>
    %357 = arith.divf %355, %356 : vector<8x128xf32>
    %358 = vector.extract_strided_slice %337 {offsets = [0, 256], sizes = [8, 128], strides = [1, 1]} : vector<8x384xf32> to vector<8x128xf32>
    %359 = vector.extract_strided_slice %341 {offsets = [0, 256], sizes = [8, 128], strides = [1, 1]} : vector<8x384xf32> to vector<8x128xf32>
    %360 = arith.mulf %349, %359 : vector<8x128xf32>
    %361 = arith.addf %358, %360 : vector<8x128xf32>
    %362 = math.tanh %361 : vector<8x128xf32>
    %cst_84 = arith.constant 1.000000e+00 : f32
    %363 = vector.broadcast %cst_84 : f32 to vector<8x128xf32>
    %364 = arith.subf %363, %357 : vector<8x128xf32>
    %365 = arith.mulf %364, %362 : vector<8x128xf32>
    %366 = arith.mulf %357, %333 : vector<8x128xf32>
    %367 = arith.addf %365, %366 : vector<8x128xf32>
    %368 = vector.broadcast %c0_i32_78 : i32 to vector<8x1xi32>
    %369 = arith.cmpi sgt, %332, %368 : vector<8x1xi32>
    %370 = vector.shape_cast %369 : vector<8x1xi1> to vector<8x1xi1>
    %371 = vector.broadcast %370 : vector<8x1xi1> to vector<8x128xi1>
    %372 = arith.select %371, %367, %333 : vector<8x128xi1>, vector<8x128xf32>
    %c1_i32_85 = arith.constant 1 : i32
    %c8_i32_86 = arith.constant 8 : i32
    %373 = arith.muli %c1_i32_85, %c8_i32_86 : i32
    %374 = tpu.assume_multiple %373, 8 : i32
    %375 = arith.index_cast %374 : i32 to index
    %c0_87 = arith.constant 0 : index
    %376 = vector.load %arg14[%375, %c0_87] : memref<48x384xf32, #tpu.memory_space<vmem>>, vector<8x384xf32>
    %377 = arith.truncf %372 : vector<8x128xf32> to vector<8x128xbf16>
    %cst_88 = arith.constant dense<0.000000e+00> : vector<8x384xf32>
    %378 = tpu.matmul %377, %330, %cst_88 {dimension_numbers = #tpu.dot_dimension_numbers<[1], [0], [0], [1], [0, 0, 1, 1], [], []>} : vector<8x128xbf16>, vector<128x384xbf16>, vector<8x384xf32> -> vector<8x384xf32>
    %379 = vector.broadcast %331 : vector<1x384xf32> to vector<8x384xf32>
    %380 = arith.addf %378, %379 : vector<8x384xf32>
    %381 = vector.extract_strided_slice %376 {offsets = [0, 0], sizes = [8, 128], strides = [1, 1]} : vector<8x384xf32> to vector<8x128xf32>
    %382 = vector.extract_strided_slice %380 {offsets = [0, 0], sizes = [8, 128], strides = [1, 1]} : vector<8x384xf32> to vector<8x128xf32>
    %383 = arith.addf %381, %382 : vector<8x128xf32>
    %384 = arith.negf %383 : vector<8x128xf32>
    %385 = math.exp %384 : vector<8x128xf32>
    %cst_89 = arith.constant 1.000000e+00 : f32
    %386 = vector.broadcast %cst_89 : f32 to vector<8x128xf32>
    %387 = arith.addf %386, %385 : vector<8x128xf32>
    %388 = arith.divf %386, %387 : vector<8x128xf32>
    %389 = vector.extract_strided_slice %376 {offsets = [0, 128], sizes = [8, 128], strides = [1, 1]} : vector<8x384xf32> to vector<8x128xf32>
    %390 = vector.extract_strided_slice %380 {offsets = [0, 128], sizes = [8, 128], strides = [1, 1]} : vector<8x384xf32> to vector<8x128xf32>
    %391 = arith.addf %389, %390 : vector<8x128xf32>
    %392 = arith.negf %391 : vector<8x128xf32>
    %393 = math.exp %392 : vector<8x128xf32>
    %cst_90 = arith.constant 1.000000e+00 : f32
    %394 = vector.broadcast %cst_90 : f32 to vector<8x128xf32>
    %395 = arith.addf %394, %393 : vector<8x128xf32>
    %396 = arith.divf %394, %395 : vector<8x128xf32>
    %397 = vector.extract_strided_slice %376 {offsets = [0, 256], sizes = [8, 128], strides = [1, 1]} : vector<8x384xf32> to vector<8x128xf32>
    %398 = vector.extract_strided_slice %380 {offsets = [0, 256], sizes = [8, 128], strides = [1, 1]} : vector<8x384xf32> to vector<8x128xf32>
    %399 = arith.mulf %388, %398 : vector<8x128xf32>
    %400 = arith.addf %397, %399 : vector<8x128xf32>
    %401 = math.tanh %400 : vector<8x128xf32>
    %cst_91 = arith.constant 1.000000e+00 : f32
    %402 = vector.broadcast %cst_91 : f32 to vector<8x128xf32>
    %403 = arith.subf %402, %396 : vector<8x128xf32>
    %404 = arith.mulf %403, %401 : vector<8x128xf32>
    %405 = arith.mulf %396, %372 : vector<8x128xf32>
    %406 = arith.addf %404, %405 : vector<8x128xf32>
    %407 = vector.broadcast %c1_i32_85 : i32 to vector<8x1xi32>
    %408 = arith.cmpi sgt, %332, %407 : vector<8x1xi32>
    %409 = vector.shape_cast %408 : vector<8x1xi1> to vector<8x1xi1>
    %410 = vector.broadcast %409 : vector<8x1xi1> to vector<8x128xi1>
    %411 = arith.select %410, %406, %372 : vector<8x128xi1>, vector<8x128xf32>
    %c2_i32_92 = arith.constant 2 : i32
    %c8_i32_93 = arith.constant 8 : i32
    %412 = arith.muli %c2_i32_92, %c8_i32_93 : i32
    %413 = tpu.assume_multiple %412, 8 : i32
    %414 = arith.index_cast %413 : i32 to index
    %c0_94 = arith.constant 0 : index
    %415 = vector.load %arg14[%414, %c0_94] : memref<48x384xf32, #tpu.memory_space<vmem>>, vector<8x384xf32>
    %416 = arith.truncf %411 : vector<8x128xf32> to vector<8x128xbf16>
    %cst_95 = arith.constant dense<0.000000e+00> : vector<8x384xf32>
    %417 = tpu.matmul %416, %330, %cst_95 {dimension_numbers = #tpu.dot_dimension_numbers<[1], [0], [0], [1], [0, 0, 1, 1], [], []>} : vector<8x128xbf16>, vector<128x384xbf16>, vector<8x384xf32> -> vector<8x384xf32>
    %418 = vector.broadcast %331 : vector<1x384xf32> to vector<8x384xf32>
    %419 = arith.addf %417, %418 : vector<8x384xf32>
    %420 = vector.extract_strided_slice %415 {offsets = [0, 0], sizes = [8, 128], strides = [1, 1]} : vector<8x384xf32> to vector<8x128xf32>
    %421 = vector.extract_strided_slice %419 {offsets = [0, 0], sizes = [8, 128], strides = [1, 1]} : vector<8x384xf32> to vector<8x128xf32>
    %422 = arith.addf %420, %421 : vector<8x128xf32>
    %423 = arith.negf %422 : vector<8x128xf32>
    %424 = math.exp %423 : vector<8x128xf32>
    %cst_96 = arith.constant 1.000000e+00 : f32
    %425 = vector.broadcast %cst_96 : f32 to vector<8x128xf32>
    %426 = arith.addf %425, %424 : vector<8x128xf32>
    %427 = arith.divf %425, %426 : vector<8x128xf32>
    %428 = vector.extract_strided_slice %415 {offsets = [0, 128], sizes = [8, 128], strides = [1, 1]} : vector<8x384xf32> to vector<8x128xf32>
    %429 = vector.extract_strided_slice %419 {offsets = [0, 128], sizes = [8, 128], strides = [1, 1]} : vector<8x384xf32> to vector<8x128xf32>
    %430 = arith.addf %428, %429 : vector<8x128xf32>
    %431 = arith.negf %430 : vector<8x128xf32>
    %432 = math.exp %431 : vector<8x128xf32>
    %cst_97 = arith.constant 1.000000e+00 : f32
    %433 = vector.broadcast %cst_97 : f32 to vector<8x128xf32>
    %434 = arith.addf %433, %432 : vector<8x128xf32>
    %435 = arith.divf %433, %434 : vector<8x128xf32>
    %436 = vector.extract_strided_slice %415 {offsets = [0, 256], sizes = [8, 128], strides = [1, 1]} : vector<8x384xf32> to vector<8x128xf32>
    %437 = vector.extract_strided_slice %419 {offsets = [0, 256], sizes = [8, 128], strides = [1, 1]} : vector<8x384xf32> to vector<8x128xf32>
    %438 = arith.mulf %427, %437 : vector<8x128xf32>
    %439 = arith.addf %436, %438 : vector<8x128xf32>
    %440 = math.tanh %439 : vector<8x128xf32>
    %cst_98 = arith.constant 1.000000e+00 : f32
    %441 = vector.broadcast %cst_98 : f32 to vector<8x128xf32>
    %442 = arith.subf %441, %435 : vector<8x128xf32>
    %443 = arith.mulf %442, %440 : vector<8x128xf32>
    %444 = arith.mulf %435, %411 : vector<8x128xf32>
    %445 = arith.addf %443, %444 : vector<8x128xf32>
    %446 = vector.broadcast %c2_i32_92 : i32 to vector<8x1xi32>
    %447 = arith.cmpi sgt, %332, %446 : vector<8x1xi32>
    %448 = vector.shape_cast %447 : vector<8x1xi1> to vector<8x1xi1>
    %449 = vector.broadcast %448 : vector<8x1xi1> to vector<8x128xi1>
    %450 = arith.select %449, %445, %411 : vector<8x128xi1>, vector<8x128xf32>
    %c3_i32_99 = arith.constant 3 : i32
    %c8_i32_100 = arith.constant 8 : i32
    %451 = arith.muli %c3_i32_99, %c8_i32_100 : i32
    %452 = tpu.assume_multiple %451, 8 : i32
    %453 = arith.index_cast %452 : i32 to index
    %c0_101 = arith.constant 0 : index
    %454 = vector.load %arg14[%453, %c0_101] : memref<48x384xf32, #tpu.memory_space<vmem>>, vector<8x384xf32>
    %455 = arith.truncf %450 : vector<8x128xf32> to vector<8x128xbf16>
    %cst_102 = arith.constant dense<0.000000e+00> : vector<8x384xf32>
    %456 = tpu.matmul %455, %330, %cst_102 {dimension_numbers = #tpu.dot_dimension_numbers<[1], [0], [0], [1], [0, 0, 1, 1], [], []>} : vector<8x128xbf16>, vector<128x384xbf16>, vector<8x384xf32> -> vector<8x384xf32>
    %457 = vector.broadcast %331 : vector<1x384xf32> to vector<8x384xf32>
    %458 = arith.addf %456, %457 : vector<8x384xf32>
    %459 = vector.extract_strided_slice %454 {offsets = [0, 0], sizes = [8, 128], strides = [1, 1]} : vector<8x384xf32> to vector<8x128xf32>
    %460 = vector.extract_strided_slice %458 {offsets = [0, 0], sizes = [8, 128], strides = [1, 1]} : vector<8x384xf32> to vector<8x128xf32>
    %461 = arith.addf %459, %460 : vector<8x128xf32>
    %462 = arith.negf %461 : vector<8x128xf32>
    %463 = math.exp %462 : vector<8x128xf32>
    %cst_103 = arith.constant 1.000000e+00 : f32
    %464 = vector.broadcast %cst_103 : f32 to vector<8x128xf32>
    %465 = arith.addf %464, %463 : vector<8x128xf32>
    %466 = arith.divf %464, %465 : vector<8x128xf32>
    %467 = vector.extract_strided_slice %454 {offsets = [0, 128], sizes = [8, 128], strides = [1, 1]} : vector<8x384xf32> to vector<8x128xf32>
    %468 = vector.extract_strided_slice %458 {offsets = [0, 128], sizes = [8, 128], strides = [1, 1]} : vector<8x384xf32> to vector<8x128xf32>
    %469 = arith.addf %467, %468 : vector<8x128xf32>
    %470 = arith.negf %469 : vector<8x128xf32>
    %471 = math.exp %470 : vector<8x128xf32>
    %cst_104 = arith.constant 1.000000e+00 : f32
    %472 = vector.broadcast %cst_104 : f32 to vector<8x128xf32>
    %473 = arith.addf %472, %471 : vector<8x128xf32>
    %474 = arith.divf %472, %473 : vector<8x128xf32>
    %475 = vector.extract_strided_slice %454 {offsets = [0, 256], sizes = [8, 128], strides = [1, 1]} : vector<8x384xf32> to vector<8x128xf32>
    %476 = vector.extract_strided_slice %458 {offsets = [0, 256], sizes = [8, 128], strides = [1, 1]} : vector<8x384xf32> to vector<8x128xf32>
    %477 = arith.mulf %466, %476 : vector<8x128xf32>
    %478 = arith.addf %475, %477 : vector<8x128xf32>
    %479 = math.tanh %478 : vector<8x128xf32>
    %cst_105 = arith.constant 1.000000e+00 : f32
    %480 = vector.broadcast %cst_105 : f32 to vector<8x128xf32>
    %481 = arith.subf %480, %474 : vector<8x128xf32>
    %482 = arith.mulf %481, %479 : vector<8x128xf32>
    %483 = arith.mulf %474, %450 : vector<8x128xf32>
    %484 = arith.addf %482, %483 : vector<8x128xf32>
    %485 = vector.broadcast %c3_i32_99 : i32 to vector<8x1xi32>
    %486 = arith.cmpi sgt, %332, %485 : vector<8x1xi32>
    %487 = vector.shape_cast %486 : vector<8x1xi1> to vector<8x1xi1>
    %488 = vector.broadcast %487 : vector<8x1xi1> to vector<8x128xi1>
    %489 = arith.select %488, %484, %450 : vector<8x128xi1>, vector<8x128xf32>
    %c4_i32_106 = arith.constant 4 : i32
    %c8_i32_107 = arith.constant 8 : i32
    %490 = arith.muli %c4_i32_106, %c8_i32_107 : i32
    %491 = tpu.assume_multiple %490, 8 : i32
    %492 = arith.index_cast %491 : i32 to index
    %c0_108 = arith.constant 0 : index
    %493 = vector.load %arg14[%492, %c0_108] : memref<48x384xf32, #tpu.memory_space<vmem>>, vector<8x384xf32>
    %494 = arith.truncf %489 : vector<8x128xf32> to vector<8x128xbf16>
    %cst_109 = arith.constant dense<0.000000e+00> : vector<8x384xf32>
    %495 = tpu.matmul %494, %330, %cst_109 {dimension_numbers = #tpu.dot_dimension_numbers<[1], [0], [0], [1], [0, 0, 1, 1], [], []>} : vector<8x128xbf16>, vector<128x384xbf16>, vector<8x384xf32> -> vector<8x384xf32>
    %496 = vector.broadcast %331 : vector<1x384xf32> to vector<8x384xf32>
    %497 = arith.addf %495, %496 : vector<8x384xf32>
    %498 = vector.extract_strided_slice %493 {offsets = [0, 0], sizes = [8, 128], strides = [1, 1]} : vector<8x384xf32> to vector<8x128xf32>
    %499 = vector.extract_strided_slice %497 {offsets = [0, 0], sizes = [8, 128], strides = [1, 1]} : vector<8x384xf32> to vector<8x128xf32>
    %500 = arith.addf %498, %499 : vector<8x128xf32>
    %501 = arith.negf %500 : vector<8x128xf32>
    %502 = math.exp %501 : vector<8x128xf32>
    %cst_110 = arith.constant 1.000000e+00 : f32
    %503 = vector.broadcast %cst_110 : f32 to vector<8x128xf32>
    %504 = arith.addf %503, %502 : vector<8x128xf32>
    %505 = arith.divf %503, %504 : vector<8x128xf32>
    %506 = vector.extract_strided_slice %493 {offsets = [0, 128], sizes = [8, 128], strides = [1, 1]} : vector<8x384xf32> to vector<8x128xf32>
    %507 = vector.extract_strided_slice %497 {offsets = [0, 128], sizes = [8, 128], strides = [1, 1]} : vector<8x384xf32> to vector<8x128xf32>
    %508 = arith.addf %506, %507 : vector<8x128xf32>
    %509 = arith.negf %508 : vector<8x128xf32>
    %510 = math.exp %509 : vector<8x128xf32>
    %cst_111 = arith.constant 1.000000e+00 : f32
    %511 = vector.broadcast %cst_111 : f32 to vector<8x128xf32>
    %512 = arith.addf %511, %510 : vector<8x128xf32>
    %513 = arith.divf %511, %512 : vector<8x128xf32>
    %514 = vector.extract_strided_slice %493 {offsets = [0, 256], sizes = [8, 128], strides = [1, 1]} : vector<8x384xf32> to vector<8x128xf32>
    %515 = vector.extract_strided_slice %497 {offsets = [0, 256], sizes = [8, 128], strides = [1, 1]} : vector<8x384xf32> to vector<8x128xf32>
    %516 = arith.mulf %505, %515 : vector<8x128xf32>
    %517 = arith.addf %514, %516 : vector<8x128xf32>
    %518 = math.tanh %517 : vector<8x128xf32>
    %cst_112 = arith.constant 1.000000e+00 : f32
    %519 = vector.broadcast %cst_112 : f32 to vector<8x128xf32>
    %520 = arith.subf %519, %513 : vector<8x128xf32>
    %521 = arith.mulf %520, %518 : vector<8x128xf32>
    %522 = arith.mulf %513, %489 : vector<8x128xf32>
    %523 = arith.addf %521, %522 : vector<8x128xf32>
    %524 = vector.broadcast %c4_i32_106 : i32 to vector<8x1xi32>
    %525 = arith.cmpi sgt, %332, %524 : vector<8x1xi32>
    %526 = vector.shape_cast %525 : vector<8x1xi1> to vector<8x1xi1>
    %527 = vector.broadcast %526 : vector<8x1xi1> to vector<8x128xi1>
    %528 = arith.select %527, %523, %489 : vector<8x128xi1>, vector<8x128xf32>
    %c5_i32_113 = arith.constant 5 : i32
    %c8_i32_114 = arith.constant 8 : i32
    %529 = arith.muli %c5_i32_113, %c8_i32_114 : i32
    %530 = tpu.assume_multiple %529, 8 : i32
    %531 = arith.index_cast %530 : i32 to index
    %c0_115 = arith.constant 0 : index
    %532 = vector.load %arg14[%531, %c0_115] : memref<48x384xf32, #tpu.memory_space<vmem>>, vector<8x384xf32>
    %533 = arith.truncf %528 : vector<8x128xf32> to vector<8x128xbf16>
    %cst_116 = arith.constant dense<0.000000e+00> : vector<8x384xf32>
    %534 = tpu.matmul %533, %330, %cst_116 {dimension_numbers = #tpu.dot_dimension_numbers<[1], [0], [0], [1], [0, 0, 1, 1], [], []>} : vector<8x128xbf16>, vector<128x384xbf16>, vector<8x384xf32> -> vector<8x384xf32>
    %535 = vector.broadcast %331 : vector<1x384xf32> to vector<8x384xf32>
    %536 = arith.addf %534, %535 : vector<8x384xf32>
    %537 = vector.extract_strided_slice %532 {offsets = [0, 0], sizes = [8, 128], strides = [1, 1]} : vector<8x384xf32> to vector<8x128xf32>
    %538 = vector.extract_strided_slice %536 {offsets = [0, 0], sizes = [8, 128], strides = [1, 1]} : vector<8x384xf32> to vector<8x128xf32>
    %539 = arith.addf %537, %538 : vector<8x128xf32>
    %540 = arith.negf %539 : vector<8x128xf32>
    %541 = math.exp %540 : vector<8x128xf32>
    %cst_117 = arith.constant 1.000000e+00 : f32
    %542 = vector.broadcast %cst_117 : f32 to vector<8x128xf32>
    %543 = arith.addf %542, %541 : vector<8x128xf32>
    %544 = arith.divf %542, %543 : vector<8x128xf32>
    %545 = vector.extract_strided_slice %532 {offsets = [0, 128], sizes = [8, 128], strides = [1, 1]} : vector<8x384xf32> to vector<8x128xf32>
    %546 = vector.extract_strided_slice %536 {offsets = [0, 128], sizes = [8, 128], strides = [1, 1]} : vector<8x384xf32> to vector<8x128xf32>
    %547 = arith.addf %545, %546 : vector<8x128xf32>
    %548 = arith.negf %547 : vector<8x128xf32>
    %549 = math.exp %548 : vector<8x128xf32>
    %cst_118 = arith.constant 1.000000e+00 : f32
    %550 = vector.broadcast %cst_118 : f32 to vector<8x128xf32>
    %551 = arith.addf %550, %549 : vector<8x128xf32>
    %552 = arith.divf %550, %551 : vector<8x128xf32>
    %553 = vector.extract_strided_slice %532 {offsets = [0, 256], sizes = [8, 128], strides = [1, 1]} : vector<8x384xf32> to vector<8x128xf32>
    %554 = vector.extract_strided_slice %536 {offsets = [0, 256], sizes = [8, 128], strides = [1, 1]} : vector<8x384xf32> to vector<8x128xf32>
    %555 = arith.mulf %544, %554 : vector<8x128xf32>
    %556 = arith.addf %553, %555 : vector<8x128xf32>
    %557 = math.tanh %556 : vector<8x128xf32>
    %cst_119 = arith.constant 1.000000e+00 : f32
    %558 = vector.broadcast %cst_119 : f32 to vector<8x128xf32>
    %559 = arith.subf %558, %552 : vector<8x128xf32>
    %560 = arith.mulf %559, %557 : vector<8x128xf32>
    %561 = arith.mulf %552, %528 : vector<8x128xf32>
    %562 = arith.addf %560, %561 : vector<8x128xf32>
    %563 = vector.broadcast %c5_i32_113 : i32 to vector<8x1xi32>
    %564 = arith.cmpi sgt, %332, %563 : vector<8x1xi32>
    %565 = vector.shape_cast %564 : vector<8x1xi1> to vector<8x1xi1>
    %566 = vector.broadcast %565 : vector<8x1xi1> to vector<8x128xi1>
    %567 = arith.select %566, %562, %528 : vector<8x128xi1>, vector<8x128xf32>
    %c6_i32_120 = arith.constant 6 : i32
    %cst_121 = arith.constant dense<0.000000e+00> : vector<8x8xf32>
    %568 = tpu.matmul %329, %567, %cst_121 {dimension_numbers = #tpu.dot_dimension_numbers<[1], [1], [0], [0], [0, 0, 1, 0], [], []>} : vector<8x128xf32>, vector<8x128xf32>, vector<8x8xf32> -> vector<8x8xf32>
    %c0_122 = arith.constant 0 : index
    %c0_123 = arith.constant 0 : index
    %569 = vector.load %arg12[%c0_122, %c0_123] : memref<8x8xf32, #tpu.memory_space<vmem>>, vector<8x8xf32>
    tpu.vector_store %arg12[%c0_122, %c0_123], %568 {strides = array<i32>} : memref<8x8xf32, #tpu.memory_space<vmem>>, vector<8x8xf32>,
    return
  }
}

</mosaic_0001>

<bundles_post_ra>
// kernel: tpu_custom_call.1
= control target key start
LH: loop header
LB: loop body
LE: loop exit
PB: predicated region body
PF: predicated region fallthrough
CT: control target
= control target key end

     0   :  { %17 = vsyncpa [#allocation5], 0  ;;  %s3904_s0 = inlined_call_operand.vmem [shape: bf16[64,32], index: 0, kind: input, shape index: {}]   ;;  %s3905_s1 = inlined_call_operand.vmem [shape: bf16[48,32], index: 1, kind: input, shape index: {}]   ;;  %s3906_s2 = inlined_call_operand.vmem [shape: s32[8,1], index: 2, kind: input, shape index: {}]   ;;  %s3907_s3 = inlined_call_operand.vmem [shape: s32[8,1], index: 3, kind: input, shape index: {}]   ;;  %s3908_s4 = inlined_call_operand.vmem [shape: bf16[32,384], index: 4, kind: input, shape index: {}]   ;;  %s3909_s5 = inlined_call_operand.vmem [shape: f32[1,384], index: 5, kind: input, shape index: {}]   ;;  %s3910_s6 = inlined_call_operand.hbm [shape: bf16[128,384], index: 6, kind: input, shape index: {}]   ;;  %s3911_s7 = inlined_call_operand.vmem [shape: f32[1,384], index: 7, kind: input, shape index: {}]   ;;  %s3912_s8 = inlined_call_operand.hbm [shape: bf16[32,384], index: 8, kind: input, shape index: {}]   ;;  %s3913_s9 = inlined_call_operand.vmem [shape: f32[1,384], index: 9, kind: input, shape index: {}]   ;;  %s3914_s10 = inlined_call_operand.hbm [shape: bf16[128,384], index: 10, kind: input, shape index: {}]   ;;  %s3915_s11 = inlined_call_operand.vmem [shape: f32[1,384], index: 11, kind: input, shape index: {}]   ;;  %s3916_s12 = inlined_call_operand.hbm [shape: f32[8,8], index: 12, kind: output, shape index: {}]  }
   0x1   :  { %18 = vsyncpa [#allocation8], 0 }
   0x2   :  { %19 = vsyncpa [#allocation6], 0  ;;  %s51_s23 = sshll.u32 %s3912_s8, 4  ;;  %s2895_s24 = smov [#allocation7]   ;;  %s52_s23 = int_to_ptr.hbm [resolvable:$true] %s51_s23 }
   0x3   :  { %s53_s25 = sshll.u32 %s2895_s24, 4  ;;  %s36_s28 = sshll.u32 %s3910_s6, 4  ;;  %s54_s25 = int_to_ptr.vmem [resolvable:$true] %s53_s25  ;;  %s37_s28 = int_to_ptr.hbm [resolvable:$true] %s36_s28 }
   0x4   :  { %s2896_s29 = smov 192   ;;  %s2897_s30 = smov 12  }
   0x5   :  { %59 = dma.hbm_to_vmem [thread:$0]  %s52_s23, 768, %s54_s25, [#allocation8], %s2896_s29, %s2896_s29, %s2897_s30  }
   0x6   :  { %s2898_s13 = smov [#allocation4]   ;;  %s66_s17 = sshll.u32 %s3914_s10, 4  ;;  %s67_s17 = int_to_ptr.hbm [resolvable:$true] %s66_s17 }
   0x7   :  { %s38_s14 = sshll.u32 %s2898_s13, 4  ;;  %s2899_s8 = smov [#allocation9]   ;;  %s39_s14 = int_to_ptr.vmem [resolvable:$true] %s38_s14 }
   0x8   :  { %44 = dma.hbm_to_vmem [thread:$0]  %s37_s28, 3072, %s39_s14, [#allocation5], %s2896_s29, %s2896_s29, %s2897_s30  }
   0x9   :  { %s68_s18 = sshll.u32 %s2899_s8, 4  ;;  %s69_s18 = int_to_ptr.vmem [resolvable:$true] %s68_s18 }
   0xa   :  { %74 = dma.hbm_to_vmem [thread:$0]  %s67_s17, 3072, %s69_s18, [#allocation8], %s2896_s29, %s2896_s29, %s2897_s30  }
   0xb   :  { %2889 = dma.done.wait [#allocation5], 3072  }
   0xc   :  { %2890 = vsyncadd [#allocation5], 4294964224 }
   0xd   :  { %2891 = dma.done.wait [#allocation8], 3840  }
   0xe   :  { %2892 = vsyncadd [#allocation8], 4294963456  ;;  %v2582_v0 = vld [vmem:[%s3908_s4 + $0x1c] sm:$0xf]  ;;  %v2272_v1 = vld [vmem:[%s3908_s4 + $0x24] sm:$0xf0] }
   0xf   :  { %v2278_v2 = vld [vmem:[%s3908_s4 + $0x20] sm:$0xf]  ;;  %v2275_v3 = vor.u32 %v2582_v0, %v2272_v1  ;;  %v2584_v4 = vld [vmem:[%s3908_s4 + $0x28] sm:$0xf0]  ;;  %v2579_v5 = vld [vmem:[%s3908_s4 + $0x4] sm:$0xf] }
  0x10   :  { %v2260_v6 = vld [vmem:[%s3908_s4 + $0xc] sm:$0xf0]  ;;  %v2279_v7 = vor.u32 %v2584_v4, %v2278_v2  ;;  %v2266_v8 = vld [vmem:[%s3908_s4 + $0x8] sm:$0xf]  ;;  %v2581_v9 = vld [vmem:[%s3908_s4 + $0x10] sm:$0xf0] }
  0x11   :  { %214 = vmatpush.bf16.msra.mxu1 %v2275_v3  ;;  %v2263_v10 = vor.u32 %v2579_v5, %v2260_v6  ;;  %v2423_v11 = vld [vmem:[#allocation4 + $0xa8] sm:$0xf]  ;;  %v2616_v12 = vld [vmem:[#allocation4 + $0xb0] sm:$0xf0]  ;;  %v2267_v13 = vor.u32 %v2581_v9, %v2266_v8  ;;  %v2615_v15 = vld [vmem:[#allocation4 + $0xac] sm:$0xf] }
  0x12   :  { %243 = vmatpush.bf16.msra.mxu2 %v2279_v7  ;;  %v3000_v14 = vor.u32 %v2616_v12, %v2423_v11  ;;  %v2425_v16 = vld [vmem:[#allocation4 + $0xb4] sm:$0xf0]  ;;  %v2411_v18 = vld [vmem:[#allocation4 + $0x90] sm:$0xf]  ;;  %v2613_v19 = vld [vmem:[#allocation4 + $0x98] sm:$0xf0] }
  0x13   :  { %v3002_v17 = vor.u32 %v2615_v15, %v2425_v16  ;;  %v3007_v20 = vld [vmem:[%s3904_s0] sm:$0xff]  ;;  %v2612_v21 = vld [vmem:[#allocation4 + $0x94] sm:$0xf]  ;;  %vm166_vm0 = vcmask 261120   ;;  %v3010_v23 = vor.u32 %v2613_v19, %v2411_v18  ;;  %v2399_v25 = vld [vmem:[#allocation4 + $0x78] sm:$0xf] }
  0x14   :  { %v2413_v22 = vld [vmem:[#allocation4 + $0x9c] sm:$0xf0]  ;;  %v2610_v26 = vld [vmem:[#allocation4 + $0x80] sm:$0xf0]  ;;  %v2609_v27 = vld [vmem:[#allocation4 + $0x7c] sm:$0xf] }
  0x15   :  { %215 = vmatpush.bf16.msra.mxu1 %v2263_v10  ;;  %v3013_v24 = vor.u32 %v2612_v21, %v2413_v22  ;;  %v2401_v28 = vld [vmem:[#allocation4 + $0x84] sm:$0xf0]  ;;  %v3020_v29 = vor.u32 %v2610_v26, %v2399_v25  ;;  %v2387_v31 = vld [vmem:[#allocation4 + $0x60] sm:$0xf]  ;;  %v2607_v32 = vld [vmem:[#allocation4 + $0x68] sm:$0xf0] }
  0x16   :  { %244 = vmatpush.bf16.msra.mxu2 %v2267_v13  ;;  %v3023_v30 = vor.u32 %v2609_v27, %v2401_v28  ;;  %v2606_v33 = vld [vmem:[#allocation4 + $0x64] sm:$0xf]  ;;  %v2389_v34 = vld [vmem:[#allocation4 + $0x6c] sm:$0xf0]  ;;  %v3026_v35 = vor.u32 %v2607_v32, %v2387_v31  ;;  %v2375_v37 = vld [vmem:[#allocation4 + $0x48] sm:$0xf] }
  0x17   :  { %v3029_v36 = vor.u32 %v2606_v33, %v2389_v34  ;;  %v2604_v38 = vld [vmem:[#allocation4 + $0x50] sm:$0xf0]  ;;  %v2363_v40 = vld [vmem:[#allocation4 + $0x30] sm:$0xf]  ;;  %v2601_v41 = vld [vmem:[#allocation4 + $0x38] sm:$0xf0] }
  0x18   :  { %2284 = vmatmul.msk.bf16.vlgmr.msra.gmra.mxu1 %vm166_vm0, %v3007_v20  ;;  %v3032_v39 = vor.u32 %v2604_v38, %v2375_v37  ;;  %v3038_v42 = vld [vmem:[%s3904_s0 + $0x8] sm:$0xff]  ;;  %v3041_v43 = vor.u32 %v2601_v41, %v2363_v40  ;;  %v2377_v45 = vld [vmem:[#allocation4 + $0x54] sm:$0xf0]  ;;  %v2583_v48 = vld [vmem:[%s3908_s4 + $0x20] sm:$0xf0]  ;;  %v3917_v5 = vmov 0  }
  0x19   :  { %633 = vmatpush.bf16.msrb.mxu1 %v3000_v14  ;;  %2288 = vmatmul.msk.bf16.vlgmr.msra.gmra.mxu2 %vm166_vm0, %v3007_v20  ;;  %v2603_v44 = vld [vmem:[#allocation4 + $0x4c] sm:$0xf]  ;;  %v2270_v46 = vld [vmem:[%s3908_s4 + $0x18] sm:$0xf]  ;;  %v2598_v50 = vld [vmem:[#allocation4 + $0x20] sm:$0xf0] }
  0x1a   :  { %646 = vmatpush.bf16.msrb.mxu2 %v3002_v17  ;;  %v3048_v47 = vor.u32 %v2603_v44, %v2377_v45  ;;  %v2351_v49 = vld [vmem:[#allocation4 + $0x18] sm:$0xf]  ;;  %v2271_v51 = vor.u32 %v2583_v48, %v2270_v46  ;;  %v2258_v52 = vld [vmem:[%s3908_s4] sm:$0xf]  ;;  %v2580_v53 = vld [vmem:[%s3908_s4 + $0x8] sm:$0xf0]  ;;  %2649 = vset.pattern.permute.xlu0 %v3917_v5 }
  0x1b   :  { %v2600_v54 = vld [vmem:[#allocation4 + $0x34] sm:$0xf]  ;;  %v3063_v55 = vor.u32 %v2598_v50, %v2351_v49  ;;  %v2365_v56 = vld [vmem:[#allocation4 + $0x3c] sm:$0xf0]  ;;  %v2259_v57 = vor.u32 %v2580_v53, %v2258_v52  ;;  %v2595_v60 = vld [vmem:[#allocation4 + $0x8] sm:$0xf0]  ;;  %2650 = vset.pattern.permute.xlu1 %v3917_v5  ;;  %2651 = vset.pattern.permute.xlu2 %v3917_v5 }
  0x1c   :  { %185 = vmatpush.bf16.msra.mxu0 %v2271_v51  ;;  %v3065_v58 = vor.u32 %v2600_v54, %v2365_v56  ;;  %v2339_v59 = vld [vmem:[#allocation4] sm:$0xf]  ;;  %v2431_v61 = vld [vmem:[#allocation4 + $0xb0] sm:$0xf]  ;;  %v2617_v62 = vld [vmem:[#allocation4 + $0xb8] sm:$0xf0] }
  0x1d   :  { %634 = vmatpush.bf16.msrb.mxu1 %v3010_v23  ;;  %v2597_v63 = vld [vmem:[#allocation4 + $0x1c] sm:$0xf]  ;;  %v2353_v0 = vld [vmem:[#allocation4 + $0x24] sm:$0xf0]  ;;  %v3069_v1 = vor.u32 %v2595_v60, %v2339_v59  ;;  %v3071_v2 = vor.u32 %v2617_v62, %v2431_v61  ;;  %v2419_v4 = vld [vmem:[#allocation4 + $0x98] sm:$0xf] }
  0x1e   :  { %647 = vmatpush.bf16.msrb.mxu2 %v3013_v24  ;;  %v3073_v3 = vor.u32 %v2597_v63, %v2353_v0  ;;  %v2614_v6 = vld [vmem:[#allocation4 + $0xa0] sm:$0xf0]  ;;  %v2341_v8 = vld [vmem:[#allocation4 + $0xc] sm:$0xf0]  ;;  %v2407_v12 = vld [vmem:[#allocation4 + $0x80] sm:$0xf] }
  0x1f   :  { %v2594_v7 = vld [vmem:[#allocation4 + $0x4] sm:$0xf]  ;;  %v3083_v9 = vor.u32 %v2614_v6, %v2419_v4  ;;  %v2577_v11 = vld [vmem:[%s3904_s0 + $0x10] sm:$0xff]  ;;  %v2611_v13 = vld [vmem:[#allocation4 + $0x88] sm:$0xf0]  ;;  %s2217_s22 = sshll.u32 %s3916_s12, 4  ;;  %s2218_s22 = int_to_ptr.hbm [resolvable:$true] %s2217_s22 }
  0x20   :  { %186 = vmatpush.bf16.msra.mxu0 %v2259_v57  ;;  %v3085_v10 = vor.u32 %v2594_v7, %v2341_v8  ;;  %v3092_v15 = vor.u32 %v2611_v13, %v2407_v12  ;;  %v2395_v16 = vld [vmem:[#allocation4 + $0x68] sm:$0xf]  ;;  %v2608_v18 = vld [vmem:[#allocation4 + $0x70] sm:$0xf0]  ;;  %v2605_v21 = vld [vmem:[#allocation4 + $0x58] sm:$0xf0] }
  0x21   :  { %635 = vmatpush.bf16.msrb.mxu1 %v3020_v29  ;;  %v3098_v19 = vor.u32 %v2608_v18, %v2395_v16  ;;  %v2371_v25 = vld [vmem:[#allocation4 + $0x38] sm:$0xf]  ;;  %v2602_v26 = vld [vmem:[#allocation4 + $0x40] sm:$0xf0]  ;;  %v2359_v31 = vld [vmem:[#allocation4 + $0x20] sm:$0xf] }
  0x22   :  { %648 = vmatpush.bf16.msrb.mxu2 %v3023_v30  ;;  %v3108_v27 = vor.u32 %v2602_v26, %v2371_v25  ;;  %v2578_v28 = vld [vmem:[%s3904_s0 + $0x18] sm:$0xff]  ;;  %v2599_v32 = vld [vmem:[#allocation4 + $0x28] sm:$0xf0]  ;;  %v2347_v34 = vld [vmem:[#allocation4 + $0x8] sm:$0xf] }
  0x23   :  { %2280 = vmatmul.msk.bf16.vlgmr.msra.gmra.mxu0 %vm166_vm0, %v3007_v20  ;;  %v2383_v20 = vld [vmem:[#allocation4 + $0x50] sm:$0xf]  ;;  %v3115_v33 = vor.u32 %v2599_v32, %v2359_v31  ;;  %v2596_v37 = vld [vmem:[#allocation4 + $0x10] sm:$0xf0]  ;;  %v3121_v38 = vld [vmem:[%s3906_s2] sm:$0xff] }
  0x24   :  { %v3102_v22 = vor.u32 %v2605_v21, %v2383_v20  ;;  %vm719_vm1 = vcmp.gt.s32.totalorder %v3121_v38, 0  ;;  %v3128_v41 = vor.u32 %v2596_v37, %v2347_v34  ;;  %vm819_vm2 = vcmp.gt.s32.totalorder %v3121_v38, 1  ;;  %v3145_v45 = vld [vmem:[%s3907_s3] sm:$0xff]  ;;  %v2318_v49 = vld [vmem:[#allocation7 + $0x18] sm:$0xf]  ;;  %v2586_v59 = vld [vmem:[%s3905_s1 + $0x8] sm:$0xff] }
  0x25   :  { %636 = vmatpush.bf16.msrb.mxu1 %v3026_v35  ;;  %v720_v40 = vsel %vm719_vm1, 1, %v3917_v5  ;;  %vm1319_vm3 = vcmp.gt.s32.totalorder %v3121_v38, 6  ;;  %vm1884_vm4 = vcmp.gt.s32.totalorder %v3145_v45, 2  ;;  %vm2181_vm5 = vcmp.gt.s32.totalorder %v3145_v45, 5  ;;  %v2592_v50 = vld [vmem:[#allocation7 + $0x20] sm:$0xf0] }
  0x26   :  { %649 = vmatpush.bf16.msrb.mxu2 %v3029_v36  ;;  %722 = vperm.xlu0 %2649, %v720_v40   ;;  %v1320_v44 = vsel %vm1319_vm3, 1, %v3917_v5  ;;  %v1885_v46 = vsel %vm1884_vm4, 1, %v3917_v5  ;;  %v2182_v48 = vsel %vm2181_vm5, 1, %v3917_v5  ;;  %v2319_v51 = vor.u32 %v2592_v50, %v2318_v49  ;;  %v2306_v52 = vld [vmem:[#allocation7] sm:$0xf]  ;;  %v3203_v12 = vld [vmem:[%s3905_s1 + $0x10] sm:$0xff] }
  0x27   :  { %v2589_v53 = vld [vmem:[#allocation7 + $0x8] sm:$0xf0]  ;;  %v2585_v56 = vld [vmem:[%s3905_s1] sm:$0xff]  ;;  %v2591_v62 = vld [vmem:[#allocation7 + $0x1c] sm:$0xf]  ;;  %vm1019_vm1 = vcmp.gt.s32.totalorder %v3121_v38, 3 }
  0x28   :  { %2285 = vmatmul.msk.bf16.gmra.mxu1 %vm166_vm0, %v3038_v42  ;;  %374 = vmatpush.bf16.msra.mxu3 %v2319_v51  ;;  %v2307_v54 = vor.u32 %v2589_v53, %v2306_v52  ;;  %v2320_v63 = vld [vmem:[#allocation7 + $0x24] sm:$0xf0]  ;;  %v106_v4 = vld [vmem:[%s3909_s5] sm:$0x7]  ;;  %v2593_v16 = vld [vmem:[#allocation7 + $0x28] sm:$0xf0] }
  0x29   :  { %637 = vmatpush.bf16.msrb.mxu1 %v3032_v39  ;;  %2289 = vmatmul.msk.bf16.gmra.mxu2 %vm166_vm0, %v3038_v42  ;;  %v2323_v0 = vor.u32 %v2591_v62, %v2320_v63  ;;  %v3193_v6 = vperm.slane %v106_v4, 1  ;;  %v2326_v13 = vld [vmem:[#allocation7 + $0x20] sm:$0xf]  ;;  %v3207_v20 = vperm.slane %v106_v4, 2  ;;  %v2308_v31 = vld [vmem:[#allocation7 + $0xc] sm:$0xf0] }
  0x2a   :  { %650 = vmatpush.bf16.msrb.mxu2 %v3048_v47  ;;  %v2327_v18 = vor.u32 %v2593_v16, %v2326_v13  ;;  %v2314_v32 = vld [vmem:[#allocation7 + $0x8] sm:$0xf]  ;;  %v2590_v37 = vld [vmem:[#allocation7 + $0x10] sm:$0xf0]  ;;  %v490_v63 = vld [vmem:[%s3911_s7] sm:$0x7] }
  0x2c   :  { %375 = vmatpush.bf16.msra.mxu3 %v2307_v54  ;;  %422 = vmatpush.bf16.msrb.mxu0 %v2327_v18 }
  0x2d   :  { %638 = vmatpush.bf16.msrb.mxu1 %v3041_v43 }
  0x2e   :  { %651 = vmatpush.bf16.msrb.mxu2 %v3065_v58 }
  0x2f   :  { %2328 = vmatmul.msk.bf16.vlgmr.msra.gmra.mxu3 %vm166_vm0, %v2585_v56 }
  0x30   :  { %398 = vmatpush.bf16.msrb.mxu3 %v2323_v0  ;;  %v3257_v0 = vperm.slane %v490_v63, 0 }
  0x31   :  { %639 = vmatpush.bf16.msrb.mxu1 %v3063_v55 }
  0x32   :  { %652 = vmatpush.bf16.msrb.mxu2 %v3073_v3 }
  0x33   :  { %2281 = vmatmul.msk.bf16.gmra.mxu0 %vm166_vm0, %v3038_v42  ;;  %v820_v42 = vsel %vm819_vm2, 1, %v3917_v5 }
  0x34   :  { %822 = vperm.xlu0 %2649, %v820_v42   ;;  %v2315_v42 = vor.u32 %v2590_v37, %v2314_v32 }
  0x35   :  { %640 = vmatpush.bf16.msrb.mxu1 %v3069_v1 }
  0x36   :  { %653 = vmatpush.bf16.msrb.mxu2 %v3085_v10  ;;  %423 = vmatpush.bf16.msrb.mxu0 %v2315_v42 }
  0x38   :  { %2286 = vmatmul.msk.bf16.gmra.mxu1 %vm166_vm0, %v2577_v11 }
  0x39   :  { %659 = vmatpush.bf16.msra.mxu1 %v3071_v2  ;;  %2290 = vmatmul.msk.bf16.gmra.mxu2 %vm166_vm0, %v2577_v11 }
  0x3a   :  { %733 = vmatpush.bf16.msra.mxu2 %v3000_v14  ;;  %759 = vmatpush.bf16.msra.mxu0 %v3071_v2 }
  0x3c   :  { %1322 = vperm.xlu0 %2649, %v1320_v44  }
  0x3d   :  { %660 = vmatpush.bf16.msra.mxu1 %v3083_v9 }
  0x3e   :  { %734 = vmatpush.bf16.msra.mxu2 %v3010_v23  ;;  %760 = vmatpush.bf16.msra.mxu0 %v3083_v9 }
  0x3f   :  { %2329 = vmatmul.msk.bf16.gmra.mxu3 %vm166_vm0, %v2586_v59 }
  0x41   :  { %661 = vmatpush.bf16.msra.mxu1 %v3092_v15 }
  0x42   :  { %735 = vmatpush.bf16.msra.mxu2 %v3020_v29  ;;  %761 = vmatpush.bf16.msra.mxu0 %v3092_v15 }
  0x43   :  { %2282 = vmatmul.msk.bf16.gmra.mxu0 %vm166_vm0, %v2577_v11 }
  0x44   :  { %1887 = vperm.xlu0 %2649, %v1885_v46  }
  0x45   :  { %662 = vmatpush.bf16.msra.mxu1 %v3098_v19 }
  0x46   :  { %736 = vmatpush.bf16.msra.mxu2 %v3026_v35  ;;  %762 = vmatpush.bf16.msra.mxu0 %v3098_v19 }
  0x48   :  { %2287 = vmatmul.msk.bf16.gmra.mxu1 %vm166_vm0, %v2578_v28 }
  0x49   :  { %663 = vmatpush.bf16.msra.mxu1 %v3102_v22  ;;  %2291 = vmatmul.msk.bf16.gmra.mxu2 %vm166_vm0, %v2578_v28 }
  0x4a   :  { %737 = vmatpush.bf16.msra.mxu2 %v3032_v39  ;;  %763 = vmatpush.bf16.msra.mxu0 %v3102_v22 }
  0x4c   :  { %2184 = vperm.xlu0 %2649, %v2182_v48  }
  0x4d   :  { %664 = vmatpush.bf16.msra.mxu1 %v3108_v27 }
  0x4e   :  { %738 = vmatpush.bf16.msra.mxu2 %v3041_v43  ;;  %764 = vmatpush.bf16.msra.mxu0 %v3108_v27 }
  0x4f   :  { %2330 = vmatmul.msk.bf16.gmra.mxu3 %vm166_vm0, %v3203_v12 }
  0x51   :  { %665 = vmatpush.bf16.msra.mxu1 %v3115_v33 }
  0x52   :  { %739 = vmatpush.bf16.msra.mxu2 %v3063_v55  ;;  %765 = vmatpush.bf16.msra.mxu0 %v3115_v33 }
  0x53   :  { %2283 = vmatmul.msk.bf16.gmra.mxu0 %vm166_vm0, %v2578_v28  ;;  %v2588_v28 = vld [vmem:[#allocation7 + $0x4] sm:$0xf] }
  0x54   :  { %v2311_v34 = vor.u32 %v2588_v28, %v2308_v31  ;;  %v3272_v31 = vperm.slane %v490_v63, 1 }
  0x55   :  { %666 = vmatpush.bf16.msra.mxu1 %v3128_v41 }
  0x56   :  { %740 = vmatpush.bf16.msra.mxu2 %v3069_v1  ;;  %399 = vmatpush.bf16.msrb.mxu3 %v2311_v34 }
  0x57   :  { %766 = vmatpush.bf16.msra.mxu0 %v3128_v41 }
  0x58   :  { %641 = vmatmul.bf16.vlgmr.msrb.gmra.mxu1 %v3917_v5 }
  0x59   :  { %654 = vmatmul.bf16.vlgmr.msrb.gmra.mxu2 %v3917_v5  ;;  %833 = vmatpush.bf16.msrb.mxu1 %v3000_v14 }
  0x5a   :  { %846 = vmatpush.bf16.msrb.mxu2 %v3002_v17  ;;  %746 = vmatpush.bf16.msra.mxu3 %v3002_v17 }
  0x5d   :  { %834 = vmatpush.bf16.msrb.mxu1 %v3010_v23 }
  0x5e   :  { %847 = vmatpush.bf16.msrb.mxu2 %v3013_v24  ;;  %747 = vmatpush.bf16.msra.mxu3 %v3013_v24 }
  0x5f   :  { %2331 = vmatmul.msk.bf16.vlgmr.msrb.gmra.mxu3 %vm166_vm0, %v2585_v56 }
  0x61   :  { %835 = vmatpush.bf16.msrb.mxu1 %v3020_v29 }
  0x62   :  { %848 = vmatpush.bf16.msrb.mxu2 %v3023_v30  ;;  %748 = vmatpush.bf16.msra.mxu3 %v3023_v30 }
  0x63   :  { %2334 = vmatmul.msk.bf16.vlgmr.msrb.gmra.mxu0 %vm166_vm0, %v2585_v56 }
  0x64   :  { %933 = vmatpush.bf16.msrb.mxu0 %v3000_v14 }
  0x65   :  { %836 = vmatpush.bf16.msrb.mxu1 %v3026_v35 }
  0x66   :  { %849 = vmatpush.bf16.msrb.mxu2 %v3029_v36  ;;  %749 = vmatpush.bf16.msra.mxu3 %v3029_v36 }
  0x68   :  { %667 = vmatmul.bf16.vlgmr.msra.gmra.mxu1 %v3917_v5  ;;  %934 = vmatpush.bf16.msrb.mxu0 %v3010_v23 }
  0x69   :  { %837 = vmatpush.bf16.msrb.mxu1 %v3032_v39 }
  0x6a   :  { %850 = vmatpush.bf16.msrb.mxu2 %v3048_v47  ;;  %750 = vmatpush.bf16.msra.mxu3 %v3048_v47 }
  0x6c   :  { %935 = vmatpush.bf16.msrb.mxu0 %v3020_v29 }
  0x6d   :  { %838 = vmatpush.bf16.msrb.mxu1 %v3041_v43 }
  0x6e   :  { %851 = vmatpush.bf16.msrb.mxu2 %v3065_v58  ;;  %751 = vmatpush.bf16.msra.mxu3 %v3065_v58 }
  0x6f   :  { %2332 = vmatmul.msk.bf16.gmra.mxu3 %vm166_vm0, %v2586_v59 }
  0x70   :  { %936 = vmatpush.bf16.msrb.mxu0 %v3026_v35 }
  0x71   :  { %839 = vmatpush.bf16.msrb.mxu1 %v3063_v55 }
  0x72   :  { %852 = vmatpush.bf16.msrb.mxu2 %v3073_v3  ;;  %752 = vmatpush.bf16.msra.mxu3 %v3073_v3 }
  0x73   :  { %2335 = vmatmul.msk.bf16.gmra.mxu0 %vm166_vm0, %v2586_v59  ;;  %v3255_v59 = vperm.slane %v106_v4, 0 }
  0x74   :  { %937 = vmatpush.bf16.msrb.mxu0 %v3032_v39 }
  0x75   :  { %840 = vmatpush.bf16.msrb.mxu1 %v3069_v1 }
  0x76   :  { %853 = vmatpush.bf16.msrb.mxu2 %v3085_v10  ;;  %753 = vmatpush.bf16.msra.mxu3 %v3085_v10 }
  0x78   :  { %938 = vmatpush.bf16.msrb.mxu0 %v3041_v43 }
  0x79   :  { %946 = vmatpush.bf16.msra.mxu1 %v3002_v17 }
  0x7a   :  { %859 = vmatpush.bf16.msrb.mxu3 %v3071_v2 }
  0x7c   :  { %939 = vmatpush.bf16.msrb.mxu0 %v3063_v55 }
  0x7d   :  { %947 = vmatpush.bf16.msra.mxu1 %v3013_v24 }
  0x7e   :  { %860 = vmatpush.bf16.msrb.mxu3 %v3083_v9 }
  0x7f   :  { %2333 = vmatmul.msk.bf16.gmra.mxu3 %vm166_vm0, %v3203_v12 }
  0x80   :  { %940 = vmatpush.bf16.msrb.mxu0 %v3069_v1 }
  0x81   :  { %948 = vmatpush.bf16.msra.mxu1 %v3023_v30 }
  0x82   :  { %861 = vmatpush.bf16.msrb.mxu3 %v3092_v15 }
  0x83   :  { %2336 = vmatmul.msk.bf16.gmra.mxu0 %vm166_vm0, %v3203_v12  ;;  %vm919_vm0 = vcmp.gt.s32.totalorder %v3121_v38, 2 }
  0x85   :  { %949 = vmatpush.bf16.msra.mxu1 %v3029_v36 }
  0x86   :  { %862 = vmatpush.bf16.msrb.mxu3 %v3098_v19 }
  0x89   :  { %950 = vmatpush.bf16.msra.mxu1 %v3048_v47 }
  0x8a   :  { %863 = vmatpush.bf16.msrb.mxu3 %v3102_v22 }
  0x8d   :  { %951 = vmatpush.bf16.msra.mxu1 %v3065_v58 }
  0x8e   :  { %864 = vmatpush.bf16.msrb.mxu3 %v3108_v27 }
  0x91   :  { %952 = vmatpush.bf16.msra.mxu1 %v3073_v3 }
  0x92   :  { %865 = vmatpush.bf16.msrb.mxu3 %v3115_v33 }
  0x95   :  { %953 = vmatpush.bf16.msra.mxu1 %v3085_v10  ;;  %v3180_v57 = vpop.f32.mrf.mxu1 }
  0x96   :  { %v218_v37 = vadd.f32 %v3180_v57, %v3193_v6  ;;  %866 = vmatpush.bf16.msrb.mxu3 %v3128_v41 }
  0x9c   :  { %v3186_v60 = vpop.f32.mrf.mxu2 }
  0x9d   :  { %v3188_v61 = vpop.f32.mrf.mxu1 }
  0xa4   :  { %v3195_v7 = vpop.f32.mrf.mxu2 }
  0xa5   :  { %v222_v8 = vpop.f32.mrf.mxu1 }
  0xa6   :  { %v3198_v11 = vadd.f32 %v222_v8, %v3193_v6  ;;  %v188_v8 = vpop.f32.mrf.mxu0 }
  0xa7   :  { %v189_v13 = vadd.f32 %v188_v8, %v3255_v59 }
  0xac   :  { %v251_v21 = vpop.f32.mrf.mxu2 }
  0xad   :  { %v3210_v25 = vadd.f32 %v251_v21, %v3207_v20  ;;  %v3212_v26 = vpop.f32.mrf.mxu1 }
  0xb4   :  { %v3214_v40 = vpop.f32.mrf.mxu2 }
  0xb5   :  { %v227_v44 = vpop.f32.mrf.mxu1 }
  0xb6   :  { %v3217_v46 = vadd.f32 %v227_v44, %v3193_v6 }
  0xbc   :  { %v256_v48 = vpop.f32.mrf.mxu2 }
  0xbd   :  { %v3226_v49 = vadd.f32 %v256_v48, %v3207_v20  ;;  %v3228_v50 = vpop.f32.mrf.mxu1 }
  0xbe   :  { %3926 = vst [vmem:[#allocation15_spill] sm:$0xff] %v3228_v50 }
  0xbf   :  { %3925 = vst [vmem:[#allocation14_spill] sm:$0xff] %v3226_v49 }
  0xc4   :  { %v3234_v51 = vpop.f32.mrf.mxu2 }
  0xc5   :  { %3927 = vst [vmem:[#allocation16_spill] sm:$0xff] %v3234_v51  ;;  %v3236_v52 = vpop.f32.mrf.mxu1 }
  0xc6   :  { %3928 = vst [vmem:[#allocation17_spill] sm:$0xff] %v3236_v52 }
  0xcc   :  { %v261_v53 = vpop.f32.mrf.mxu2 }
  0xcd   :  { %v3245_v54 = vadd.f32 %v261_v53, %v3207_v20  ;;  %v234_v56 = vpop.f32.mrf.mxu1 }
  0xce   :  { %v3248_v62 = vadd.f32 %v234_v56, %v3193_v6 }
  0xcf   :  { %3929 = vst [vmem:[#allocation18_spill] sm:$0xff] %v3245_v54 }
  0xd0   :  { %3930 = vst [vmem:[#allocation19_spill] sm:$0xff] %v3248_v62 }
  0xd4   :  { %v263_v16 = vpop.f32.mrf.mxu2 }
  0xd5   :  { %v3265_v18 = vadd.f32 %v263_v16, %v3207_v20  ;;  %v642_v21 = vpop.f32.mrf.mxu1 }
  0xd6   :  { %v643_v4 = vadd.f32 %v642_v21, %v3257_v0 }
  0xd7   :  { %3931 = vst [vmem:[#allocation20_spill] sm:$0xff] %v3265_v18 }
  0xd8   :  { %v672_v28 = vadd.f32 %v643_v4, %v189_v13 }
  0xda   :  { %v2433_v32 = vmul.f32 -1.442695, %v672_v28 }
  0xdc   :  { %2652 = vpow2.f32 %v2433_v32  ;;  %v655_v34 = vpop.f32.mrf.mxu2  ;;  %v3289_v32 = vperm.slane %v490_v63, 2 }
  0xdd   :  { %v656_v42 = vadd.f32 %v655_v34, %v3272_v31  ;;  %v644_v44 = vpop.f32.mrf.mxu1 }
  0xdf   :  { %v692_v48 = vadd.f32 %v656_v42, %v218_v37 }
  0xe1   :  { %v2434_v53 = vmul.f32 -1.442695, %v692_v48 }
  0xe2   :  { %v2653_v12 = vpop.eup %2652 }
  0xe3   :  { %v676_v56 = vadd.f32 1.0, %v2653_v12  ;;  %2654 = vpow2.f32 %v2434_v53  ;;  %v3293_v53 = vpop.f32.mrf.mxu0 }
  0xe4   :  { %v657_v8 = vpop.f32.mrf.mxu2 }
  0xe5   :  { %2656 = vrcp.f32 %v676_v56  ;;  %v668_v13 = vpop.f32.mrf.mxu1  ;;  %v688_v37 = vand.u32 2147483648, %v676_v56  ;;  %v686_v44 = vand.u32 2147483647, %v676_v56  ;;  %vm682_vm7 = vweird.f32 %v676_v56 }
  0xe6   :  { %v669_v12 = vadd.f32 %v668_v13, %v3289_v32 }
  0xe7   :  { %v689_v63 = vor.u32 1.1754944e-38, %v688_v37  ;;  %vm687_vm9 = vcmp.eq.f32.partialorder %v686_v44, 8.507059e+37 }
  0xe9   :  { %v2655_v57 = vpop.eup %2654 }
  0xea   :  { %v696_v16 = vadd.f32 1.0, %v2655_v57 }
  0xeb   :  { %v2657_v21 = vpop.eup %2656 }
  0xec   :  { %2658 = vrcp.f32 %v696_v16  ;;  %v678_v4 = vmul.f32 %v2657_v21, %v676_v56  ;;  %vm683_vm6 = vweird.f32 %v2657_v21  ;;  %v708_v18 = vand.u32 2147483648, %v696_v16 }
  0xed   :  { %v670_v28 = vpop.f32.mrf.mxu1  ;;  %vm684_vm8 = vmor %vm682_vm7, %vm683_vm6  ;;  %v706_v52 = vand.u32 2147483647, %v696_v16  ;;  %vm702_vm11 = vweird.f32 %v696_v16 }
  0xee   :  { %v679_v34 = vsub.f32 1.0, %v678_v4  ;;  %v709_v56 = vor.u32 1.1754944e-38, %v708_v18 }
  0xef   :  { %vm707_vm13 = vcmp.eq.f32.partialorder %v706_v52, 8.507059e+37 }
  0xf0   :  { %v680_v42 = vmul.f32 %v2657_v21, %v679_v34  ;;  %v247_v34 = vadd.f32 %v3186_v60, %v3207_v20 }
  0xf2   :  { %v2659_v48 = vpop.eup %2658  ;;  %v681_v8 = vadd.f32 %v2657_v21, %v680_v42  ;;  %v3298_v42 = vpop.f32.mrf.mxu0 }
  0xf3   :  { %v698_v57 = vmul.f32 %v2659_v48, %v696_v16  ;;  %vm703_vm10 = vweird.f32 %v2659_v48  ;;  %v304_v16 = vld [vmem:[%s3913_s9] sm:$0x7] }
  0xf4   :  { %v685_v28 = vsel %vm684_vm8, %v2657_v21, %v681_v8  ;;  %vm704_vm12 = vmor %vm702_vm11, %vm703_vm10  ;;  %vm1686_vm10 = vcmp.gt.s32.totalorder %v3145_v45, 0  ;;  %vm1983_vm11 = vcmp.gt.s32.totalorder %v3145_v45, 3 }
  0xf5   :  { %v699_v4 = vsub.f32 1.0, %v698_v57  ;;  %v690_v5 = vsel %vm687_vm9, %v689_v63, %v685_v28  ;;  %v723_v57 = vpop.permute.xlu0 %722  ;;  %v3330_v28 = vperm.slane %v304_v16, 0 }
  0xf6   :  { %v712_v62 = vmul.f32 %v690_v5, %v669_v12  ;;  %vm724_vm14 = vcmp.eq.s32.totalorder %v723_v57, 1 }
  0xf7   :  { %v700_v54 = vmul.f32 %v2659_v48, %v699_v4  ;;  %vm2435_vm15 = vmpackc.low %vm724_vm14, %vm724_vm14  ;;  %3935 = vst [vmem:[#allocation24_spill] sm:$0xff] %v3330_v28 }
  0xf8   :  { %v713_v51 = vadd.f32 %v712_v62, %v247_v34 }
  0xf9   :  { %v701_v13 = vadd.f32 %v2659_v48, %v700_v54 }
  0xfa   :  { %2660 = vtanh.f32 %v713_v51  ;;  %v3300_v63 = vpop.f32.mrf.mxu0  ;;  %v3307_v51 = vpop.f32.mrf.mxu3 }
  0xfb   :  { %v705_v21 = vsel %vm704_vm12, %v2659_v48, %v701_v13  ;;  %3932 = vst [vmem:[#allocation21_spill] sm:$0xff] %v3307_v51 }
  0xfc   :  { %v710_v37 = vsel %vm707_vm13, %v709_v56, %v705_v21  ;;  %vm1419_vm13 = vcmp.gt.s32.totalorder %v3121_v38, 7 }
  0xfd   :  { %v715_v44 = vsub.f32 1.0, %v710_v37  ;;  %v717_v5 = vmul.f32 0.0, %v710_v37 }
 0x100   :  { %v2661_v8 = vpop.eup %2660 }
 0x101   :  { %v716_v60 = vmul.f32 %v2661_v8, %v715_v44 }
 0x102   :  { %v3312_v52 = vpop.f32.mrf.mxu0  ;;  %v3317_v18 = vpop.f32.mrf.mxu3 }
 0x103   :  { %v718_v12 = vadd.f32 %v717_v5, %v716_v60  ;;  %3933 = vst [vmem:[#allocation22_spill] sm:$0xff] %v3317_v18 }
 0x105   :  { %v2436_v62 = vpack.c.bf16 %v718_v12, %v718_v12  ;;  %v3302_v54 = vsel %vm724_vm14, %v718_v12, 0.0 }
 0x107   :  { %2437 = vmatmul.msk.bf16.vlgmr.msra.gmra.mxu2 %vm2435_vm15, %v2436_v62  ;;  %2440 = vmatmul.msk.bf16.vlgmr.msra.gmra.mxu3 %vm2435_vm15, %v2436_v62 }
 0x108   :  { %2443 = vmatmul.msk.bf16.vlgmr.msra.gmra.mxu0 %vm2435_vm15, %v2436_v62  ;;  %959 = vmatpush.bf16.msra.mxu2 %v3071_v2  ;;  %v3363_v62 = vperm.slane %v304_v16, 2 }
 0x109   :  { %1033 = vmatpush.bf16.msra.mxu3 %v3000_v14  ;;  %1046 = vmatpush.bf16.msra.mxu0 %v3002_v17 }
 0x10a   :  { %v3325_v48 = vpop.f32.mrf.mxu0  ;;  %v382_v4 = vpop.f32.mrf.mxu3  ;;  %3946 = vst [vmem:[#allocation35_spill] sm:$0xff] %v3363_v62 }
 0x10b   :  { %3934 = vst [vmem:[#allocation23_spill] sm:$0xff] %v3325_v48  ;;  %v3333_v34 = vadd.f32 %v382_v4, %v3330_v28 }
 0x10c   :  { %960 = vmatpush.bf16.msra.mxu2 %v3083_v9 }
 0x10d   :  { %1034 = vmatpush.bf16.msra.mxu3 %v3010_v23  ;;  %1047 = vmatpush.bf16.msra.mxu0 %v3013_v24  ;;  %3936 = vst [vmem:[#allocation25_spill] sm:$0xff] %v3333_v34 }
 0x110   :  { %961 = vmatpush.bf16.msra.mxu2 %v3092_v15 }
 0x111   :  { %1035 = vmatpush.bf16.msra.mxu3 %v3020_v29  ;;  %1048 = vmatpush.bf16.msra.mxu0 %v3023_v30 }
 0x112   :  { %v3341_v13 = vpop.f32.mrf.mxu0  ;;  %v3343_v56 = vpop.f32.mrf.mxu3 }
 0x113   :  { %3937 = vst [vmem:[#allocation26_spill] sm:$0xff] %v3341_v13 }
 0x114   :  { %962 = vmatpush.bf16.msra.mxu2 %v3098_v19  ;;  %3938 = vst [vmem:[#allocation27_spill] sm:$0xff] %v3343_v56 }
 0x115   :  { %1036 = vmatpush.bf16.msra.mxu3 %v3026_v35  ;;  %1049 = vmatpush.bf16.msra.mxu0 %v3029_v36 }
 0x118   :  { %963 = vmatpush.bf16.msra.mxu2 %v3102_v22 }
 0x119   :  { %1037 = vmatpush.bf16.msra.mxu3 %v3032_v39  ;;  %1050 = vmatpush.bf16.msra.mxu0 %v3048_v47 }
 0x11a   :  { %v387_v21 = vpop.f32.mrf.mxu3  ;;  %v3351_v44 = vpop.f32.mrf.mxu0 }
 0x11b   :  { %v3349_v37 = vadd.f32 %v387_v21, %v3330_v28  ;;  %3940 = vst [vmem:[#allocation29_spill] sm:$0xff] %v3351_v44  ;;  %v3368_v21 = vperm.slane %v304_v16, 1 }
 0x11c   :  { %964 = vmatpush.bf16.msra.mxu2 %v3108_v27 }
 0x11d   :  { %1038 = vmatpush.bf16.msra.mxu3 %v3041_v43  ;;  %1051 = vmatpush.bf16.msra.mxu0 %v3065_v58  ;;  %3939 = vst [vmem:[#allocation28_spill] sm:$0xff] %v3349_v37 }
 0x11e   :  { %3948 = vst [vmem:[#allocation37_spill] sm:$0xff] %v3368_v21 }
 0x120   :  { %965 = vmatpush.bf16.msra.mxu2 %v3115_v33 }
 0x121   :  { %1039 = vmatpush.bf16.msra.mxu3 %v3063_v55  ;;  %1052 = vmatpush.bf16.msra.mxu0 %v3073_v3 }
 0x122   :  { %v3353_v8 = vpop.f32.mrf.mxu3  ;;  %v3355_v57 = vpop.f32.mrf.mxu0 }
 0x123   :  { %3941 = vst [vmem:[#allocation30_spill] sm:$0xff] %v3353_v8 }
 0x124   :  { %966 = vmatpush.bf16.msra.mxu2 %v3128_v41  ;;  %3942 = vst [vmem:[#allocation31_spill] sm:$0xff] %v3355_v57 }
 0x125   :  { %1040 = vmatpush.bf16.msra.mxu3 %v3069_v1  ;;  %1053 = vmatpush.bf16.msra.mxu0 %v3085_v10 }
 0x12a   :  { %v3357_v60 = vpop.f32.mrf.mxu3  ;;  %v3359_v5 = vpop.f32.mrf.mxu0 }
 0x12b   :  { %3943 = vst [vmem:[#allocation32_spill] sm:$0xff] %v3357_v60 }
 0x12c   :  { %3944 = vst [vmem:[#allocation33_spill] sm:$0xff] %v3359_v5 }
 0x132   :  { %v3361_v12 = vpop.f32.mrf.mxu3  ;;  %v430_v4 = vpop.f32.mrf.mxu0 }
 0x133   :  { %3945 = vst [vmem:[#allocation34_spill] sm:$0xff] %v3361_v12  ;;  %v3366_v56 = vadd.f32 %v430_v4, %v3363_v62 }
 0x135   :  { %3947 = vst [vmem:[#allocation36_spill] sm:$0xff] %v3366_v56 }
 0x13a   :  { %v406_v37 = vpop.f32.mrf.mxu3  ;;  %v432_v8 = vpop.f32.mrf.mxu0 }
 0x13b   :  { %v3371_v34 = vadd.f32 %v406_v37, %v3368_v21  ;;  %v3374_v18 = vadd.f32 %v432_v8, %v3363_v62 }
 0x13d   :  { %3949 = vst [vmem:[#allocation38_spill] sm:$0xff] %v3371_v34 }
 0x13e   :  { %3950 = vst [vmem:[#allocation39_spill] sm:$0xff] %v3374_v18 }
 0x142   :  { %v408_v57 = vpop.f32.mrf.mxu3  ;;  %v435_v12 = vpop.f32.mrf.mxu0 }
 0x143   :  { %v3377_v5 = vadd.f32 %v408_v57, %v3368_v21  ;;  %v3380_v60 = vadd.f32 %v435_v12, %v3363_v62  ;;  %v191_v12 = vadd.f32 %v3293_v53, %v3255_v59  ;;  %v3956_v53 = vmov 0  }
 0x145   :  { %3951 = vst [vmem:[#allocation40_spill] sm:$0xff] %v3377_v5  ;;  %v220_v5 = vadd.f32 %v3188_v61, %v3193_v6 }
 0x146   :  { %3952 = vst [vmem:[#allocation41_spill] sm:$0xff] %v3380_v60 }
 0x14a   :  { %v411_v4 = vpop.f32.mrf.mxu3  ;;  %v437_v56 = vpop.f32.mrf.mxu0 }
 0x14b   :  { %v3383_v16 = vadd.f32 %v411_v4, %v3368_v21  ;;  %v3386_v37 = vadd.f32 %v437_v56, %v3363_v62 }
 0x14d   :  { %3953 = vst [vmem:[#allocation42_spill] sm:$0xff] %v3383_v16 }
 0x14e   :  { %3954 = vst [vmem:[#allocation43_spill] sm:$0xff] %v3386_v37 }
 0x152   :  { %v413_v34 = vpop.f32.mrf.mxu3 }
 0x153   :  { %v3389_v8 = vadd.f32 %v413_v34, %v3368_v21 }
 0x155   :  { %3955 = vst [vmem:[#allocation44_spill] sm:$0xff] %v3389_v8 }
 0x185   :  { %v768_v18 = vpop.f32.mrf.mxu0 }
 0x18a   :  { %v742_v44 = vpop.f32.mrf.mxu2  ;;  %v755_v57 = vpop.f32.mrf.mxu3 }
 0x18b   :  { %v743_v4 = vadd.f32 %v742_v44, %v3257_v0  ;;  %v756_v60 = vadd.f32 %v755_v57, %v3272_v31  ;;  %v920_v44 = vsel %vm919_vm0, 1, %v3956_v53 }
 0x18c   :  { %922 = vperm.xlu1 %2650, %v920_v44  }
 0x18d   :  { %v772_v16 = vadd.f32 %v743_v4, %v191_v12  ;;  %v792_v56 = vadd.f32 %v756_v60, %v220_v5  ;;  %v770_v37 = vpop.f32.mrf.mxu0 }
 0x18f   :  { %v2444_v62 = vmul.f32 -1.442695, %v772_v16  ;;  %v2445_v51 = vmul.f32 -1.442695, %v792_v56 }
 0x191   :  { %2662 = vpow2.f32 %v2444_v62 }
 0x192   :  { %2664 = vpow2.f32 %v2445_v51  ;;  %v744_v34 = vpop.f32.mrf.mxu2  ;;  %v757_v8 = vpop.f32.mrf.mxu3 }
 0x197   :  { %v2663_v21 = vpop.eup %2662 }
 0x198   :  { %v2665_v28 = vpop.eup %2664  ;;  %v776_v13 = vadd.f32 1.0, %v2663_v21  ;;  %v1020_v21 = vsel %vm1019_vm1, 1, %v3956_v53 }
 0x199   :  { %v796_v61 = vadd.f32 1.0, %v2665_v28  ;;  %1022 = vperm.xlu1 %2650, %v1020_v21   ;;  %v1687_v21 = vsel %vm1686_vm10, 1, %v3956_v53 }
 0x19a   :  { %2666 = vrcp.f32 %v776_v13  ;;  %v786_v62 = vand.u32 2147483647, %v776_v13  ;;  %v788_v37 = vand.u32 2147483648, %v776_v13  ;;  %vm782_vm4 = vweird.f32 %v776_v13 }
 0x19b   :  { %2668 = vrcp.f32 %v796_v61  ;;  %v808_v28 = vand.u32 2147483648, %v796_v61  ;;  %v806_v56 = vand.u32 2147483647, %v796_v61  ;;  %vm802_vm6 = vweird.f32 %v796_v61 }
 0x19c   :  { %v789_v44 = vor.u32 1.1754944e-38, %v788_v37  ;;  %vm787_vm7 = vcmp.eq.f32.partialorder %v786_v62, 8.507059e+37 }
 0x19d   :  { %vm807_vm9 = vcmp.eq.f32.partialorder %v806_v56, 8.507059e+37 }
 0x1a0   :  { %v2667_v57 = vpop.eup %2666 }
 0x1a1   :  { %v2669_v60 = vpop.eup %2668  ;;  %v778_v5 = vmul.f32 %v2667_v57, %v776_v13  ;;  %vm783_vm2 = vweird.f32 %v2667_v57  ;;  %1689 = vperm.xlu1 %2650, %v1687_v21  }
 0x1a2   :  { %v798_v16 = vmul.f32 %v2669_v60, %v796_v61  ;;  %vm803_vm3 = vweird.f32 %v2669_v60  ;;  %vm784_vm5 = vmor %vm782_vm4, %vm783_vm2 }
 0x1a3   :  { %v779_v51 = vsub.f32 1.0, %v778_v5  ;;  %v769_v5 = vadd.f32 %v768_v18, %v3289_v32  ;;  %vm804_vm8 = vmor %vm802_vm6, %vm803_vm3 }
 0x1a4   :  { %v799_v8 = vsub.f32 1.0, %v798_v16  ;;  %v809_v16 = vor.u32 1.1754944e-38, %v808_v28  ;;  %v1420_v28 = vsel %vm1419_vm13, 1, %v3956_v53 }
 0x1a5   :  { %v780_v12 = vmul.f32 %v2667_v57, %v779_v51 }
 0x1a6   :  { %v800_v4 = vmul.f32 %v2669_v60, %v799_v8  ;;  %v249_v8 = vadd.f32 %v3195_v7, %v3207_v20 }
 0x1a7   :  { %v781_v34 = vadd.f32 %v2667_v57, %v780_v12 }
 0x1a8   :  { %v801_v48 = vadd.f32 %v2669_v60, %v800_v4  ;;  %v194_v4 = vadd.f32 %v3298_v42, %v3255_v59 }
 0x1a9   :  { %v785_v50 = vsel %vm784_vm5, %v2667_v57, %v781_v34 }
 0x1aa   :  { %v790_v51 = vsel %vm787_vm7, %v789_v44, %v785_v50  ;;  %v805_v49 = vsel %vm804_vm8, %v2669_v60, %v801_v48  ;;  %v1984_v48 = vsel %vm1983_vm11, 1, %v3956_v53  ;;  %v823_v60 = vpop.permute.xlu0 %822  ;;  %vm1119_vm7 = vcmp.gt.s32.totalorder %v3121_v38, 4 }
 0x1ab   :  { %v812_v13 = vmul.f32 %v790_v51, %v769_v5  ;;  %v810_v12 = vsel %vm807_vm9, %v809_v16, %v805_v49  ;;  %1986 = vperm.xlu1 %2650, %v1984_v48   ;;  %vm824_vm12 = vcmp.eq.s32.totalorder %v823_v60, 1  ;;  %vm1219_vm8 = vcmp.gt.s32.totalorder %v3121_v38, 5 }
 0x1ac   :  { %v817_v61 = vmul.f32 %v810_v12, %v3302_v54  ;;  %v815_v18 = vsub.f32 1.0, %v810_v12 }
 0x1ad   :  { %v813_v37 = vadd.f32 %v812_v13, %v249_v8 }
 0x1af   :  { %2670 = vtanh.f32 %v813_v37 }
 0x1b3   :  { %1422 = vperm.xlu1 %2650, %v1420_v28  }
 0x1b5   :  { %v2671_v50 = vpop.eup %2670 }
 0x1b6   :  { %v816_v57 = vmul.f32 %v2671_v50, %v815_v18 }
 0x1b8   :  { %v818_v62 = vadd.f32 %v817_v61, %v816_v57 }
 0x1ba   :  { %v3410_v7 = vsel %vm824_vm12, %v818_v62, %v3302_v54 }
 0x1bb   :  { %v832_v49 = vpack.c.bf16 %v3410_v7, %v3410_v7 }
 0x1bd   :  { %841 = vmatmul.bf16.vlgmr.msrb.gmra.mxu1 %v832_v49  ;;  %854 = vmatmul.bf16.vlgmr.msrb.gmra.mxu2 %v832_v49 }
 0x1be   :  { %867 = vmatmul.bf16.vlgmr.msrb.gmra.mxu3 %v832_v49  ;;  %1059 = vmatpush.bf16.msrb.mxu1 %v3071_v2 }
 0x1bf   :  { %1133 = vmatpush.bf16.msrb.mxu2 %v3000_v14  ;;  %1146 = vmatpush.bf16.msrb.mxu3 %v3002_v17 }
 0x1c2   :  { %1060 = vmatpush.bf16.msrb.mxu1 %v3083_v9 }
 0x1c3   :  { %1134 = vmatpush.bf16.msrb.mxu2 %v3010_v23  ;;  %1147 = vmatpush.bf16.msrb.mxu3 %v3013_v24 }
 0x1c6   :  { %1061 = vmatpush.bf16.msrb.mxu1 %v3092_v15 }
 0x1c7   :  { %1135 = vmatpush.bf16.msrb.mxu2 %v3020_v29  ;;  %1148 = vmatpush.bf16.msrb.mxu3 %v3023_v30 }
 0x1ca   :  { %1062 = vmatpush.bf16.msrb.mxu1 %v3098_v19 }
 0x1cb   :  { %1136 = vmatpush.bf16.msrb.mxu2 %v3026_v35  ;;  %1149 = vmatpush.bf16.msrb.mxu3 %v3029_v36 }
 0x1ce   :  { %1063 = vmatpush.bf16.msrb.mxu1 %v3102_v22 }
 0x1cf   :  { %1137 = vmatpush.bf16.msrb.mxu2 %v3032_v39  ;;  %1150 = vmatpush.bf16.msrb.mxu3 %v3048_v47 }
 0x1d2   :  { %1064 = vmatpush.bf16.msrb.mxu1 %v3108_v27 }
 0x1d3   :  { %1138 = vmatpush.bf16.msrb.mxu2 %v3041_v43  ;;  %1151 = vmatpush.bf16.msrb.mxu3 %v3065_v58 }
 0x1d6   :  { %1065 = vmatpush.bf16.msrb.mxu1 %v3115_v33 }
 0x1d7   :  { %1139 = vmatpush.bf16.msrb.mxu2 %v3063_v55  ;;  %1152 = vmatpush.bf16.msrb.mxu3 %v3073_v3 }
 0x1da   :  { %1066 = vmatpush.bf16.msrb.mxu1 %v3128_v41 }
 0x1db   :  { %1140 = vmatpush.bf16.msrb.mxu2 %v3069_v1  ;;  %1153 = vmatpush.bf16.msrb.mxu3 %v3085_v10 }
 0x23a   :  { %v842_v54 = vpop.f32.mrf.mxu1 }
 0x23b   :  { %v843_v56 = vadd.f32 %v842_v54, %v3257_v0 }
 0x23d   :  { %v872_v34 = vadd.f32 %v843_v56, %v194_v4 }
 0x23f   :  { %v2446_v44 = vmul.f32 -1.442695, %v872_v34 }
 0x240   :  { %v855_v5 = vpop.f32.mrf.mxu2 }
 0x241   :  { %2672 = vpow2.f32 %v2446_v44  ;;  %v856_v16 = vadd.f32 %v855_v5, %v3272_v31  ;;  %v868_v51 = vpop.f32.mrf.mxu3 }
 0x242   :  { %v844_v8 = vpop.f32.mrf.mxu1  ;;  %v869_v44 = vadd.f32 %v868_v51, %v3289_v32 }
 0x243   :  { %v892_v13 = vadd.f32 %v856_v16, %v3198_v11 }
 0x245   :  { %v2447_v12 = vmul.f32 -1.442695, %v892_v13 }
 0x247   :  { %v2673_v61 = vpop.eup %2672  ;;  %2674 = vpow2.f32 %v2447_v12 }
 0x248   :  { %v876_v37 = vadd.f32 1.0, %v2673_v61  ;;  %v857_v21 = vpop.f32.mrf.mxu2 }
 0x249   :  { %v870_v18 = vpop.f32.mrf.mxu3 }
 0x24a   :  { %2676 = vrcp.f32 %v876_v37  ;;  %v888_v62 = vand.u32 2147483648, %v876_v37  ;;  %v886_v28 = vand.u32 2147483647, %v876_v37  ;;  %vm882_vm15 = vweird.f32 %v876_v37 }
 0x24c   :  { %v889_v56 = vor.u32 1.1754944e-38, %v888_v62  ;;  %vm887_vm1 = vcmp.eq.f32.partialorder %v886_v28, 8.507059e+37 }
 0x24d   :  { %v2675_v42 = vpop.eup %2674 }
 0x24e   :  { %v896_v50 = vadd.f32 1.0, %v2675_v42 }
 0x250   :  { %v2677_v48 = vpop.eup %2676  ;;  %2678 = vrcp.f32 %v896_v50  ;;  %v908_v12 = vand.u32 2147483648, %v896_v50  ;;  %v906_v61 = vand.u32 2147483647, %v896_v50  ;;  %vm902_vm3 = vweird.f32 %v896_v50 }
 0x251   :  { %v878_v57 = vmul.f32 %v2677_v48, %v876_v37  ;;  %vm883_vm14 = vweird.f32 %v2677_v48 }
 0x252   :  { %vm884_vm0 = vmor %vm882_vm15, %vm883_vm14  ;;  %v909_v42 = vor.u32 1.1754944e-38, %v908_v12  ;;  %vm907_vm5 = vcmp.eq.f32.partialorder %v906_v61, 8.507059e+37  ;;  %vm1785_vm14 = vcmp.gt.s32.totalorder %v3145_v45, 1  ;;  %v2792_v45 = vld [vmem:[%s3907_s3] sm:$0xff] }
 0x253   :  { %v879_v60 = vsub.f32 1.0, %v878_v57 }
 0x255   :  { %v880_v49 = vmul.f32 %v2677_v48, %v879_v60 }
 0x256   :  { %v2679_v54 = vpop.eup %2678 }
 0x257   :  { %v898_v4 = vmul.f32 %v2679_v54, %v896_v50  ;;  %v881_v11 = vadd.f32 %v2677_v48, %v880_v49  ;;  %vm903_vm2 = vweird.f32 %v2679_v54 }
 0x258   :  { %vm904_vm4 = vmor %vm902_vm3, %vm903_vm2  ;;  %vm2082_vm2 = vcmp.gt.s32.totalorder %v2792_v45, 4 }
 0x259   :  { %v899_v34 = vsub.f32 1.0, %v898_v4  ;;  %v885_v5 = vsel %vm884_vm0, %v2677_v48, %v881_v11  ;;  %v923_v48 = vpop.permute.xlu1 %922  ;;  %v196_v11 = vadd.f32 %v3300_v63, %v3255_v59  ;;  %v1120_v63 = vsel %vm1119_vm7, 1, %v3956_v53 }
 0x25a   :  { %v890_v16 = vsel %vm887_vm1, %v889_v56, %v885_v5  ;;  %vm924_vm6 = vcmp.eq.s32.totalorder %v923_v48, 1  ;;  %1122 = vperm.xlu2 %2651, %v1120_v63  }
 0x25b   :  { %v912_v8 = vmul.f32 %v890_v16, %v869_v44  ;;  %v900_v13 = vmul.f32 %v2679_v54, %v899_v34 }
 0x25d   :  { %v913_v21 = vadd.f32 %v912_v8, %v3210_v25  ;;  %v901_v18 = vadd.f32 %v2679_v54, %v900_v13 }
 0x25f   :  { %2680 = vtanh.f32 %v913_v21  ;;  %v905_v37 = vsel %vm904_vm4, %v2679_v54, %v901_v18  ;;  %v225_v54 = vadd.f32 %v3212_v26, %v3193_v6 }
 0x260   :  { %v910_v57 = vsel %vm907_vm5, %v909_v42, %v905_v37 }
 0x261   :  { %v915_v60 = vsub.f32 1.0, %v910_v57  ;;  %v917_v49 = vmul.f32 %v910_v57, %v3410_v7 }
 0x265   :  { %v2681_v51 = vpop.eup %2680 }
 0x266   :  { %v916_v62 = vmul.f32 %v2681_v51, %v915_v60 }
 0x268   :  { %v918_v28 = vadd.f32 %v917_v49, %v916_v62 }
 0x26a   :  { %v3449_v4 = vsel %vm924_vm6, %v918_v28, %v3410_v7 }
 0x26b   :  { %v932_v25 = vpack.c.bf16 %v3449_v4, %v3449_v4 }
 0x26d   :  { %941 = vmatmul.bf16.vlgmr.msrb.gmra.mxu0 %v932_v25  ;;  %954 = vmatmul.bf16.vlgmr.msra.gmra.mxu1 %v932_v25 }
 0x26e   :  { %967 = vmatmul.bf16.vlgmr.msra.gmra.mxu2 %v932_v25  ;;  %1159 = vmatpush.bf16.msrb.mxu0 %v3071_v2 }
 0x26f   :  { %1233 = vmatpush.bf16.msra.mxu1 %v3000_v14  ;;  %1246 = vmatpush.bf16.msra.mxu2 %v3002_v17 }
 0x272   :  { %1160 = vmatpush.bf16.msrb.mxu0 %v3083_v9 }
 0x273   :  { %1234 = vmatpush.bf16.msra.mxu1 %v3010_v23  ;;  %1247 = vmatpush.bf16.msra.mxu2 %v3013_v24 }
 0x276   :  { %1161 = vmatpush.bf16.msrb.mxu0 %v3092_v15 }
 0x277   :  { %1235 = vmatpush.bf16.msra.mxu1 %v3020_v29  ;;  %1248 = vmatpush.bf16.msra.mxu2 %v3023_v30 }
 0x27a   :  { %1162 = vmatpush.bf16.msrb.mxu0 %v3098_v19 }
 0x27b   :  { %1236 = vmatpush.bf16.msra.mxu1 %v3026_v35  ;;  %1249 = vmatpush.bf16.msra.mxu2 %v3029_v36 }
 0x27e   :  { %1163 = vmatpush.bf16.msrb.mxu0 %v3102_v22 }
 0x27f   :  { %1237 = vmatpush.bf16.msra.mxu1 %v3032_v39  ;;  %1250 = vmatpush.bf16.msra.mxu2 %v3048_v47 }
 0x282   :  { %1164 = vmatpush.bf16.msrb.mxu0 %v3108_v27 }
 0x283   :  { %1238 = vmatpush.bf16.msra.mxu1 %v3041_v43  ;;  %1251 = vmatpush.bf16.msra.mxu2 %v3065_v58 }
 0x286   :  { %1165 = vmatpush.bf16.msrb.mxu0 %v3115_v33 }
 0x287   :  { %1239 = vmatpush.bf16.msra.mxu1 %v3063_v55  ;;  %1252 = vmatpush.bf16.msra.mxu2 %v3073_v3 }
 0x28a   :  { %1166 = vmatpush.bf16.msrb.mxu0 %v3128_v41 }
 0x28b   :  { %1240 = vmatpush.bf16.msra.mxu1 %v3069_v1  ;;  %1253 = vmatpush.bf16.msra.mxu2 %v3085_v10 }
 0x2ea   :  { %v942_v7 = vpop.f32.mrf.mxu0  ;;  %v955_v50 = vpop.f32.mrf.mxu1 }
 0x2eb   :  { %v943_v56 = vadd.f32 %v942_v7, %v3257_v0  ;;  %v956_v34 = vadd.f32 %v955_v50, %v3272_v31  ;;  %v1220_v50 = vsel %vm1219_vm8, 1, %v3956_v53 }
 0x2ec   :  { %1222 = vperm.xlu2 %2651, %v1220_v50  }
 0x2ed   :  { %v972_v44 = vadd.f32 %v943_v56, %v196_v11  ;;  %v992_v5 = vadd.f32 %v956_v34, %v225_v54 }
 0x2ef   :  { %v2448_v16 = vmul.f32 -1.442695, %v972_v44  ;;  %v2449_v8 = vmul.f32 -1.442695, %v992_v5 }
 0x2f1   :  { %2682 = vpow2.f32 %v2448_v16  ;;  %v968_v13 = vpop.f32.mrf.mxu2  ;;  %v254_v16 = vadd.f32 %v3214_v40, %v3207_v20 }
 0x2f2   :  { %2684 = vpow2.f32 %v2449_v8  ;;  %v944_v12 = vpop.f32.mrf.mxu0  ;;  %v957_v61 = vpop.f32.mrf.mxu1  ;;  %v969_v34 = vadd.f32 %v968_v13, %v3289_v32 }
 0x2f7   :  { %v2683_v21 = vpop.eup %2682 }
 0x2f8   :  { %v2685_v18 = vpop.eup %2684  ;;  %v976_v37 = vadd.f32 1.0, %v2683_v21 }
 0x2f9   :  { %v996_v26 = vadd.f32 1.0, %v2685_v18  ;;  %v970_v42 = vpop.f32.mrf.mxu2  ;;  %v1786_v18 = vsel %vm1785_vm14, 1, %v3956_v53 }
 0x2fa   :  { %2686 = vrcp.f32 %v976_v37  ;;  %v988_v28 = vand.u32 2147483648, %v976_v37  ;;  %v986_v7 = vand.u32 2147483647, %v976_v37  ;;  %vm982_vm10 = vweird.f32 %v976_v37  ;;  %1788 = vperm.xlu2 %2651, %v1786_v18  }
 0x2fb   :  { %2688 = vrcp.f32 %v996_v26  ;;  %v1008_v8 = vand.u32 2147483648, %v996_v26  ;;  %vm1002_vm15 = vweird.f32 %v996_v26  ;;  %v1006_v61 = vand.u32 2147483647, %v996_v26 }
 0x2fc   :  { %v989_v56 = vor.u32 1.1754944e-38, %v988_v28  ;;  %vm987_vm12 = vcmp.eq.f32.partialorder %v986_v7, 8.507059e+37 }
 0x2fd   :  { %v1009_v13 = vor.u32 1.1754944e-38, %v1008_v8  ;;  %vm1007_vm1 = vcmp.eq.f32.partialorder %v1006_v61, 8.507059e+37 }
 0x300   :  { %v2687_v57 = vpop.eup %2686 }
 0x301   :  { %v2689_v60 = vpop.eup %2688  ;;  %v978_v51 = vmul.f32 %v2687_v57, %v976_v37  ;;  %vm983_vm9 = vweird.f32 %v2687_v57 }
 0x302   :  { %v998_v48 = vmul.f32 %v2689_v60, %v996_v26  ;;  %vm984_vm11 = vmor %vm982_vm10, %vm983_vm9  ;;  %vm1003_vm13 = vweird.f32 %v2689_v60 }
 0x303   :  { %v979_v62 = vsub.f32 1.0, %v978_v51  ;;  %vm1004_vm0 = vmor %vm1002_vm15, %vm1003_vm13 }
 0x304   :  { %v999_v49 = vsub.f32 1.0, %v998_v48  ;;  %v1023_v48 = vpop.permute.xlu1 %1022 }
 0x305   :  { %v980_v25 = vmul.f32 %v2687_v57, %v979_v62  ;;  %vm1024_vm3 = vcmp.eq.s32.totalorder %v1023_v48, 1 }
 0x306   :  { %v1000_v54 = vmul.f32 %v2689_v60, %v999_v49 }
 0x307   :  { %v981_v11 = vadd.f32 %v2687_v57, %v980_v25 }
 0x308   :  { %v1001_v5 = vadd.f32 %v2689_v60, %v1000_v54 }
 0x309   :  { %v985_v44 = vsel %vm984_vm11, %v2687_v57, %v981_v11  ;;  %v2083_v57 = vsel %vm2082_vm2, 1, %v3956_v53 }
 0x30a   :  { %v990_v38 = vsel %vm987_vm12, %v989_v56, %v985_v44  ;;  %v1005_v37 = vsel %vm1004_vm0, %v2689_v60, %v1001_v5  ;;  %2085 = vperm.xlu2 %2651, %v2083_v57  }
 0x30b   :  { %v1012_v12 = vmul.f32 %v990_v38, %v969_v34  ;;  %v1010_v42 = vsel %vm1007_vm1, %v1009_v13, %v1005_v37  ;;  %v3957_v37 = vld [vmem:[#allocation14_spill] sm:$0xff] }
 0x30c   :  { %v1015_v40 = vsub.f32 1.0, %v1010_v42  ;;  %v1017_v51 = vmul.f32 %v1010_v42, %v3449_v4 }
 0x30d   :  { %v1013_v21 = vadd.f32 %v1012_v12, %v254_v16 }
 0x30f   :  { %2690 = vtanh.f32 %v1013_v21 }
 0x315   :  { %v2691_v63 = vpop.eup %2690 }
 0x316   :  { %v1016_v26 = vmul.f32 %v2691_v63, %v1015_v40 }
 0x318   :  { %v1018_v62 = vadd.f32 %v1017_v51, %v1016_v26  ;;  %v1123_v26 = vpop.permute.xlu2 %1122 }
 0x319   :  { %vm1124_vm12 = vcmp.eq.s32.totalorder %v1123_v26, 1  ;;  %v2619_v26 = vld [vmem:[#allocation9 + $0x8] sm:$0xf0] }
 0x31a   :  { %v3498_v60 = vsel %vm1024_vm3, %v1018_v62, %v3449_v4 }
 0x31b   :  { %v1032_v49 = vpack.c.bf16 %v3498_v60, %v3498_v60 }
 0x31d   :  { %1041 = vmatmul.bf16.vlgmr.msra.gmra.mxu3 %v1032_v49  ;;  %1054 = vmatmul.bf16.vlgmr.msra.gmra.mxu0 %v1032_v49 }
 0x31e   :  { %1067 = vmatmul.bf16.vlgmr.msrb.gmra.mxu1 %v1032_v49  ;;  %1259 = vmatpush.bf16.msra.mxu3 %v3071_v2 }
 0x31f   :  { %1333 = vmatpush.bf16.msra.mxu0 %v3000_v14  ;;  %1346 = vmatpush.bf16.msrb.mxu1 %v3002_v17 }
 0x322   :  { %1260 = vmatpush.bf16.msra.mxu3 %v3083_v9 }
 0x323   :  { %1334 = vmatpush.bf16.msra.mxu0 %v3010_v23  ;;  %1347 = vmatpush.bf16.msrb.mxu1 %v3013_v24 }
 0x326   :  { %1261 = vmatpush.bf16.msra.mxu3 %v3092_v15 }
 0x327   :  { %1335 = vmatpush.bf16.msra.mxu0 %v3020_v29  ;;  %1348 = vmatpush.bf16.msrb.mxu1 %v3023_v30 }
 0x32a   :  { %1262 = vmatpush.bf16.msra.mxu3 %v3098_v19 }
 0x32b   :  { %1336 = vmatpush.bf16.msra.mxu0 %v3026_v35  ;;  %1349 = vmatpush.bf16.msrb.mxu1 %v3029_v36  ;;  %v199_v35 = vadd.f32 %v3312_v52, %v3255_v59 }
 0x32e   :  { %1263 = vmatpush.bf16.msra.mxu3 %v3102_v22 }
 0x32f   :  { %1337 = vmatpush.bf16.msra.mxu0 %v3032_v39  ;;  %1350 = vmatpush.bf16.msrb.mxu1 %v3048_v47 }
 0x332   :  { %1264 = vmatpush.bf16.msra.mxu3 %v3108_v27 }
 0x333   :  { %1338 = vmatpush.bf16.msra.mxu0 %v3041_v43  ;;  %1351 = vmatpush.bf16.msrb.mxu1 %v3065_v58 }
 0x336   :  { %1265 = vmatpush.bf16.msra.mxu3 %v3115_v33 }
 0x337   :  { %1339 = vmatpush.bf16.msra.mxu0 %v3063_v55  ;;  %1352 = vmatpush.bf16.msrb.mxu1 %v3073_v3 }
 0x33a   :  { %1266 = vmatpush.bf16.msra.mxu3 %v3128_v41 }
 0x33b   :  { %1340 = vmatpush.bf16.msra.mxu0 %v3069_v1  ;;  %1353 = vmatpush.bf16.msrb.mxu1 %v3085_v10 }
 0x39a   :  { %v1055_v14 = vpop.f32.mrf.mxu0 }
 0x39b   :  { %v1056_v17 = vadd.f32 %v1055_v14, %v3272_v31  ;;  %v1068_v23 = vpop.f32.mrf.mxu1 }
 0x39c   :  { %v1069_v5 = vadd.f32 %v1068_v23, %v3289_v32 }
 0x39d   :  { %v1092_v24 = vadd.f32 %v1056_v17, %v3217_v46 }
 0x39f   :  { %v2451_v29 = vmul.f32 -1.442695, %v1092_v24 }
 0x3a0   :  { %v1042_v30 = vpop.f32.mrf.mxu3 }
 0x3a1   :  { %2692 = vpow2.f32 %v2451_v29  ;;  %v1043_v36 = vadd.f32 %v1042_v30, %v3257_v0 }
 0x3a2   :  { %v1057_v39 = vpop.f32.mrf.mxu0 }
 0x3a3   :  { %v1072_v43 = vadd.f32 %v1043_v36, %v199_v35  ;;  %v1070_v47 = vpop.f32.mrf.mxu1  ;;  %v2640_v35 = vld [vmem:[#allocation9 + $0xb0] sm:$0xf0]  ;;  %v2637_v39 = vld [vmem:[#allocation9 + $0x98] sm:$0xf0] }
 0x3a5   :  { %v2450_v55 = vmul.f32 -1.442695, %v1072_v43 }
 0x3a7   :  { %v2693_v58 = vpop.eup %2692  ;;  %2694 = vpow2.f32 %v2450_v55 }
 0x3a8   :  { %v1096_v1 = vadd.f32 1.0, %v2693_v58  ;;  %v1044_v3 = vpop.f32.mrf.mxu3  ;;  %v2520_v58 = vld [vmem:[#allocation9 + $0x78] sm:$0xf] }
 0x3aa   :  { %2696 = vrcp.f32 %v1096_v1  ;;  %v1108_v61 = vand.u32 2147483648, %v1096_v1  ;;  %vm1102_vm9 = vweird.f32 %v1096_v1  ;;  %v1106_v18 = vand.u32 2147483647, %v1096_v1 }
 0x3ac   :  { %v1109_v45 = vor.u32 1.1754944e-38, %v1108_v61  ;;  %vm1107_vm11 = vcmp.eq.f32.partialorder %v1106_v18, 8.507059e+37  ;;  %v2472_v61 = vld [vmem:[#allocation9 + $0x18] sm:$0xf] }
 0x3ad   :  { %v2695_v10 = vpop.eup %2694 }
 0x3ae   :  { %v1076_v4 = vadd.f32 1.0, %v2695_v10 }
 0x3b0   :  { %2698 = vrcp.f32 %v1076_v4  ;;  %v2697_v46 = vpop.eup %2696  ;;  %v1088_v54 = vand.u32 2147483648, %v1076_v4  ;;  %v1086_v56 = vand.u32 2147483647, %v1076_v4  ;;  %vm1082_vm5 = vweird.f32 %v1076_v4 }
 0x3b1   :  { %v1098_v28 = vmul.f32 %v2697_v46, %v1096_v1  ;;  %vm1103_vm8 = vweird.f32 %v2697_v46  ;;  %v2634_v1 = vld [vmem:[#allocation9 + $0x80] sm:$0xf0] }
 0x3b2   :  { %v1089_v38 = vor.u32 1.1754944e-38, %v1088_v54  ;;  %vm1087_vm7 = vcmp.eq.f32.partialorder %v1086_v56, 8.507059e+37  ;;  %vm1104_vm10 = vmor %vm1102_vm9, %vm1103_vm8  ;;  %v2628_v56 = vld [vmem:[#allocation9 + $0x50] sm:$0xf0] }
 0x3b3   :  { %v1099_v52 = vsub.f32 1.0, %v1098_v28  ;;  %v2631_v28 = vld [vmem:[#allocation9 + $0x68] sm:$0xf0] }
 0x3b5   :  { %v1100_v34 = vmul.f32 %v2697_v46, %v1099_v52 }
 0x3b6   :  { %v2699_v25 = vpop.eup %2698 }
 0x3b7   :  { %v1078_v7 = vmul.f32 %v2699_v25, %v1076_v4  ;;  %vm1083_vm4 = vweird.f32 %v2699_v25  ;;  %v1101_v12 = vadd.f32 %v2697_v46, %v1100_v34  ;;  %v3561_v4 = vor.u32 %v2634_v1, %v2520_v58 }
 0x3b8   :  { %vm1084_vm6 = vmor %vm1082_vm5, %vm1083_vm4 }
 0x3b9   :  { %v1079_v50 = vsub.f32 1.0, %v1078_v7  ;;  %v1105_v42 = vsel %vm1104_vm10, %v2697_v46, %v1101_v12  ;;  %v2508_v46 = vld [vmem:[#allocation9 + $0x60] sm:$0xf] }
 0x3ba   :  { %v1110_v40 = vsel %vm1107_vm11, %v1109_v45, %v1105_v42 }
 0x3bb   :  { %v1080_v11 = vmul.f32 %v2699_v25, %v1079_v50  ;;  %v1115_v63 = vsub.f32 1.0, %v1110_v40  ;;  %v1117_v48 = vmul.f32 %v1110_v40, %v3498_v60  ;;  %v3564_v50 = vor.u32 %v2631_v28, %v2508_v46 }
 0x3bd   :  { %v1081_v44 = vadd.f32 %v2699_v25, %v1080_v11  ;;  %v2496_v11 = vld [vmem:[#allocation9 + $0x48] sm:$0xf] }
 0x3be   :  { %v3567_v34 = vor.u32 %v2628_v56, %v2496_v11  ;;  %v2641_v11 = vld [vmem:[#allocation9 + $0xb8] sm:$0xf0] }
 0x3bf   :  { %v1085_v16 = vsel %vm1084_vm6, %v2699_v25, %v1081_v44  ;;  %v2484_v44 = vld [vmem:[#allocation9 + $0x30] sm:$0xf] }
 0x3c0   :  { %v1090_v8 = vsel %vm1087_vm7, %v1089_v38, %v1085_v16  ;;  %v2625_v38 = vld [vmem:[#allocation9 + $0x38] sm:$0xf0] }
 0x3c1   :  { %v1112_v21 = vmul.f32 %v1090_v8, %v1069_v5  ;;  %v3570_v16 = vor.u32 %v2625_v38, %v2484_v44 }
 0x3c3   :  { %v1113_v13 = vadd.f32 %v1112_v21, %v3957_v37  ;;  %v2622_v21 = vld [vmem:[#allocation9 + $0x20] sm:$0xf0] }
 0x3c4   :  { %v3573_v45 = vor.u32 %v2622_v21, %v2472_v61  ;;  %v2636_v21 = vld [vmem:[#allocation9 + $0x94] sm:$0xf] }
 0x3c5   :  { %2700 = vtanh.f32 %v1113_v13 }
 0x3cb   :  { %v2701_v57 = vpop.eup %2700 }
 0x3cc   :  { %v1116_v51 = vmul.f32 %v2701_v57, %v1115_v63  ;;  %v2460_v57 = vld [vmem:[#allocation9] sm:$0xf] }
 0x3ce   :  { %v1118_v62 = vadd.f32 %v1117_v48, %v1116_v51 }
 0x3d0   :  { %v3535_v49 = vsel %vm1124_vm12, %v1118_v62, %v3498_v60 }
 0x3d1   :  { %v1132_v14 = vpack.c.bf16 %v3535_v49, %v3535_v49 }
 0x3d3   :  { %1141 = vmatmul.bf16.vlgmr.msrb.gmra.mxu2 %v1132_v14  ;;  %1154 = vmatmul.bf16.vlgmr.msrb.gmra.mxu3 %v1132_v14 }
 0x3d4   :  { %1167 = vmatmul.bf16.vlgmr.msrb.gmra.mxu0 %v1132_v14  ;;  %1359 = vmatpush.bf16.msrb.mxu2 %v3071_v2  ;;  %v3958_v2 = vld [vmem:[#allocation15_spill] sm:$0xff]  ;;  %v3576_v14 = vor.u32 %v2619_v26, %v2460_v57  ;;  %v2633_v26 = vld [vmem:[#allocation9 + $0x7c] sm:$0xf] }
 0x3d5   :  { %v230_v24 = vadd.f32 %v3958_v2, %v3193_v6 }
 0x3d8   :  { %1360 = vmatpush.bf16.msrb.mxu2 %v3083_v9  ;;  %v3959_v9 = vld [vmem:[#allocation23_spill] sm:$0xff] }
 0x3dc   :  { %1361 = vmatpush.bf16.msrb.mxu2 %v3092_v15  ;;  %v201_v15 = vadd.f32 %v3959_v9, %v3255_v59  ;;  %v3960_v9 = vld [vmem:[#allocation16_spill] sm:$0xff] }
 0x3e0   :  { %1362 = vmatpush.bf16.msrb.mxu2 %v3098_v19 }
 0x3e4   :  { %1363 = vmatpush.bf16.msrb.mxu2 %v3102_v22 }
 0x3e8   :  { %1364 = vmatpush.bf16.msrb.mxu2 %v3108_v27 }
 0x3ec   :  { %1365 = vmatpush.bf16.msrb.mxu2 %v3115_v33  ;;  %v2544_v33 = vld [vmem:[#allocation9 + $0xa8] sm:$0xf] }
 0x3ed   :  { %v3555_v36 = vor.u32 %v2640_v35, %v2544_v33 }
 0x3ef   :  { %1600 = vmatpush.bf16.msrb.mxu3 %v3555_v36 }
 0x3f0   :  { %1366 = vmatpush.bf16.msrb.mxu2 %v3128_v41  ;;  %v2532_v41 = vld [vmem:[#allocation9 + $0x90] sm:$0xf] }
 0x3f1   :  { %v3558_v55 = vor.u32 %v2637_v39, %v2532_v41 }
 0x3f3   :  { %1601 = vmatpush.bf16.msrb.mxu3 %v3558_v55 }
 0x3f7   :  { %1602 = vmatpush.bf16.msrb.mxu3 %v3561_v4 }
 0x3fb   :  { %1603 = vmatpush.bf16.msrb.mxu3 %v3564_v50 }
 0x3ff   :  { %1604 = vmatpush.bf16.msrb.mxu3 %v3567_v34 }
 0x403   :  { %1605 = vmatpush.bf16.msrb.mxu3 %v3570_v16 }
 0x407   :  { %1606 = vmatpush.bf16.msrb.mxu3 %v3573_v45 }
 0x40b   :  { %1607 = vmatpush.bf16.msrb.mxu3 %v3576_v14 }
 0x451   :  { %v3547_v60 = vpop.f32.mrf.mxu0 }
 0x456   :  { %v1142_v17 = vpop.f32.mrf.mxu2  ;;  %v1155_v23 = vpop.f32.mrf.mxu3 }
 0x457   :  { %v1143_v19 = vadd.f32 %v1142_v17, %v3257_v0  ;;  %v1156_v22 = vadd.f32 %v1155_v23, %v3272_v31  ;;  %v1169_v17 = vadd.f32 %v3547_v60, %v3289_v32 }
 0x459   :  { %v1172_v29 = vadd.f32 %v1143_v19, %v201_v15  ;;  %v1192_v27 = vadd.f32 %v1156_v22, %v230_v24  ;;  %v1170_v30 = vpop.f32.mrf.mxu0  ;;  %v259_v15 = vadd.f32 %v3960_v9, %v3207_v20 }
 0x45b   :  { %v2452_v43 = vmul.f32 -1.442695, %v1172_v29  ;;  %v2453_v47 = vmul.f32 -1.442695, %v1192_v27 }
 0x45d   :  { %2702 = vpow2.f32 %v2452_v43 }
 0x45e   :  { %2704 = vpow2.f32 %v2453_v47  ;;  %v1144_v3 = vpop.f32.mrf.mxu2  ;;  %v1157_v10 = vpop.f32.mrf.mxu3 }
 0x45f   :  { %v1223_v47 = vpop.permute.xlu2 %1222  ;;  %v3961_v3 = vld [vmem:[#allocation26_spill] sm:$0xff] }
 0x460   :  { %vm1224_vm5 = vcmp.eq.s32.totalorder %v1223_v47, 1  ;;  %v204_v10 = vadd.f32 %v3961_v3, %v3255_v59  ;;  %v2624_v3 = vld [vmem:[#allocation9 + $0x34] sm:$0xf] }
 0x463   :  { %v2703_v25 = vpop.eup %2702 }
 0x464   :  { %v2705_v7 = vpop.eup %2704  ;;  %v1176_v52 = vadd.f32 1.0, %v2703_v25  ;;  %v2639_v25 = vld [vmem:[#allocation9 + $0xac] sm:$0xf] }
 0x465   :  { %v1196_v54 = vadd.f32 1.0, %v2705_v7  ;;  %v2546_v7 = vld [vmem:[#allocation9 + $0xb4] sm:$0xf0] }
 0x466   :  { %2706 = vrcp.f32 %v1176_v52  ;;  %v1188_v13 = vand.u32 2147483648, %v1176_v52  ;;  %v1186_v63 = vand.u32 2147483647, %v1176_v52  ;;  %vm1182_vm14 = vweird.f32 %v1176_v52 }
 0x467   :  { %2708 = vrcp.f32 %v1196_v54  ;;  %v1208_v22 = vand.u32 2147483648, %v1196_v54  ;;  %vm1202_vm2 = vweird.f32 %v1196_v54  ;;  %v1206_v29 = vand.u32 2147483647, %v1196_v54 }
 0x468   :  { %v1189_v62 = vor.u32 1.1754944e-38, %v1188_v13  ;;  %vm1187_vm0 = vcmp.eq.f32.partialorder %v1186_v63, 8.507059e+37 }
 0x469   :  { %v1209_v33 = vor.u32 1.1754944e-38, %v1208_v22  ;;  %vm1207_vm4 = vcmp.eq.f32.partialorder %v1206_v29, 8.507059e+37 }
 0x46c   :  { %v2707_v5 = vpop.eup %2706 }
 0x46d   :  { %v2709_v8 = vpop.eup %2708  ;;  %v1178_v12 = vmul.f32 %v2707_v5, %v1176_v52  ;;  %vm1183_vm13 = vweird.f32 %v2707_v5  ;;  %v2552_v52 = vld [vmem:[#allocation9 + $0xb0] sm:$0xf] }
 0x46e   :  { %v1198_v18 = vmul.f32 %v2709_v8, %v1196_v54  ;;  %vm1184_vm15 = vmor %vm1182_vm14, %vm1183_vm13  ;;  %vm1203_vm1 = vweird.f32 %v2709_v8  ;;  %v3601_v54 = vor.u32 %v2639_v25, %v2546_v7  ;;  %v3603_v44 = vor.u32 %v2641_v11, %v2552_v52  ;;  %v2626_v25 = vld [vmem:[#allocation9 + $0x40] sm:$0xf0] }
 0x46f   :  { %v1179_v37 = vsub.f32 1.0, %v1178_v12  ;;  %vm1204_vm3 = vmor %vm1202_vm2, %vm1203_vm1 }
 0x470   :  { %v1199_v42 = vsub.f32 1.0, %v1198_v18  ;;  %1613 = vmatpush.bf16.msrb.mxu0 %v3601_v54  ;;  %v2534_v18 = vld [vmem:[#allocation9 + $0x9c] sm:$0xf0] }
 0x471   :  { %v1180_v40 = vmul.f32 %v2707_v5, %v1179_v37  ;;  %v2540_v37 = vld [vmem:[#allocation9 + $0x98] sm:$0xf] }
 0x472   :  { %v1200_v51 = vmul.f32 %v2709_v8, %v1199_v42  ;;  %v3613_v42 = vor.u32 %v2636_v21, %v2534_v18  ;;  %v3964_v21 = vld [vmem:[#allocation21_spill] sm:$0xff] }
 0x473   :  { %v1181_v48 = vadd.f32 %v2707_v5, %v1180_v40  ;;  %v2638_v40 = vld [vmem:[#allocation9 + $0xa0] sm:$0xf0] }
 0x474   :  { %v1201_v24 = vadd.f32 %v2709_v8, %v1200_v51  ;;  %v3615_v57 = vor.u32 %v2638_v40, %v2540_v37  ;;  %1614 = vmatpush.bf16.msrb.mxu0 %v3613_v42  ;;  %v2522_v51 = vld [vmem:[#allocation9 + $0x84] sm:$0xf0]  ;;  %v2623_v40 = vld [vmem:[#allocation9 + $0x28] sm:$0xf0] }
 0x475   :  { %v1185_v23 = vsel %vm1184_vm15, %v2707_v5, %v1181_v48  ;;  %v3962_v5 = vld [vmem:[#allocation17_spill] sm:$0xff]  ;;  %v3620_v48 = vor.u32 %v2633_v26, %v2522_v51 }
 0x476   :  { %v1190_v2 = vsel %vm1187_vm0, %v1189_v62, %v1185_v23  ;;  %v1205_v30 = vsel %vm1204_vm3, %v2709_v8, %v1201_v24  ;;  %v233_v8 = vadd.f32 %v3962_v5, %v3193_v6  ;;  %v2528_v62 = vld [vmem:[#allocation9 + $0x80] sm:$0xf]  ;;  %v2621_v5 = vld [vmem:[#allocation9 + $0x1c] sm:$0xf] }
 0x477   :  { %v1212_v19 = vmul.f32 %v1190_v2, %v1169_v17  ;;  %v1210_v60 = vsel %vm1207_vm4, %v1209_v33, %v1205_v30  ;;  %v2635_v17 = vld [vmem:[#allocation9 + $0x88] sm:$0xf0]  ;;  %v2632_v30 = vld [vmem:[#allocation9 + $0x70] sm:$0xf0]  ;;  %v3635_v33 = vld [vmem:[%s3915_s11] sm:$0x7] }
 0x478   :  { %v1215_v35 = vsub.f32 1.0, %v1210_v60  ;;  %v1217_v43 = vmul.f32 %v1210_v60, %v3535_v49  ;;  %v3622_v2 = vor.u32 %v2635_v17, %v2528_v62  ;;  %1615 = vmatpush.bf16.msrb.mxu0 %v3620_v48  ;;  %s2901_s11 = smov [#allocation10]  }
 0x479   :  { %v1213_v27 = vadd.f32 %v1212_v19, %v259_v15  ;;  %v2630_v15 = vld [vmem:[#allocation9 + $0x64] sm:$0xf]  ;;  %v2510_v19 = vld [vmem:[#allocation9 + $0x6c] sm:$0xf0]  ;;  %s2215_s20 = sshll.u32 %s2901_s11, 4  ;;  %s2216_s20 = int_to_ptr.vmem [resolvable:$true] %s2215_s20 }
 0x47a   :  { %v3629_v29 = vor.u32 %v2630_v15, %v2510_v19  ;;  %v2462_v15 = vld [vmem:[#allocation9 + $0xc] sm:$0xf0] }
 0x47b   :  { %2710 = vtanh.f32 %v1213_v27  ;;  %v2516_v27 = vld [vmem:[#allocation9 + $0x68] sm:$0xf] }
 0x47c   :  { %v3637_v60 = vor.u32 %v2632_v30, %v2516_v27  ;;  %1616 = vmatpush.bf16.msrb.mxu0 %v3629_v29  ;;  %v2620_v27 = vld [vmem:[#allocation9 + $0x10] sm:$0xf0] }
 0x481   :  { %v2711_v41 = vpop.eup %2710 }
 0x482   :  { %v1216_v39 = vmul.f32 %v2711_v41, %v1215_v35  ;;  %v2627_v41 = vld [vmem:[#allocation9 + $0x4c] sm:$0xf] }
 0x484   :  { %v1218_v20 = vadd.f32 %v1217_v43, %v1216_v39  ;;  %v2498_v39 = vld [vmem:[#allocation9 + $0x54] sm:$0xf0]  ;;  %v2504_v43 = vld [vmem:[#allocation9 + $0x50] sm:$0xf] }
 0x486   :  { %v3585_v58 = vsel %vm1224_vm5, %v1218_v20, %v3535_v49  ;;  %v3645_v20 = vperm.slane %v3635_v33, 0 }
 0x487   :  { %v1232_v1 = vpack.c.bf16 %v3585_v58, %v3585_v58 }
 0x489   :  { %1241 = vmatmul.bf16.vlgmr.msra.gmra.mxu1 %v1232_v1  ;;  %1254 = vmatmul.bf16.vlgmr.msra.gmra.mxu2 %v1232_v1 }
 0x48a   :  { %1267 = vmatmul.bf16.vlgmr.msra.gmra.mxu3 %v1232_v1  ;;  %1699 = vmatpush.bf16.msra.mxu2 %v3555_v36  ;;  %v3647_v1 = vor.u32 %v2627_v41, %v2498_v39 }
 0x48b   :  { %1712 = vmatpush.bf16.msra.mxu3 %v3601_v54  ;;  %1626 = vmatpush.bf16.msra.mxu1 %v3603_v44 }
 0x48c   :  { %1617 = vmatpush.bf16.msrb.mxu0 %v3647_v1 }
 0x48e   :  { %1700 = vmatpush.bf16.msra.mxu2 %v3558_v55 }
 0x48f   :  { %1713 = vmatpush.bf16.msra.mxu3 %v3613_v42  ;;  %1627 = vmatpush.bf16.msra.mxu1 %v3615_v57 }
 0x492   :  { %1701 = vmatpush.bf16.msra.mxu2 %v3561_v4 }
 0x493   :  { %1714 = vmatpush.bf16.msra.mxu3 %v3620_v48  ;;  %1628 = vmatpush.bf16.msra.mxu1 %v3622_v2 }
 0x496   :  { %1702 = vmatpush.bf16.msra.mxu2 %v3564_v50 }
 0x497   :  { %1715 = vmatpush.bf16.msra.mxu3 %v3629_v29  ;;  %1629 = vmatpush.bf16.msra.mxu1 %v3637_v60 }
 0x49a   :  { %1608 = vmatmul.bf16.vlgmr.msrb.gmra.mxu3 %v3956_v53  ;;  %1703 = vmatpush.bf16.msra.mxu2 %v3567_v34 }
 0x49b   :  { %1716 = vmatpush.bf16.msra.mxu3 %v3647_v1 }
 0x49e   :  { %1704 = vmatpush.bf16.msra.mxu2 %v3570_v16 }
 0x4a2   :  { %1705 = vmatpush.bf16.msra.mxu2 %v3573_v45 }
 0x4a6   :  { %1706 = vmatpush.bf16.msra.mxu2 %v3576_v14 }
 0x506   :  { %v1242_v49 = vpop.f32.mrf.mxu1 }
 0x507   :  { %v1243_v46 = vadd.f32 %v1242_v49, %v3257_v0  ;;  %v2629_v49 = vld [vmem:[#allocation9 + $0x58] sm:$0xf0] }
 0x509   :  { %v1272_v28 = vadd.f32 %v1243_v46, %v204_v10  ;;  %v3649_v10 = vor.u32 %v2629_v49, %v2504_v43  ;;  %v2486_v46 = vld [vmem:[#allocation9 + $0x3c] sm:$0xf0] }
 0x50b   :  { %v2454_v56 = vmul.f32 -1.442695, %v1272_v28  ;;  %v2492_v28 = vld [vmem:[#allocation9 + $0x38] sm:$0xf]  ;;  %1630 = vmatpush.bf16.msra.mxu1 %v3649_v10 }
 0x50c   :  { %v1255_v38 = vpop.f32.mrf.mxu2 }
 0x50d   :  { %2712 = vpow2.f32 %v2454_v56  ;;  %v1256_v12 = vadd.f32 %v1255_v38, %v3272_v31  ;;  %v3610_v61 = vpop.f32.mrf.mxu3  ;;  %v3656_v56 = vor.u32 %v2624_v3, %v2486_v46  ;;  %v3658_v38 = vor.u32 %v2626_v25, %v2492_v28 }
 0x50e   :  { %v1244_v13 = vpop.f32.mrf.mxu1  ;;  %v1269_v41 = vadd.f32 %v3610_v61, %v3289_v32 }
 0x50f   :  { %v1292_v63 = vadd.f32 %v1256_v12, %v233_v8  ;;  %v2474_v8 = vld [vmem:[#allocation9 + $0x24] sm:$0xf0]  ;;  %v3963_v12 = vld [vmem:[#allocation24_spill] sm:$0xff]  ;;  %v2480_v13 = vld [vmem:[#allocation9 + $0x20] sm:$0xf]  ;;  %1618 = vmatpush.bf16.msrb.mxu0 %v3656_v56  ;;  %1717 = vmatpush.bf16.msra.mxu3 %v3656_v56 }
 0x510   :  { %v378_v18 = vadd.f32 %v3964_v21, %v3963_v12  ;;  %v3667_v51 = vor.u32 %v2621_v5, %v2474_v8  ;;  %1631 = vmatpush.bf16.msra.mxu1 %v3658_v38  ;;  %v3965_v5 = vld [vmem:[#allocation18_spill] sm:$0xff] }
 0x511   :  { %v2455_v6 = vmul.f32 -1.442695, %v1292_v63 }
 0x513   :  { %v2713_v23 = vpop.eup %2712  ;;  %2714 = vpow2.f32 %v2455_v6  ;;  %1619 = vmatpush.bf16.msrb.mxu0 %v3667_v51  ;;  %1718 = vmatpush.bf16.msra.mxu3 %v3667_v51 }
 0x514   :  { %v3624_v24 = vadd.f32 1.0, %v2713_v23  ;;  %v1257_v9 = vpop.f32.mrf.mxu2  ;;  %v3672_v23 = vor.u32 %v2623_v40, %v2480_v13 }
 0x515   :  { %v1270_v22 = vpop.f32.mrf.mxu3  ;;  %v2618_v9 = vld [vmem:[#allocation9 + $0x4] sm:$0xf] }
 0x516   :  { %2716 = vrcp.f32 %v3624_v24  ;;  %v1288_v6 = vand.u32 2147483648, %v3624_v24  ;;  %v1286_v17 = vand.u32 2147483647, %v3624_v24  ;;  %v2468_v22 = vld [vmem:[#allocation9 + $0x8] sm:$0xf]  ;;  %vm1282_vm7 = vweird.f32 %v3624_v24  ;;  %1632 = vmatpush.bf16.msra.mxu1 %v3672_v23 }
 0x517   :  { %v3679_v43 = vor.u32 %v2618_v9, %v2462_v15  ;;  %v3683_v46 = vor.u32 %v2620_v27, %v2468_v22 }
 0x518   :  { %v1289_v39 = vor.u32 1.1754944e-38, %v1288_v6  ;;  %vm1287_vm9 = vcmp.eq.f32.partialorder %v1286_v17, 8.507059e+37  ;;  %v1323_v6 = vpop.permute.xlu0 %1322 }
 0x519   :  { %v2715_v35 = vpop.eup %2714  ;;  %1620 = vmatpush.bf16.msrb.mxu0 %v3679_v43  ;;  %1719 = vmatpush.bf16.msra.mxu3 %v3679_v43  ;;  %vm1324_vm14 = vcmp.eq.s32.totalorder %v1323_v6, 1 }
 0x51a   :  { %v3642_v47 = vadd.f32 1.0, %v2715_v35  ;;  %1633 = vmatpush.bf16.msra.mxu1 %v3683_v46 }
 0x51c   :  { %v2717_v7 = vpop.eup %2716  ;;  %2718 = vrcp.f32 %v3642_v47  ;;  %v1308_v61 = vand.u32 2147483648, %v3642_v47  ;;  %vm1302_vm11 = vweird.f32 %v3642_v47 }
 0x51d   :  { %v1278_v52 = vmul.f32 %v2717_v7, %v3624_v24  ;;  %v1609_v11 = vpop.f32.mrf.mxu3  ;;  %vm1283_vm6 = vweird.f32 %v2717_v7  ;;  %1824 = vmatpush.bf16.msrb.mxu3 %v3603_v44 }
 0x51e   :  { %v1610_v37 = vadd.f32 %v1609_v11, %v3645_v20  ;;  %vm1284_vm8 = vmor %vm1282_vm7, %vm1283_vm6  ;;  %v1306_v11 = vand.u32 2147483647, %v3642_v47  ;;  %v1309_v21 = vor.u32 1.1754944e-38, %v1308_v61 }
 0x51f   :  { %v1279_v63 = vsub.f32 1.0, %v1278_v52 }
 0x520   :  { %v3664_v26 = vadd.f32 %v1610_v37, %v378_v18  ;;  %vm1307_vm13 = vcmp.eq.f32.partialorder %v1306_v11, 8.507059e+37 }
 0x521   :  { %v1280_v62 = vmul.f32 %v2717_v7, %v1279_v63  ;;  %1825 = vmatpush.bf16.msrb.mxu3 %v3615_v57 }
 0x522   :  { %v2719_v19 = vpop.eup %2718 }
 0x523   :  { %v1298_v30 = vmul.f32 %v2719_v19, %v3642_v47  ;;  %v1281_v35 = vadd.f32 %v2717_v7, %v1280_v62  ;;  %vm1303_vm10 = vweird.f32 %v2719_v19 }
 0x524   :  { %vm1304_vm12 = vmor %vm1302_vm11, %vm1303_vm10 }
 0x525   :  { %v1299_v49 = vsub.f32 1.0, %v1298_v30  ;;  %v1285_v3 = vsel %vm1284_vm8, %v2717_v7, %v1281_v35  ;;  %v1611_v28 = vpop.f32.mrf.mxu3  ;;  %1826 = vmatpush.bf16.msrb.mxu3 %v3622_v2  ;;  %v3966_v35 = vld [vmem:[#allocation29_spill] sm:$0xff] }
 0x526   :  { %v1290_v24 = vsel %vm1287_vm9, %v1289_v39, %v1285_v3  ;;  %v3967_v28 = vld [vmem:[#allocation19_spill] sm:$0xff] }
 0x527   :  { %v1300_v25 = vmul.f32 %v2719_v19, %v1299_v49  ;;  %v1312_v52 = vmul.f32 %v1290_v24, %v1269_v41  ;;  %v206_v41 = vadd.f32 %v3966_v35, %v3255_v59  ;;  %v3970_v35 = vld [vmem:[#allocation35_spill] sm:$0xff] }
 0x529   :  { %v1301_v7 = vadd.f32 %v2719_v19, %v1300_v25  ;;  %v1313_v8 = vadd.f32 %v1312_v52, %v3965_v5  ;;  %1827 = vmatpush.bf16.msrb.mxu3 %v3637_v60 }
 0x52b   :  { %v1305_v18 = vsel %vm1304_vm12, %v2719_v19, %v1301_v7  ;;  %2720 = vtanh.f32 %v1313_v8 }
 0x52c   :  { %v1310_v37 = vsel %vm1307_vm13, %v1309_v21, %v1305_v18 }
 0x52d   :  { %v1315_v13 = vsub.f32 1.0, %v1310_v37  ;;  %v1317_v63 = vmul.f32 %v1310_v37, %v3585_v58  ;;  %1828 = vmatpush.bf16.msrb.mxu3 %v3649_v10  ;;  %v3758_v37 = vperm.slane %v3635_v33, 2 }
 0x531   :  { %v2721_v40 = vpop.eup %2720  ;;  %1829 = vmatpush.bf16.msrb.mxu3 %v3658_v38 }
 0x532   :  { %v1316_v47 = vmul.f32 %v2721_v40, %v1315_v13 }
 0x534   :  { %v1318_v62 = vadd.f32 %v1317_v63, %v1316_v47 }
 0x535   :  { %1830 = vmatpush.bf16.msrb.mxu3 %v3672_v23 }
 0x536   :  { %v3698_v17 = vsel %vm1324_vm14, %v1318_v62, %v3585_v58 }
 0x537   :  { %v1332_v9 = vpack.c.bf16 %v3698_v17, %v3698_v17 }
 0x539   :  { %1341 = vmatmul.bf16.vlgmr.msra.gmra.mxu0 %v1332_v9  ;;  %1354 = vmatmul.bf16.vlgmr.msrb.gmra.mxu1 %v1332_v9 }
 0x53a   :  { %1367 = vmatmul.bf16.vlgmr.msrb.gmra.mxu2 %v1332_v9  ;;  %1725 = vmatpush.bf16.msra.mxu0 %v3603_v44 }
 0x53b   :  { %1798 = vmatpush.bf16.msrb.mxu1 %v3555_v36  ;;  %1811 = vmatpush.bf16.msrb.mxu2 %v3601_v54 }
 0x53c   :  { %1831 = vmatpush.bf16.msrb.mxu3 %v3683_v46 }
 0x53e   :  { %1726 = vmatpush.bf16.msra.mxu0 %v3615_v57 }
 0x53f   :  { %1799 = vmatpush.bf16.msrb.mxu1 %v3558_v55  ;;  %1812 = vmatpush.bf16.msrb.mxu2 %v3613_v42 }
 0x542   :  { %1727 = vmatpush.bf16.msra.mxu0 %v3622_v2 }
 0x543   :  { %1800 = vmatpush.bf16.msrb.mxu1 %v3561_v4  ;;  %1813 = vmatpush.bf16.msrb.mxu2 %v3620_v48 }
 0x546   :  { %1728 = vmatpush.bf16.msra.mxu0 %v3637_v60 }
 0x547   :  { %1801 = vmatpush.bf16.msrb.mxu1 %v3564_v50  ;;  %1814 = vmatpush.bf16.msrb.mxu2 %v3629_v29 }
 0x549   :  { %1621 = vmatmul.bf16.vlgmr.msrb.gmra.mxu0 %v3956_v53  ;;  %1634 = vmatmul.bf16.vlgmr.msra.gmra.mxu1 %v3956_v53  ;;  %v2554_v53 = vmul.f32 -1.442695, %v3664_v26 }
 0x54a   :  { %1729 = vmatpush.bf16.msra.mxu0 %v3649_v10 }
 0x54b   :  { %1802 = vmatpush.bf16.msrb.mxu1 %v3567_v34  ;;  %1815 = vmatpush.bf16.msrb.mxu2 %v3647_v1  ;;  %2722 = vpow2.f32 %v2554_v53  ;;  %v3968_v53 = vld [vmem:[#allocation37_spill] sm:$0xff] }
 0x54e   :  { %1730 = vmatpush.bf16.msra.mxu0 %v3658_v38 }
 0x54f   :  { %1803 = vmatpush.bf16.msrb.mxu1 %v3570_v16  ;;  %1816 = vmatpush.bf16.msrb.mxu2 %v3656_v56 }
 0x551   :  { %v2723_v58 = vpop.eup %2722 }
 0x552   :  { %1731 = vmatpush.bf16.msra.mxu0 %v3672_v23  ;;  %v1643_v15 = vadd.f32 1.0, %v2723_v58  ;;  %v3969_v58 = vld [vmem:[#allocation32_spill] sm:$0xff] }
 0x553   :  { %1804 = vmatpush.bf16.msrb.mxu1 %v3573_v45  ;;  %1817 = vmatpush.bf16.msrb.mxu2 %v3667_v51 }
 0x554   :  { %2724 = vrcp.f32 %v1643_v15  ;;  %vm1649_vm0 = vweird.f32 %v1643_v15  ;;  %v1655_v59 = vand.u32 2147483648, %v1643_v15  ;;  %v1653_v13 = vand.u32 2147483647, %v1643_v15 }
 0x556   :  { %1732 = vmatpush.bf16.msra.mxu0 %v3683_v46  ;;  %v1656_v9 = vor.u32 1.1754944e-38, %v1655_v59  ;;  %vm1654_vm2 = vcmp.eq.f32.partialorder %v1653_v13, 8.507059e+37 }
 0x557   :  { %1805 = vmatpush.bf16.msrb.mxu1 %v3576_v14  ;;  %1818 = vmatpush.bf16.msrb.mxu2 %v3679_v43 }
 0x55a   :  { %1897 = vmatpush.bf16.msrb.mxu0 %v3555_v36  ;;  %v2725_v19 = vpop.eup %2724 }
 0x55b   :  { %1910 = vmatpush.bf16.msra.mxu1 %v3601_v54  ;;  %v1645_v30 = vmul.f32 %v2725_v19, %v1643_v15  ;;  %vm1650_vm15 = vweird.f32 %v2725_v19  ;;  %v3971_v15 = vld [vmem:[#allocation31_spill] sm:$0xff] }
 0x55c   :  { %vm1651_vm1 = vmor %vm1649_vm0, %vm1650_vm15 }
 0x55d   :  { %v1646_v25 = vsub.f32 1.0, %v1645_v30 }
 0x55e   :  { %1898 = vmatpush.bf16.msrb.mxu0 %v3558_v55 }
 0x55f   :  { %1911 = vmatpush.bf16.msra.mxu1 %v3613_v42  ;;  %v1647_v5 = vmul.f32 %v2725_v19, %v1646_v25 }
 0x561   :  { %v1648_v8 = vadd.f32 %v2725_v19, %v1647_v5 }
 0x562   :  { %1899 = vmatpush.bf16.msrb.mxu0 %v3561_v4 }
 0x563   :  { %1912 = vmatpush.bf16.msra.mxu1 %v3620_v48  ;;  %v1652_v62 = vsel %vm1651_vm1, %v2725_v19, %v1648_v8 }
 0x566   :  { %1900 = vmatpush.bf16.msrb.mxu0 %v3564_v50 }
 0x567   :  { %1913 = vmatpush.bf16.msra.mxu1 %v3629_v29 }
 0x56a   :  { %1901 = vmatpush.bf16.msrb.mxu0 %v3567_v34 }
 0x56b   :  { %1914 = vmatpush.bf16.msra.mxu1 %v3647_v1 }
 0x56e   :  { %1902 = vmatpush.bf16.msrb.mxu0 %v3570_v16 }
 0x56f   :  { %1915 = vmatpush.bf16.msra.mxu1 %v3656_v56 }
 0x572   :  { %1903 = vmatpush.bf16.msrb.mxu0 %v3573_v45 }
 0x573   :  { %1916 = vmatpush.bf16.msra.mxu1 %v3667_v51 }
 0x576   :  { %1904 = vmatpush.bf16.msrb.mxu0 %v3576_v14 }
 0x577   :  { %1917 = vmatpush.bf16.msra.mxu1 %v3679_v43 }
 0x5b6   :  { %v1342_v22 = vpop.f32.mrf.mxu0  ;;  %v1355_v27 = vpop.f32.mrf.mxu1 }
 0x5b7   :  { %v1343_v39 = vadd.f32 %v1342_v22, %v3257_v0  ;;  %v1356_v49 = vadd.f32 %v1355_v27, %v3272_v31  ;;  %v3755_v31 = vperm.slane %v3635_v33, 1  ;;  %v402_v22 = vadd.f32 %v3969_v58, %v3968_v53 }
 0x5b8   :  { %v1657_v33 = vsel %vm1654_vm2, %v1656_v9, %v1652_v62 }
 0x5b9   :  { %v1372_v3 = vadd.f32 %v1343_v39, %v206_v41  ;;  %v1392_v24 = vadd.f32 %v1356_v49, %v3967_v28  ;;  %v426_v41 = vadd.f32 %v3971_v15, %v3970_v35  ;;  %v3972_v15 = vld [vmem:[#allocation20_spill] sm:$0xff] }
 0x5bb   :  { %v2456_v26 = vmul.f32 -1.442695, %v1372_v3  ;;  %v2457_v61 = vmul.f32 -1.442695, %v1392_v24 }
 0x5bd   :  { %2726 = vpow2.f32 %v2456_v26  ;;  %v1368_v52 = vpop.f32.mrf.mxu2 }
 0x5be   :  { %2728 = vpow2.f32 %v2457_v61  ;;  %v1344_v11 = vpop.f32.mrf.mxu0  ;;  %v1357_v7 = vpop.f32.mrf.mxu1 }
 0x5c3   :  { %v2727_v21 = vpop.eup %2726 }
 0x5c4   :  { %v2729_v0 = vpop.eup %2728  ;;  %v1376_v18 = vadd.f32 1.0, %v2727_v21 }
 0x5c5   :  { %v1396_v40 = vadd.f32 1.0, %v2729_v0  ;;  %v1370_v47 = vpop.f32.mrf.mxu2 }
 0x5c6   :  { %2730 = vrcp.f32 %v1376_v18  ;;  %v1622_v63 = vpop.f32.mrf.mxu0  ;;  %v1635_v6 = vpop.f32.mrf.mxu1  ;;  %v1388_v8 = vand.u32 2147483648, %v1376_v18  ;;  %v1386_v59 = vand.u32 2147483647, %v1376_v18  ;;  %vm1382_vm4 = vweird.f32 %v1376_v18 }
 0x5c7   :  { %2732 = vrcp.f32 %v1396_v40  ;;  %v1623_v27 = vadd.f32 %v1622_v63, %v3755_v31  ;;  %v1636_v30 = vadd.f32 %v1635_v6, %v3758_v37  ;;  %v1369_v6 = vadd.f32 %v1368_v52, %v3289_v32 }
 0x5c8   :  { %v1389_v63 = vor.u32 1.1754944e-38, %v1388_v8  ;;  %vm1387_vm6 = vcmp.eq.f32.partialorder %v1386_v59, 8.507059e+37  ;;  %vm1402_vm8 = vweird.f32 %v1396_v40 }
 0x5c9   :  { %v1659_v39 = vadd.f32 %v1623_v27, %v402_v22  ;;  %v1679_v49 = vmul.f32 %v1657_v33, %v1636_v30  ;;  %v1408_v27 = vand.u32 2147483648, %v1396_v40  ;;  %v1406_v33 = vand.u32 2147483647, %v1396_v40 }
 0x5cb   :  { %v2555_v28 = vmul.f32 -1.442695, %v1659_v39  ;;  %v1680_v24 = vadd.f32 %v1679_v49, %v426_v41  ;;  %v1409_v39 = vor.u32 1.1754944e-38, %v1408_v27  ;;  %vm1407_vm10 = vcmp.eq.f32.partialorder %v1406_v33, 8.507059e+37  ;;  %v3973_v27 = vld [vmem:[#allocation22_spill] sm:$0xff] }
 0x5cc   :  { %v2731_v3 = vpop.eup %2730  ;;  %v3974_v33 = vld [vmem:[#allocation34_spill] sm:$0xff] }
 0x5cd   :  { %v2733_v19 = vpop.eup %2732  ;;  %v1378_v25 = vmul.f32 %v2731_v3, %v1376_v18  ;;  %2734 = vpow2.f32 %v2555_v28  ;;  %vm1383_vm3 = vweird.f32 %v2731_v3 }
 0x5ce   :  { %v1398_v26 = vmul.f32 %v2733_v19, %v1396_v40  ;;  %v1624_v61 = vpop.f32.mrf.mxu0  ;;  %v1637_v11 = vpop.f32.mrf.mxu1  ;;  %vm1384_vm5 = vmor %vm1382_vm4, %vm1383_vm3  ;;  %vm1403_vm7 = vweird.f32 %v2733_v19 }
 0x5cf   :  { %v1379_v7 = vsub.f32 1.0, %v1378_v25  ;;  %vm1404_vm9 = vmor %vm1402_vm8, %vm1403_vm7 }
 0x5d0   :  { %v1399_v5 = vsub.f32 1.0, %v1398_v26 }
 0x5d1   :  { %v1380_v21 = vmul.f32 %v2731_v3, %v1379_v7 }
 0x5d2   :  { %v1400_v0 = vmul.f32 %v2733_v19, %v1399_v5 }
 0x5d3   :  { %v1381_v13 = vadd.f32 %v2731_v3, %v1380_v21  ;;  %v2735_v47 = vpop.eup %2734 }
 0x5d4   :  { %v1663_v9 = vadd.f32 1.0, %v2735_v47  ;;  %v1401_v22 = vadd.f32 %v2733_v19, %v1400_v0 }
 0x5d5   :  { %v1385_v62 = vsel %vm1384_vm5, %v2731_v3, %v1381_v13 }
 0x5d6   :  { %v1390_v58 = vsel %vm1387_vm6, %v1389_v63, %v1385_v62  ;;  %2736 = vrcp.f32 %v1663_v9  ;;  %v1405_v18 = vsel %vm1404_vm9, %v2733_v19, %v1401_v22  ;;  %v1675_v26 = vand.u32 2147483648, %v1663_v9 }
 0x5d7   :  { %v1412_v30 = vmul.f32 %v1390_v58, %v1369_v6  ;;  %v1410_v32 = vsel %vm1407_vm10, %v1409_v39, %v1405_v18  ;;  %v1673_v61 = vand.u32 2147483647, %v1663_v9  ;;  %vm1669_vm12 = vweird.f32 %v1663_v9  ;;  %v3771_v6 = vpop.permute.xlu1 %1689 }
 0x5d8   :  { %v1415_v3 = vsub.f32 1.0, %v1410_v32  ;;  %v1417_v40 = vmul.f32 %v1410_v32, %v3698_v17  ;;  %v1676_v8 = vor.u32 1.1754944e-38, %v1675_v26  ;;  %vm1691_vm15 = vcmp.eq.s32.totalorder %v3771_v6, 1 }
 0x5d9   :  { %v1413_v41 = vadd.f32 %v1412_v30, %v3972_v15  ;;  %vm1674_vm14 = vcmp.eq.f32.partialorder %v1673_v61, 8.507059e+37  ;;  %vm2556_vm0 = vmpackc.low %vm1691_vm15, %vm1691_vm15  ;;  %v380_v30 = vadd.f32 %v3973_v27, %v3963_v12  ;;  %v404_v15 = vadd.f32 %v3974_v33, %v3968_v53 }
 0x5db   :  { %2738 = vtanh.f32 %v1413_v41 }
 0x5dc   :  { %v2737_v49 = vpop.eup %2736  ;;  %2740 = vtanh.f32 %v1680_v24 }
 0x5dd   :  { %v1665_v52 = vmul.f32 %v2737_v49, %v1663_v9  ;;  %vm1670_vm11 = vweird.f32 %v2737_v49 }
 0x5de   :  { %vm1671_vm13 = vmor %vm1669_vm12, %vm1670_vm11 }
 0x5df   :  { %v1666_v28 = vsub.f32 1.0, %v1665_v52 }
 0x5e1   :  { %v2739_v25 = vpop.eup %2738  ;;  %v1667_v7 = vmul.f32 %v2737_v49, %v1666_v28 }
 0x5e2   :  { %v1416_v11 = vmul.f32 %v2739_v25, %v1415_v3  ;;  %v2741_v13 = vpop.eup %2740 }
 0x5e3   :  { %v1668_v5 = vadd.f32 %v2737_v49, %v1667_v7 }
 0x5e4   :  { %v3769_v19 = vadd.f32 %v1417_v40, %v1416_v11 }
 0x5e5   :  { %v1672_v21 = vsel %vm1671_vm13, %v2737_v49, %v1668_v5 }
 0x5e6   :  { %v1677_v59 = vsel %vm1674_vm14, %v1676_v8, %v1672_v21 }
 0x5e7   :  { %v1682_v0 = vsub.f32 1.0, %v1677_v59  ;;  %v1684_v63 = vmul.f32 0.0, %v1677_v59 }
 0x5e9   :  { %v1683_v47 = vmul.f32 %v2741_v13, %v1682_v0 }
 0x5eb   :  { %v3774_v62 = vadd.f32 %v1684_v63, %v1683_v47 }
 0x5ed   :  { %v2557_v24 = vpack.c.bf16 %v3774_v62, %v3774_v62 }
 0x5ef   :  { %2558 = vmatmul.msk.bf16.vlgmr.msra.gmra.mxu2 %vm2556_vm0, %v2557_v24  ;;  %2561 = vmatmul.msk.bf16.vlgmr.msra.gmra.mxu3 %vm2556_vm0, %v2557_v24 }
 0x5f0   :  { %2564 = vmatmul.msk.bf16.vlgmr.msra.gmra.mxu0 %vm2556_vm0, %v2557_v24  ;;  %1923 = vmatpush.bf16.msra.mxu2 %v3603_v44 }
 0x5f1   :  { %1996 = vmatpush.bf16.msra.mxu3 %v3555_v36  ;;  %2009 = vmatpush.bf16.msra.mxu0 %v3601_v54 }
 0x5f4   :  { %1924 = vmatpush.bf16.msra.mxu2 %v3615_v57 }
 0x5f5   :  { %1997 = vmatpush.bf16.msra.mxu3 %v3558_v55  ;;  %2010 = vmatpush.bf16.msra.mxu0 %v3613_v42 }
 0x5f8   :  { %1925 = vmatpush.bf16.msra.mxu2 %v3622_v2 }
 0x5f9   :  { %1998 = vmatpush.bf16.msra.mxu3 %v3561_v4  ;;  %2011 = vmatpush.bf16.msra.mxu0 %v3620_v48 }
 0x5fc   :  { %1926 = vmatpush.bf16.msra.mxu2 %v3637_v60 }
 0x5fd   :  { %1999 = vmatpush.bf16.msra.mxu3 %v3564_v50  ;;  %2012 = vmatpush.bf16.msra.mxu0 %v3629_v29 }
 0x600   :  { %1927 = vmatpush.bf16.msra.mxu2 %v3649_v10 }
 0x601   :  { %2000 = vmatpush.bf16.msra.mxu3 %v3567_v34  ;;  %2013 = vmatpush.bf16.msra.mxu0 %v3647_v1 }
 0x604   :  { %1928 = vmatpush.bf16.msra.mxu2 %v3658_v38 }
 0x605   :  { %2001 = vmatpush.bf16.msra.mxu3 %v3570_v16  ;;  %2014 = vmatpush.bf16.msra.mxu0 %v3656_v56 }
 0x608   :  { %1929 = vmatpush.bf16.msra.mxu2 %v3672_v23 }
 0x609   :  { %2002 = vmatpush.bf16.msra.mxu3 %v3573_v45  ;;  %2015 = vmatpush.bf16.msra.mxu0 %v3667_v51 }
 0x60c   :  { %1930 = vmatpush.bf16.msra.mxu2 %v3683_v46 }
 0x60d   :  { %2003 = vmatpush.bf16.msra.mxu3 %v3576_v14  ;;  %2016 = vmatpush.bf16.msra.mxu0 %v3679_v43 }
 0x66d   :  { %v1734_v9 = vpop.f32.mrf.mxu0 }
 0x66e   :  { %v1735_v33 = vadd.f32 %v1734_v9, %v3758_v37 }
 0x672   :  { %v1708_v58 = vpop.f32.mrf.mxu2  ;;  %v1721_v22 = vpop.f32.mrf.mxu3 }
 0x673   :  { %v1709_v41 = vadd.f32 %v1708_v58, %v3645_v20  ;;  %v1722_v18 = vadd.f32 %v1721_v22, %v3755_v31 }
 0x675   :  { %v1738_v39 = vadd.f32 %v1709_v41, %v380_v30  ;;  %v1758_v49 = vadd.f32 %v1722_v18, %v404_v15  ;;  %v1736_v32 = vpop.f32.mrf.mxu0 }
 0x677   :  { %v2565_v52 = vmul.f32 -1.442695, %v1738_v39  ;;  %v2566_v3 = vmul.f32 -1.442695, %v1758_v49  ;;  %v3975_v49 = vld [vmem:[#allocation33_spill] sm:$0xff] }
 0x678   :  { %v428_v32 = vadd.f32 %v3975_v49, %v3970_v35 }
 0x679   :  { %2742 = vpow2.f32 %v2565_v52  ;;  %v1692_v52 = vsel %vm1691_vm15, %v3774_v62, 0.0 }
 0x67a   :  { %2744 = vpow2.f32 %v2566_v3  ;;  %v1710_v28 = vpop.f32.mrf.mxu2  ;;  %v1723_v25 = vpop.f32.mrf.mxu3 }
 0x67f   :  { %v2743_v26 = vpop.eup %2742 }
 0x680   :  { %v2745_v61 = vpop.eup %2744  ;;  %v1742_v11 = vadd.f32 1.0, %v2743_v26 }
 0x681   :  { %v1762_v7 = vadd.f32 1.0, %v2745_v61 }
 0x682   :  { %2746 = vrcp.f32 %v1742_v11  ;;  %v1754_v59 = vand.u32 2147483648, %v1742_v11  ;;  %v1752_v47 = vand.u32 2147483647, %v1742_v11  ;;  %vm1748_vm3 = vweird.f32 %v1742_v11 }
 0x683   :  { %2748 = vrcp.f32 %v1762_v7  ;;  %v1774_v63 = vand.u32 2147483648, %v1762_v7  ;;  %v1772_v58 = vand.u32 2147483647, %v1762_v7  ;;  %vm1768_vm5 = vweird.f32 %v1762_v7 }
 0x684   :  { %v1755_v27 = vor.u32 1.1754944e-38, %v1754_v59  ;;  %vm1753_vm6 = vcmp.eq.f32.partialorder %v1752_v47, 8.507059e+37 }
 0x685   :  { %v1775_v41 = vor.u32 1.1754944e-38, %v1774_v63  ;;  %vm1773_vm8 = vcmp.eq.f32.partialorder %v1772_v58, 8.507059e+37 }
 0x688   :  { %v2747_v53 = vpop.eup %2746 }
 0x689   :  { %v2749_v40 = vpop.eup %2748  ;;  %v1744_v5 = vmul.f32 %v2747_v53, %v1742_v11  ;;  %vm1749_vm1 = vweird.f32 %v2747_v53 }
 0x68a   :  { %v1764_v8 = vmul.f32 %v2749_v40, %v1762_v7  ;;  %vm1769_vm2 = vweird.f32 %v2749_v40  ;;  %vm1750_vm4 = vmor %vm1748_vm3, %vm1749_vm1  ;;  %v1789_v7 = vpop.permute.xlu2 %1788 }
 0x68b   :  { %v1745_v21 = vsub.f32 1.0, %v1744_v5  ;;  %vm1770_vm7 = vmor %vm1768_vm5, %vm1769_vm2  ;;  %vm1790_vm9 = vcmp.eq.s32.totalorder %v1789_v7, 1  ;;  %v1888_v7 = vpop.permute.xlu0 %1887 }
 0x68c   :  { %v1765_v0 = vsub.f32 1.0, %v1764_v8  ;;  %vm1889_vm2 = vcmp.eq.s32.totalorder %v1888_v7, 1  ;;  %v3982_v7 = vld [vmem:[#allocation42_spill] sm:$0xff] }
 0x68d   :  { %v1746_v13 = vmul.f32 %v2747_v53, %v1745_v21 }
 0x68e   :  { %v1766_v24 = vmul.f32 %v2749_v40, %v1765_v0 }
 0x68f   :  { %v1747_v22 = vadd.f32 %v2747_v53, %v1746_v13 }
 0x690   :  { %v1767_v30 = vadd.f32 %v2749_v40, %v1766_v24 }
 0x691   :  { %v1751_v15 = vsel %vm1750_vm4, %v2747_v53, %v1747_v22 }
 0x692   :  { %v1756_v18 = vsel %vm1753_vm6, %v1755_v27, %v1751_v15  ;;  %v1771_v39 = vsel %vm1770_vm7, %v2749_v40, %v1767_v30 }
 0x693   :  { %v1778_v3 = vmul.f32 %v1756_v18, %v1735_v33  ;;  %v1776_v28 = vsel %vm1773_vm8, %v1775_v41, %v1771_v39 }
 0x694   :  { %v1783_v25 = vmul.f32 %v1776_v28, %v1692_v52  ;;  %v1781_v9 = vsub.f32 1.0, %v1776_v28 }
 0x695   :  { %v1779_v26 = vadd.f32 %v1778_v3, %v428_v32  ;;  %v3978_v32 = vld [vmem:[#allocation36_spill] sm:$0xff] }
 0x697   :  { %2750 = vtanh.f32 %v1779_v26 }
 0x69d   :  { %v2751_v61 = vpop.eup %2750 }
 0x69e   :  { %v1782_v11 = vmul.f32 %v2751_v61, %v1781_v9 }
 0x6a0   :  { %v1784_v53 = vadd.f32 %v1783_v25, %v1782_v11 }
 0x6a2   :  { %v3817_v40 = vsel %vm1790_vm9, %v1784_v53, %v1692_v52 }
 0x6a3   :  { %v1797_v35 = vpack.c.bf16 %v3817_v40, %v3817_v40 }
 0x6a5   :  { %1806 = vmatmul.bf16.vlgmr.msrb.gmra.mxu1 %v1797_v35  ;;  %1819 = vmatmul.bf16.vlgmr.msrb.gmra.mxu2 %v1797_v35 }
 0x6a6   :  { %1832 = vmatmul.bf16.vlgmr.msrb.gmra.mxu3 %v1797_v35  ;;  %2022 = vmatpush.bf16.msrb.mxu1 %v3603_v44 }
 0x6a7   :  { %2095 = vmatpush.bf16.msrb.mxu2 %v3555_v36  ;;  %2108 = vmatpush.bf16.msrb.mxu3 %v3601_v54 }
 0x6aa   :  { %2023 = vmatpush.bf16.msrb.mxu1 %v3615_v57 }
 0x6ab   :  { %2096 = vmatpush.bf16.msrb.mxu2 %v3558_v55  ;;  %2109 = vmatpush.bf16.msrb.mxu3 %v3613_v42 }
 0x6ae   :  { %2024 = vmatpush.bf16.msrb.mxu1 %v3622_v2 }
 0x6af   :  { %2097 = vmatpush.bf16.msrb.mxu2 %v3561_v4  ;;  %2110 = vmatpush.bf16.msrb.mxu3 %v3620_v48  ;;  %v3976_v4 = vld [vmem:[#allocation25_spill] sm:$0xff]  ;;  %v3977_v48 = vld [vmem:[#allocation38_spill] sm:$0xff] }
 0x6b2   :  { %2025 = vmatpush.bf16.msrb.mxu1 %v3637_v60 }
 0x6b3   :  { %2098 = vmatpush.bf16.msrb.mxu2 %v3564_v50  ;;  %2111 = vmatpush.bf16.msrb.mxu3 %v3629_v29 }
 0x6b6   :  { %2026 = vmatpush.bf16.msrb.mxu1 %v3649_v10 }
 0x6b7   :  { %2099 = vmatpush.bf16.msrb.mxu2 %v3567_v34  ;;  %2112 = vmatpush.bf16.msrb.mxu3 %v3647_v1 }
 0x6ba   :  { %2027 = vmatpush.bf16.msrb.mxu1 %v3658_v38 }
 0x6bb   :  { %2100 = vmatpush.bf16.msrb.mxu2 %v3570_v16  ;;  %2113 = vmatpush.bf16.msrb.mxu3 %v3656_v56 }
 0x6be   :  { %2028 = vmatpush.bf16.msrb.mxu1 %v3672_v23 }
 0x6bf   :  { %2101 = vmatpush.bf16.msrb.mxu2 %v3573_v45  ;;  %2114 = vmatpush.bf16.msrb.mxu3 %v3667_v51 }
 0x6c2   :  { %2029 = vmatpush.bf16.msrb.mxu1 %v3683_v46 }
 0x6c3   :  { %2102 = vmatpush.bf16.msrb.mxu2 %v3576_v14  ;;  %2115 = vmatpush.bf16.msrb.mxu3 %v3679_v43 }
 0x722   :  { %v1807_v36 = vpop.f32.mrf.mxu1 }
 0x723   :  { %v1808_v55 = vadd.f32 %v1807_v36, %v3645_v20 }
 0x725   :  { %v1837_v50 = vadd.f32 %v1808_v55, %v3976_v4  ;;  %v3979_v4 = vld [vmem:[#allocation27_spill] sm:$0xff] }
 0x727   :  { %v2567_v34 = vmul.f32 -1.442695, %v1837_v50  ;;  %v385_v50 = vadd.f32 %v3979_v4, %v3963_v12 }
 0x728   :  { %v1820_v16 = vpop.f32.mrf.mxu2 }
 0x729   :  { %2752 = vpow2.f32 %v2567_v34  ;;  %v1821_v54 = vadd.f32 %v1820_v16, %v3755_v31  ;;  %v1833_v42 = vpop.f32.mrf.mxu3  ;;  %v3980_v34 = vld [vmem:[#allocation40_spill] sm:$0xff] }
 0x72a   :  { %v1809_v45 = vpop.f32.mrf.mxu1  ;;  %v1834_v27 = vadd.f32 %v1833_v42, %v3758_v37 }
 0x72b   :  { %v1857_v29 = vadd.f32 %v1821_v54, %v3977_v48 }
 0x72d   :  { %v2568_v1 = vmul.f32 -1.442695, %v1857_v29 }
 0x72f   :  { %v2753_v56 = vpop.eup %2752  ;;  %2754 = vpow2.f32 %v2568_v1 }
 0x730   :  { %v1841_v14 = vadd.f32 1.0, %v2753_v56  ;;  %v1822_v51 = vpop.f32.mrf.mxu2 }
 0x731   :  { %v1835_v43 = vpop.f32.mrf.mxu3 }
 0x732   :  { %2756 = vrcp.f32 %v1841_v14  ;;  %v1853_v59 = vand.u32 2147483648, %v1841_v14  ;;  %v1851_v13 = vand.u32 2147483647, %v1841_v14  ;;  %vm1847_vm11 = vweird.f32 %v1841_v14 }
 0x734   :  { %v1854_v58 = vor.u32 1.1754944e-38, %v1853_v59  ;;  %vm1852_vm13 = vcmp.eq.f32.partialorder %v1851_v13, 8.507059e+37 }
 0x735   :  { %v2755_v6 = vpop.eup %2754 }
 0x736   :  { %v1861_v62 = vadd.f32 1.0, %v2755_v6 }
 0x738   :  { %v2757_v5 = vpop.eup %2756  ;;  %2758 = vrcp.f32 %v1861_v62  ;;  %v1873_v41 = vand.u32 2147483648, %v1861_v62  ;;  %v1871_v39 = vand.u32 2147483647, %v1861_v62  ;;  %vm1867_vm15 = vweird.f32 %v1861_v62 }
 0x739   :  { %v1843_v8 = vmul.f32 %v2757_v5, %v1841_v14  ;;  %vm1848_vm10 = vweird.f32 %v2757_v5 }
 0x73a   :  { %vm1849_vm12 = vmor %vm1847_vm11, %vm1848_vm10  ;;  %v1874_v3 = vor.u32 1.1754944e-38, %v1873_v41  ;;  %vm1872_vm1 = vcmp.eq.f32.partialorder %v1871_v39, 8.507059e+37 }
 0x73b   :  { %v1844_v21 = vsub.f32 1.0, %v1843_v8 }
 0x73d   :  { %v1845_v0 = vmul.f32 %v2757_v5, %v1844_v21 }
 0x73e   :  { %v2759_v47 = vpop.eup %2758 }
 0x73f   :  { %v1863_v63 = vmul.f32 %v2759_v47, %v1861_v62  ;;  %v1846_v24 = vadd.f32 %v2757_v5, %v1845_v0  ;;  %vm1868_vm14 = vweird.f32 %v2759_v47 }
 0x740   :  { %vm1869_vm0 = vmor %vm1867_vm15, %vm1868_vm14 }
 0x741   :  { %v1864_v22 = vsub.f32 1.0, %v1863_v63  ;;  %v1850_v30 = vsel %vm1849_vm12, %v2757_v5, %v1846_v24 }
 0x742   :  { %v1855_v33 = vsel %vm1852_vm13, %v1854_v58, %v1850_v30  ;;  %v3981_v30 = vld [vmem:[#allocation39_spill] sm:$0xff] }
 0x743   :  { %v1865_v15 = vmul.f32 %v2759_v47, %v1864_v22  ;;  %v1877_v18 = vmul.f32 %v1855_v33, %v1834_v27 }
 0x745   :  { %v1866_v49 = vadd.f32 %v2759_v47, %v1865_v15  ;;  %v1878_v52 = vadd.f32 %v1877_v18, %v3978_v32 }
 0x747   :  { %v1870_v28 = vsel %vm1869_vm0, %v2759_v47, %v1866_v49  ;;  %2760 = vtanh.f32 %v1878_v52 }
 0x748   :  { %v1875_v25 = vsel %vm1872_vm1, %v1874_v3, %v1870_v28  ;;  %v1987_v3 = vpop.permute.xlu1 %1986 }
 0x749   :  { %v1880_v26 = vsub.f32 1.0, %v1875_v25  ;;  %v1882_v11 = vmul.f32 %v1875_v25, %v3817_v40  ;;  %vm1988_vm11 = vcmp.eq.s32.totalorder %v1987_v3, 1 }
 0x74d   :  { %v2761_v9 = vpop.eup %2760 }
 0x74e   :  { %v1881_v61 = vmul.f32 %v2761_v9, %v1880_v26 }
 0x750   :  { %v1883_v53 = vadd.f32 %v1882_v11, %v1881_v61 }
 0x752   :  { %v3853_v35 = vsel %vm1889_vm2, %v1883_v53, %v3817_v40 }
 0x753   :  { %v1896_v36 = vpack.c.bf16 %v3853_v35, %v3853_v35 }
 0x755   :  { %1905 = vmatmul.bf16.vlgmr.msrb.gmra.mxu0 %v1896_v36  ;;  %1918 = vmatmul.bf16.vlgmr.msra.gmra.mxu1 %v1896_v36 }
 0x756   :  { %1931 = vmatmul.bf16.vlgmr.msra.gmra.mxu2 %v1896_v36  ;;  %2121 = vmatpush.bf16.msrb.mxu0 %v3603_v44 }
 0x75a   :  { %2122 = vmatpush.bf16.msrb.mxu0 %v3615_v57 }
 0x75e   :  { %2123 = vmatpush.bf16.msrb.mxu0 %v3622_v2 }
 0x762   :  { %2124 = vmatpush.bf16.msrb.mxu0 %v3637_v60 }
 0x766   :  { %2125 = vmatpush.bf16.msrb.mxu0 %v3649_v10 }
 0x76a   :  { %2126 = vmatpush.bf16.msrb.mxu0 %v3658_v38 }
 0x76e   :  { %2127 = vmatpush.bf16.msrb.mxu0 %v3672_v23 }
 0x772   :  { %2128 = vmatpush.bf16.msrb.mxu0 %v3683_v46 }
 0x7d2   :  { %v1906_v40 = vpop.f32.mrf.mxu0  ;;  %v1919_v55 = vpop.f32.mrf.mxu1 }
 0x7d3   :  { %v1907_v44 = vadd.f32 %v1906_v40, %v3645_v20  ;;  %v1920_v57 = vadd.f32 %v1919_v55, %v3755_v31 }
 0x7d5   :  { %v1936_v2 = vadd.f32 %v1907_v44, %v385_v50  ;;  %v1956_v60 = vadd.f32 %v1920_v57, %v3980_v34 }
 0x7d7   :  { %v2569_v16 = vmul.f32 -1.442695, %v1936_v2  ;;  %v2570_v10 = vmul.f32 -1.442695, %v1956_v60 }
 0x7d9   :  { %2762 = vpow2.f32 %v2569_v16  ;;  %v1932_v38 = vpop.f32.mrf.mxu2 }
 0x7da   :  { %2764 = vpow2.f32 %v2570_v10  ;;  %v1908_v23 = vpop.f32.mrf.mxu0  ;;  %v1921_v54 = vpop.f32.mrf.mxu1  ;;  %v1933_v13 = vadd.f32 %v1932_v38, %v3758_v37 }
 0x7df   :  { %v2763_v46 = vpop.eup %2762 }
 0x7e0   :  { %v2765_v42 = vpop.eup %2764  ;;  %v1940_v45 = vadd.f32 1.0, %v2763_v46 }
 0x7e1   :  { %v1960_v48 = vadd.f32 1.0, %v2765_v42  ;;  %v1934_v29 = vpop.f32.mrf.mxu2 }
 0x7e2   :  { %2766 = vrcp.f32 %v1940_v45  ;;  %v1952_v62 = vand.u32 2147483648, %v1940_v45  ;;  %v1950_v8 = vand.u32 2147483647, %v1940_v45  ;;  %vm1946_vm4 = vweird.f32 %v1940_v45 }
 0x7e3   :  { %2768 = vrcp.f32 %v1960_v48  ;;  %v1972_v58 = vand.u32 2147483648, %v1960_v48  ;;  %vm1966_vm8 = vweird.f32 %v1960_v48  ;;  %v1970_v27 = vand.u32 2147483647, %v1960_v48 }
 0x7e4   :  { %v1953_v0 = vor.u32 1.1754944e-38, %v1952_v62  ;;  %vm1951_vm6 = vcmp.eq.f32.partialorder %v1950_v8, 8.507059e+37 }
 0x7e5   :  { %v1973_v41 = vor.u32 1.1754944e-38, %v1972_v58  ;;  %vm1971_vm10 = vcmp.eq.f32.partialorder %v1970_v27, 8.507059e+37  ;;  %v2086_v27 = vpop.permute.xlu2 %2085 }
 0x7e8   :  { %v2767_v1 = vpop.eup %2766 }
 0x7e9   :  { %v2769_v56 = vpop.eup %2768  ;;  %v1942_v14 = vmul.f32 %v2767_v1, %v1940_v45  ;;  %vm1947_vm3 = vweird.f32 %v2767_v1 }
 0x7ea   :  { %v1962_v51 = vmul.f32 %v2769_v56, %v1960_v48  ;;  %vm1948_vm5 = vmor %vm1946_vm4, %vm1947_vm3  ;;  %vm1967_vm7 = vweird.f32 %v2769_v56  ;;  %vm2087_vm4 = vcmp.eq.s32.totalorder %v2086_v27, 1 }
 0x7eb   :  { %v1943_v43 = vsub.f32 1.0, %v1942_v14  ;;  %vm1968_vm9 = vmor %vm1966_vm8, %vm1967_vm7 }
 0x7ec   :  { %v1963_v6 = vsub.f32 1.0, %v1962_v51 }
 0x7ed   :  { %v1944_v5 = vmul.f32 %v2767_v1, %v1943_v43 }
 0x7ee   :  { %v1964_v21 = vmul.f32 %v2769_v56, %v1963_v6 }
 0x7ef   :  { %v1945_v59 = vadd.f32 %v2767_v1, %v1944_v5 }
 0x7f0   :  { %v1965_v24 = vadd.f32 %v2769_v56, %v1964_v21 }
 0x7f1   :  { %v1949_v47 = vsel %vm1948_vm5, %v2767_v1, %v1945_v59 }
 0x7f2   :  { %v1954_v63 = vsel %vm1951_vm6, %v1953_v0, %v1949_v47  ;;  %v1969_v15 = vsel %vm1968_vm9, %v2769_v56, %v1965_v24  ;;  %v3984_v0 = vld [vmem:[#allocation41_spill] sm:$0xff] }
 0x7f3   :  { %v1976_v22 = vmul.f32 %v1954_v63, %v1933_v13  ;;  %v1974_v18 = vsel %vm1971_vm10, %v1973_v41, %v1969_v15 }
 0x7f4   :  { %v1979_v39 = vsub.f32 1.0, %v1974_v18  ;;  %v1981_v52 = vmul.f32 %v1974_v18, %v3853_v35 }
 0x7f5   :  { %v1977_v33 = vadd.f32 %v1976_v22, %v3981_v30 }
 0x7f7   :  { %2770 = vtanh.f32 %v1977_v33 }
 0x7fd   :  { %v2771_v49 = vpop.eup %2770 }
 0x7fe   :  { %v1980_v32 = vmul.f32 %v2771_v49, %v1979_v39 }
 0x800   :  { %v1982_v28 = vadd.f32 %v1981_v52, %v1980_v32  ;;  %v3985_v52 = vld [vmem:[#allocation30_spill] sm:$0xff] }
 0x801   :  { %v390_v3 = vadd.f32 %v3985_v52, %v3963_v12 }
 0x802   :  { %v3874_v25 = vsel %vm1988_vm11, %v1982_v28, %v3853_v35  ;;  %v3983_v35 = vld [vmem:[#allocation28_spill] sm:$0xff] }
 0x803   :  { %v1995_v26 = vpack.c.bf16 %v3874_v25, %v3874_v25 }
 0x805   :  { %2004 = vmatmul.bf16.vlgmr.msra.gmra.mxu3 %v1995_v26  ;;  %2017 = vmatmul.bf16.vlgmr.msra.gmra.mxu0 %v1995_v26 }
 0x806   :  { %2030 = vmatmul.bf16.vlgmr.msrb.gmra.mxu1 %v1995_v26 }
 0x882   :  { %v2018_v9 = vpop.f32.mrf.mxu0 }
 0x883   :  { %v2019_v61 = vadd.f32 %v2018_v9, %v3755_v31  ;;  %v2031_v11 = vpop.f32.mrf.mxu1 }
 0x884   :  { %v2032_v43 = vadd.f32 %v2031_v11, %v3758_v37 }
 0x885   :  { %v2055_v53 = vadd.f32 %v2019_v61, %v3982_v7  ;;  %v3986_v61 = vld [vmem:[#allocation44_spill] sm:$0xff] }
 0x887   :  { %v2572_v36 = vmul.f32 -1.442695, %v2055_v53 }
 0x888   :  { %v2005_v40 = vpop.f32.mrf.mxu3 }
 0x889   :  { %2772 = vpow2.f32 %v2572_v36  ;;  %v2006_v55 = vadd.f32 %v2005_v40, %v3645_v20 }
 0x88a   :  { %v2020_v4 = vpop.f32.mrf.mxu0 }
 0x88b   :  { %v2035_v50 = vadd.f32 %v2006_v55, %v3983_v35  ;;  %v2033_v44 = vpop.f32.mrf.mxu1 }
 0x88d   :  { %v2571_v57 = vmul.f32 -1.442695, %v2035_v50 }
 0x88f   :  { %v2773_v2 = vpop.eup %2772  ;;  %2774 = vpow2.f32 %v2571_v57 }
 0x890   :  { %v2059_v34 = vadd.f32 1.0, %v2773_v2  ;;  %v2007_v60 = vpop.f32.mrf.mxu3 }
 0x892   :  { %2776 = vrcp.f32 %v2059_v34  ;;  %v2071_v8 = vand.u32 2147483648, %v2059_v34  ;;  %vm2065_vm1 = vweird.f32 %v2059_v34  ;;  %v2069_v59 = vand.u32 2147483647, %v2059_v34 }
 0x894   :  { %v2072_v63 = vor.u32 1.1754944e-38, %v2071_v8  ;;  %vm2070_vm3 = vcmp.eq.f32.partialorder %v2069_v59, 8.507059e+37 }
 0x895   :  { %v2775_v16 = vpop.eup %2774 }
 0x896   :  { %v2039_v10 = vadd.f32 1.0, %v2775_v16 }
 0x898   :  { %2778 = vrcp.f32 %v2039_v10  ;;  %v2777_v38 = vpop.eup %2776  ;;  %v2051_v48 = vand.u32 2147483648, %v2039_v10  ;;  %v2049_v1 = vand.u32 2147483647, %v2039_v10  ;;  %vm2045_vm13 = vweird.f32 %v2039_v10 }
 0x899   :  { %v2061_v23 = vmul.f32 %v2777_v38, %v2059_v34  ;;  %vm2066_vm0 = vweird.f32 %v2777_v38 }
 0x89a   :  { %v2052_v51 = vor.u32 1.1754944e-38, %v2051_v48  ;;  %vm2050_vm15 = vcmp.eq.f32.partialorder %v2049_v1, 8.507059e+37  ;;  %vm2067_vm2 = vmor %vm2065_vm1, %vm2066_vm0 }
 0x89b   :  { %v2062_v42 = vsub.f32 1.0, %v2061_v23 }
 0x89d   :  { %v2063_v56 = vmul.f32 %v2777_v38, %v2062_v42 }
 0x89e   :  { %v2779_v54 = vpop.eup %2778 }
 0x89f   :  { %v2041_v46 = vmul.f32 %v2779_v54, %v2039_v10  ;;  %vm2046_vm12 = vweird.f32 %v2779_v54  ;;  %v2064_v62 = vadd.f32 %v2777_v38, %v2063_v56  ;;  %v3987_v56 = vld [vmem:[#allocation43_spill] sm:$0xff] }
 0x8a0   :  { %vm2047_vm14 = vmor %vm2045_vm13, %vm2046_vm12 }
 0x8a1   :  { %v2042_v45 = vsub.f32 1.0, %v2041_v46  ;;  %v2068_v47 = vsel %vm2067_vm2, %v2777_v38, %v2064_v62 }
 0x8a2   :  { %v2073_v24 = vsel %vm2070_vm3, %v2072_v63, %v2068_v47 }
 0x8a3   :  { %v2043_v29 = vmul.f32 %v2779_v54, %v2042_v45  ;;  %v2078_v58 = vsub.f32 1.0, %v2073_v24  ;;  %v2080_v33 = vmul.f32 %v2073_v24, %v3874_v25 }
 0x8a5   :  { %v2044_v14 = vadd.f32 %v2779_v54, %v2043_v29 }
 0x8a7   :  { %v2048_v6 = vsel %vm2047_vm14, %v2779_v54, %v2044_v14 }
 0x8a8   :  { %v2053_v5 = vsel %vm2050_vm15, %v2052_v51, %v2048_v6  ;;  %vm2208_vm15 = vcmask 64512  }
 0x8a9   :  { %v2075_v21 = vmul.f32 %v2053_v5, %v2032_v43 }
 0x8ab   :  { %v2076_v13 = vadd.f32 %v2075_v21, %v3984_v0  ;;  %v1423_v0 = vpop.permute.xlu1 %1422 }
 0x8ac   :  { %vm1424_vm14 = vcmp.eq.s32.totalorder %v1423_v0, 1 }
 0x8ad   :  { %2780 = vtanh.f32 %v2076_v13  ;;  %v1425_v47 = vsel %vm1424_vm14, %v3769_v19, %v3698_v17 }
 0x8b3   :  { %v2781_v22 = vpop.eup %2780 }
 0x8b4   :  { %v2079_v30 = vmul.f32 %v2781_v22, %v2078_v58 }
 0x8b6   :  { %v2081_v15 = vadd.f32 %v2080_v33, %v2079_v30 }
 0x8b8   :  { %v3886_v41 = vsel %vm2087_vm4, %v2081_v15, %v3874_v25 }
 0x8b9   :  { %v2094_v18 = vpack.c.bf16 %v3886_v41, %v3886_v41 }
 0x8bb   :  { %2103 = vmatmul.bf16.vlgmr.msrb.gmra.mxu2 %v2094_v18  ;;  %2116 = vmatmul.bf16.vlgmr.msrb.gmra.mxu3 %v2094_v18 }
 0x8bc   :  { %2129 = vmatmul.bf16.vlgmr.msrb.gmra.mxu0 %v2094_v18 }
 0x939   :  { %v2130_v39 = vpop.f32.mrf.mxu0 }
 0x93a   :  { %v2131_v54 = vadd.f32 %v2130_v39, %v3758_v37  ;;  %v2185_v37 = vpop.permute.xlu0 %2184 }
 0x93b   :  { %vm2186_vm13 = vcmp.eq.s32.totalorder %v2185_v37, 1 }
 0x93e   :  { %v2104_v49 = vpop.f32.mrf.mxu2  ;;  %v2117_v32 = vpop.f32.mrf.mxu3 }
 0x93f   :  { %v2105_v28 = vadd.f32 %v2104_v49, %v3645_v20  ;;  %v2118_v26 = vadd.f32 %v2117_v32, %v3755_v31 }
 0x941   :  { %v2134_v9 = vadd.f32 %v2105_v28, %v390_v3  ;;  %v2154_v25 = vadd.f32 %v2118_v26, %v3986_v61  ;;  %v2132_v11 = vpop.f32.mrf.mxu0 }
 0x943   :  { %v2573_v7 = vmul.f32 -1.442695, %v2134_v9  ;;  %v2574_v53 = vmul.f32 -1.442695, %v2154_v25 }
 0x945   :  { %2782 = vpow2.f32 %v2573_v7 }
 0x946   :  { %2784 = vpow2.f32 %v2574_v53  ;;  %v2106_v36 = vpop.f32.mrf.mxu2  ;;  %v2119_v40 = vpop.f32.mrf.mxu3 }
 0x94b   :  { %v2783_v55 = vpop.eup %2782 }
 0x94c   :  { %v2785_v4 = vpop.eup %2784  ;;  %v2138_v35 = vadd.f32 1.0, %v2783_v55 }
 0x94d   :  { %v2158_v50 = vadd.f32 1.0, %v2785_v4 }
 0x94e   :  { %2786 = vrcp.f32 %v2138_v35  ;;  %v2150_v2 = vand.u32 2147483648, %v2138_v35  ;;  %v2148_v16 = vand.u32 2147483647, %v2138_v35  ;;  %vm2144_vm6 = vweird.f32 %v2138_v35 }
 0x94f   :  { %2788 = vrcp.f32 %v2158_v50  ;;  %v2170_v48 = vand.u32 2147483648, %v2158_v50  ;;  %vm2164_vm10 = vweird.f32 %v2158_v50  ;;  %v2168_v1 = vand.u32 2147483647, %v2158_v50 }
 0x950   :  { %v2151_v23 = vor.u32 1.1754944e-38, %v2150_v2  ;;  %vm2149_vm8 = vcmp.eq.f32.partialorder %v2148_v16, 8.507059e+37 }
 0x951   :  { %v2171_v43 = vor.u32 1.1754944e-38, %v2170_v48  ;;  %vm2169_vm12 = vcmp.eq.f32.partialorder %v2168_v1, 8.507059e+37 }
 0x954   :  { %v2787_v12 = vpop.eup %2786 }
 0x955   :  { %v2789_v20 = vpop.eup %2788  ;;  %v2140_v44 = vmul.f32 %v2787_v12, %v2138_v35  ;;  %vm2145_vm5 = vweird.f32 %v2787_v12 }
 0x956   :  { %v2160_v31 = vmul.f32 %v2789_v20, %v2158_v50  ;;  %vm2146_vm7 = vmor %vm2144_vm6, %vm2145_vm5  ;;  %vm2165_vm9 = vweird.f32 %v2789_v20 }
 0x957   :  { %v2141_v57 = vsub.f32 1.0, %v2140_v44  ;;  %vm2166_vm11 = vmor %vm2164_vm10, %vm2165_vm9 }
 0x958   :  { %v2161_v34 = vsub.f32 1.0, %v2160_v31 }
 0x959   :  { %v2142_v60 = vmul.f32 %v2787_v12, %v2141_v57 }
 0x95a   :  { %v2162_v10 = vmul.f32 %v2789_v20, %v2161_v34 }
 0x95b   :  { %v2143_v38 = vadd.f32 %v2787_v12, %v2142_v60 }
 0x95c   :  { %v2163_v45 = vadd.f32 %v2789_v20, %v2162_v10 }
 0x95d   :  { %v2147_v46 = vsel %vm2146_vm7, %v2787_v12, %v2143_v38 }
 0x95e   :  { %v2152_v42 = vsel %vm2149_vm8, %v2151_v23, %v2147_v46  ;;  %v2167_v51 = vsel %vm2166_vm11, %v2789_v20, %v2163_v45 }
 0x95f   :  { %v2174_v29 = vmul.f32 %v2152_v42, %v2131_v54  ;;  %v2172_v6 = vsel %vm2169_vm12, %v2171_v43, %v2167_v51 }
 0x960   :  { %v2177_v62 = vsub.f32 1.0, %v2172_v6  ;;  %v2179_v21 = vmul.f32 %v2172_v6, %v3886_v41 }
 0x961   :  { %v2175_v14 = vadd.f32 %v2174_v29, %v3987_v56 }
 0x963   :  { %2790 = vtanh.f32 %v2175_v14 }
 0x969   :  { %v2791_v5 = vpop.eup %2790 }
 0x96a   :  { %v2178_v8 = vmul.f32 %v2791_v5, %v2177_v62 }
 0x96c   :  { %v2180_v59 = vadd.f32 %v2179_v21, %v2178_v8 }
 0x96e   :  { %v2187_v13 = vsel %vm2186_vm13, %v2180_v59, %v3886_v41 }
 0x96f   :  { %2203 = vmatpush.xpose.msra.mxu1 %v2187_v13 }
 0x972   :  { %2204 = vmatmul.f32.vlgmr.msra.gmra.mxu1 %v1425_v47 }
 0x9ef   :  { %v2205_v63 = vpop.f32.mrf.mxu1 }
 0x9f0   :  { %2209 = vst.msk [vmem:[#allocation10] sm:$0xff] %vm2208_vm15, %v2205_v63 }
 0x9f1   :  { %2220 = dma.vmem_to_hbm [thread:$0]  %s2216_s20, 128, %s2218_s22, [#allocation6]  }
 0x9f2   :  { %2893 = dma.done.wait [#allocation6], 128  }
 0x9f3   :  { %2894 = vsyncadd [#allocation6], 4294967168 }
 0x9f4   :  { %2225 = vsyncpa [#allocation5], 1 }
 0x9f5   :  { %2226 = vsyncpa [#allocation8], 1 }
 0x9f6   :  { %2227 = vsyncpa [#allocation6], 1 }

</bundles_post_ra>
